<compile_context>
chip_gen: v7x
topology: tpu7x:2x2x1
jax: 0.10.0
libtpu: 0.0.40
codegen_flags: <defaults>
</compile_context>

<pallas_src>
import functools

import jax
import jax.numpy as jnp
from jax.experimental import pallas as pl
from jax.experimental.pallas import tpu as pltpu


# --------------------------------------------------------------------------------------
# Shared in-kernel helpers
# --------------------------------------------------------------------------------------
def _accumulate_neighbors(neigh_ref, acc_ref):
    """acc_ref (block_b, D_in) f32  +=  sum over the N axis of the current neighbor chunk."""
    block_n = neigh_ref.shape[1]
    if block_n <= 32:
        # Small chunk: single sublane/XLU reduction (f32 accumulation; neigh may be bf16).
        acc_ref[...] += jnp.sum(neigh_ref[...].astype(jnp.float32), axis=1)
    else:
        # Large chunk: reduce in sub-chunks so the f32 upcast intermediates stay bounded.
        sub = 16
        nsub = block_n // sub

        def body(s, carry):
            start = pl.multiple_of(s * sub, sub)
            acc_ref[...] += jnp.sum(
                neigh_ref[:, pl.ds(start, sub), :].astype(jnp.float32), axis=1)
            return carry

        jax.lax.fori_loop(0, nsub, body, 0, unroll=True)
        rem = block_n - nsub * sub
        if rem:
            acc_ref[...] += jnp.sum(
                neigh_ref[:, pl.ds(nsub * sub, rem), :].astype(jnp.float32), axis=1)


def _linear_relu(means, w_ref, b_ref, mxu_dtype):
    """means (block_b, D_in) f32 -> relu(means @ W + b), f32 accumulation on the MXU."""
    res = jnp.dot(means.astype(mxu_dtype), w_ref[...].astype(mxu_dtype),
                  preferred_element_type=jnp.float32)
    res = res + b_ref[...].astype(jnp.float32)
    return jnp.maximum(res, 0.0)


# --------------------------------------------------------------------------------------
# Fused path: whole batch resident in VMEM, single pallas_call, grid only over N-chunks.
# --------------------------------------------------------------------------------------
def _fused_kernel(self_ref, neigh_ref, w_ref, b_ref, gamma_ref, beta_ref,
                  out_ref, acc_ref, *, n_total, inv_batch, eps, mxu_dtype):
    ik = pl.program_id(0)

    @pl.when(ik == 0)
    def _():
        acc_ref[...] = jnp.zeros_like(acc_ref)

    _accumulate_neighbors(neigh_ref, acc_ref)

    @pl.when(ik == pl.num_programs(0) - 1)
    def _():
        means = (acc_ref[...] + self_ref[...].astype(jnp.float32)) * (1.0 / (n_total + 1))
        res = _linear_relu(means, w_ref, b_ref, mxu_dtype)
        # BatchNorm1d (training-mode batch statistics, biased variance).
        # Two-pass (centered) variance: the whole batch is resident, so this is cheap and
        # avoids the E[x^2]-E[x]^2 cancellation concern.
        mu = jnp.sum(res, axis=0, keepdims=True) * inv_batch
        d = res - mu
        var = jnp.sum(d * d, axis=0, keepdims=True) * inv_batch
        rstd = jax.lax.rsqrt(var + eps)
        out_ref[...] = (d * (gamma_ref[...] * rstd) + beta_ref[...]).astype(out_ref.dtype)


# --------------------------------------------------------------------------------------
# Two-stage path (large B): stage 1 tiles the batch and emits partial BN statistics,
# stage 2 finalizes the global statistics and normalizes each batch tile.
# --------------------------------------------------------------------------------------
def _stage1_kernel(self_ref, neigh_ref, w_ref, b_ref,
                   res_ref, psum_ref, psumsq_ref, acc_ref, *, n_total, mxu_dtype):
    ik = pl.program_id(1)

    @pl.when(ik == 0)
    def _():
        acc_ref[...] = jnp.zeros_like(acc_ref)

    _accumulate_neighbors(neigh_ref, acc_ref)

    @pl.when(ik == pl.num_programs(1) - 1)
    def _():
        means = (acc_ref[...] + self_ref[...].astype(jnp.float32)) * (1.0 / (n_total + 1))
        res = _linear_relu(means, w_ref, b_ref, mxu_dtype)
        res_ref[...] = res.astype(res_ref.dtype)
        # Per-B-tile partial statistics (finalized globally in stage 2). Stats are computed
        # from the f32 `res` before any downcast of the stored activations.
        psum_ref[...] = jnp.sum(res, axis=0, keepdims=True)[None]          # (1, 1, D_out)
        psumsq_ref[...] = jnp.sum(res * res, axis=0, keepdims=True)[None]  # (1, 1, D_out)


def _stage2_kernel(res_ref, psum_ref, psumsq_ref, gamma_ref, beta_ref, out_ref,
                   *, inv_batch, eps):
    mean = jnp.sum(psum_ref[...], axis=0) * inv_batch        # (1, D_out)
    ex2 = jnp.sum(psumsq_ref[...], axis=0) * inv_batch       # (1, D_out)
    # TODO(synk): E[x^2]-E[x]^2 can cancel if |mean| >> std; fine for post-ReLU unit-scale
    # activations — switch to a Welford merge of per-tile stats for extreme scales.
    var = jnp.maximum(ex2 - mean * mean, 0.0)
    rstd = jax.lax.rsqrt(var + eps)
    res = res_ref[...].astype(jnp.float32)
    out_ref[...] = ((res - mean) * (gamma_ref[...] * rstd) + beta_ref[...]).astype(out_ref.dtype)


# --------------------------------------------------------------------------------------
# Wrapper
# --------------------------------------------------------------------------------------
def _choose_block_n(N, block_b, d_in, itemsize, budget_bytes, sublane_pack):
    """Largest legal N-chunk whose double-buffered neighbor tile fits the budget."""
    candidates = [N] + [c for c in range(sublane_pack, N, sublane_pack) if N % c == 0]
    fitting = [c for c in candidates if 2 * block_b * c * d_in * itemsize <= budget_bytes]
    if fitting:
        return max(fitting)
    return min(candidates)


def mean_aggregator(self_vecs, neigh_vecs, weight_t, bias, gamma, beta, *,
                    block_b=None, block_n=None, fuse_bn=None, eps=1e-5,
                    mxu_dtype=jnp.float32, vmem_limit_bytes=32 * 1024 * 1024):
    """self_vecs: (B, D_in), neigh_vecs: (B, N, D_in) (f32 or bf16),
    weight_t: (D_in, D_out) -- nn.Linear weight, pre-transposed once at setup,
    bias/gamma/beta: (D_out,).
    mxu_dtype=jnp.bfloat16 selects the native MXU fast path (f32 accumulation) at a small
    numerical cost; default f32 matches PyTorch float32 numerics."""
    B, D_in = self_vecs.shape
    _, N, _ = neigh_vecs.shape
    D_out = weight_t.shape[1]

    b2 = bias.reshape(1, D_out).astype(jnp.float32)
    g2 = gamma.reshape(1, D_out).astype(jnp.float32)
    be2 = beta.reshape(1, D_out).astype(jnp.float32)

    neigh_item = neigh_vecs.dtype.itemsize
    sublane_pack = 16 if neigh_item == 2 else 8

    # Decide whether to fuse BatchNorm into a single pass: requires the full-batch
    # accumulator / activations (plus weights, excluding the streamed neighbor tiles) to fit
    # comfortably in VMEM.  Two-stage is kept for large B (and 2-TC batch sharding on v7x).
    fused_resident_bytes = (3 * B * D_in + 6 * B * D_out + 2 * D_in * D_out) * 4
    if fuse_bn is None:
        fuse_bn = fused_resident_bytes <= vmem_limit_bytes // 4

    # Batch tile.
    if fuse_bn:
        bb = B
    else:
        bb = block_b if block_b is not None else min(B, 256)  # 256 fills v6e/v7x's MXU in M
        if bb <= 0 or B % bb != 0:
            bb = B

    # Neighbor N-chunk: as large as the VMEM budget allows (fewer grid steps, bigger DMAs).
    neigh_budget = vmem_limit_bytes // 3
    bn_ = block_n
    if bn_ is None:
        bn_ = _choose_block_n(N, bb, D_in, neigh_item, neigh_budget, sublane_pack)
    if bn_ >= N or N % bn_ != 0 or bn_ % sublane_pack != 0:
        bn_ = N
    nk = N // bn_

    if fuse_bn:
        return pl.pallas_call(
            functools.partial(_fused_kernel, n_total=N, inv_batch=1.0 / B, eps=eps,
                              mxu_dtype=mxu_dtype),
            out_shape=jax.ShapeDtypeStruct((B, D_out), jnp.float32),
            grid_spec=pltpu.PrefetchScalarGridSpec(
                num_scalar_prefetch=0,
                grid=(nk,),
                in_specs=[
                    pl.BlockSpec((B, D_in), lambda ik: (0, 0)),
                    pl.BlockSpec((B, bn_, D_in), lambda ik: (0, ik, 0)),
                    pl.BlockSpec((D_in, D_out), lambda ik: (0, 0)),
                    pl.BlockSpec((1, D_out), lambda ik: (0, 0)),
                    pl.BlockSpec((1, D_out), lambda ik: (0, 0)),
                    pl.BlockSpec((1, D_out), lambda ik: (0, 0)),
                ],
                out_specs=pl.BlockSpec((B, D_out), lambda ik: (0, 0)),
                scratch_shapes=[pltpu.VMEM((B, D_in), jnp.float32)],
            ),
            compiler_params=pltpu.CompilerParams(
                dimension_semantics=("arbitrary",),
                vmem_limit_bytes=vmem_limit_bytes),
        )(self_vecs, neigh_vecs, weight_t, b2, g2, be2)

    # ---------------- Two-stage path (large B) ----------------
    nb = B // bb

    res, psum, psumsq = pl.pallas_call(
        functools.partial(_stage1_kernel, n_total=N, mxu_dtype=mxu_dtype),
        out_shape=(
            jax.ShapeDtypeStruct((B, D_out), jnp.float32),        # pre-BN activations
            jax.ShapeDtypeStruct((nb, 1, D_out), jnp.float32),    # per-tile sum
            jax.ShapeDtypeStruct((nb, 1, D_out), jnp.float32),    # per-tile sum of squares
        ),
        grid_spec=pltpu.PrefetchScalarGridSpec(
            num_scalar_prefetch=0,
            grid=(nb, nk),
            in_specs=[
                pl.BlockSpec((bb, D_in), lambda ib, ik: (ib, 0)),
                pl.BlockSpec((bb, bn_, D_in), lambda ib, ik: (ib, ik, 0)),
                pl.BlockSpec((D_in, D_out), lambda ib, ik: (0, 0)),
                pl.BlockSpec((1, D_out), lambda ib, ik: (0, 0)),
            ],
            out_specs=(
                pl.BlockSpec((bb, D_out), lambda ib, ik: (ib, 0)),
                pl.BlockSpec((1, 1, D_out), lambda ib, ik: (ib, 0, 0)),
                pl.BlockSpec((1, 1, D_out), lambda ib, ik: (ib, 0, 0)),
            ),
            scratch_shapes=[pltpu.VMEM((bb, D_in), jnp.float32)],
        ),
        compiler_params=pltpu.CompilerParams(
            dimension_semantics=("parallel", "arbitrary"),
            vmem_limit_bytes=vmem_limit_bytes),
    )(self_vecs, neigh_vecs, weight_t, b2)

    out = pl.pallas_call(
        functools.partial(_stage2_kernel, inv_batch=1.0 / B, eps=eps),
        out_shape=jax.ShapeDtypeStruct((B, D_out), jnp.float32),
        grid_spec=pltpu.PrefetchScalarGridSpec(
            num_scalar_prefetch=0,
            grid=(nb,),
            in_specs=[
                pl.BlockSpec((bb, D_out), lambda ib: (ib, 0)),
                pl.BlockSpec((nb, 1, D_out), lambda ib: (0, 0, 0)),
                pl.BlockSpec((nb, 1, D_out), lambda ib: (0, 0, 0)),
                pl.BlockSpec((1, D_out), lambda ib: (0, 0)),
                pl.BlockSpec((1, D_out), lambda ib: (0, 0)),
            ],
            out_specs=pl.BlockSpec((bb, D_out), lambda ib: (ib, 0)),
        ),
        input_output_aliases={0: 0},   # reuse the `res` HBM buffer for the final output
        compiler_params=pltpu.CompilerParams(
            dimension_semantics=("parallel",),
            vmem_limit_bytes=vmem_limit_bytes),
    )(res, psum, psumsq, g2, be2)

    return out


def mean_aggregator_ref(self_vecs, neigh_vecs, weight, bias, gamma, beta, eps=1e-5):
    """Pure-JAX reference (weight in PyTorch nn.Linear layout (D_out, D_in))."""
    t1 = jnp.concatenate([neigh_vecs, self_vecs[:, None, :]], axis=1)
    means = jnp.mean(t1, axis=1)
    res = means @ weight.T + bias
    res = jnp.maximum(res, 0.0)
    mu = jnp.mean(res, axis=0, keepdims=True)
    var = jnp.mean((res - mu) ** 2, axis=0, keepdims=True)
    return (res - mu) / jnp.sqrt(var + eps) * gamma + beta


if __name__ == "__main__":
    # Lane-dense, batched shapes: D_in = D_out = 128, B = 256, N = 16 (whole N in one chunk).
    B, N, D_in, D_out = 256, 16, 128, 128

    key = jax.random.PRNGKey(0)
    k1, k2, k3, k4 = jax.random.split(key, 4)

    self_vecs = jax.random.normal(k1, (B, D_in), dtype=jnp.float32)
    neigh_vecs = jax.random.normal(k2, (B, N, D_in), dtype=jnp.float32)

    # Parameters (PyTorch nn.Linear layout: weight (D_out, D_in), bias (D_out,);
    # BatchNorm1d default affine params gamma=1, beta=0).
    bound = 1.0 / (D_in ** 0.5)
    weight = jax.random.uniform(k3, (D_out, D_in), jnp.float32, -bound, bound)
    bias = jax.random.uniform(k4, (D_out,), jnp.float32, -bound, bound)
    gamma = jnp.ones((D_out,), jnp.float32)
    beta = jnp.zeros((D_out,), jnp.float32)

    # Pre-transpose the weight ONCE at parameter-setup time (stored layout), not per call.
    weight_t = weight.T  # (D_in, D_out)

    ref = mean_aggregator_ref(self_vecs, neigh_vecs, weight, bias, gamma, beta)

    # 1) Fused single-kernel path (auto-selected: batch fits VMEM), f32 MXU.
    run_fused = jax.jit(mean_aggregator)
    out_fused = jax.block_until_ready(
        run_fused(self_vecs, neigh_vecs, weight_t, bias, gamma, beta))
    assert out_fused.shape == (B, D_out)
    err_f = float(jnp.max(jnp.abs(out_fused - ref)))
    assert jnp.allclose(out_fused, ref, atol=2e-3, rtol=2e-3), \
        f"fused path mismatch vs reference, max_err={err_f}"

    # 2) Two-stage path (forced, as used for large B), exercising the partial-stats
    #    reduction and the input/output-aliased BN finalization.
    run_two_stage = jax.jit(functools.partial(mean_aggregator, fuse_bn=False, block_b=128))
    out_2s = jax.block_until_ready(
        run_two_stage(self_vecs, neigh_vecs, weight_t, bias, gamma, beta))
    err_2s = float(jnp.max(jnp.abs(out_2s - ref)))
    assert jnp.allclose(out_2s, ref, atol=2e-3, rtol=2e-3), \
        f"two-stage path mismatch vs reference, max_err={err_2s}"

    # 3) bf16-MXU fast path (looser tolerance: bf16 operands, f32 accumulation).
    run_bf16 = jax.jit(functools.partial(mean_aggregator, mxu_dtype=jnp.bfloat16))
    out_bf16 = jax.block_until_ready(
        run_bf16(self_vecs, neigh_vecs, weight_t, bias, gamma, beta))
    err_b = float(jnp.max(jnp.abs(out_bf16 - ref)))
    assert jnp.allclose(out_bf16, ref, atol=5e-2, rtol=5e-2), \
        f"bf16-MXU path mismatch vs reference, max_err={err_b}"

    print("KERNEL_OK")
</pallas_src>

<mosaic_0001>
module attributes {stable_mosaic.version = 11 : i64} {
  func.func @_fused_kernel(%arg0: i32, %arg1: memref<256x128xf32, #tpu.memory_space<vmem>>, %arg2: memref<256x16x128xf32, #tpu.memory_space<vmem>>, %arg3: memref<128x128xf32, #tpu.memory_space<vmem>>, %arg4: memref<1x128xf32, #tpu.memory_space<vmem>>, %arg5: memref<1x128xf32, #tpu.memory_space<vmem>>, %arg6: memref<1x128xf32, #tpu.memory_space<vmem>>, %arg7: memref<256x128xf32, #tpu.memory_space<vmem>>, %arg8: memref<256x128xf32, #tpu.memory_space<vmem>>) attributes {dimension_semantics = [#tpu.dimension_semantics<arbitrary>], iteration_bounds = array<i64: 1>, scalar_prefetch = 0 : i64, scratch_operands = 1 : i64, tpu.core_type = #tpu.core_type<tc>, window_params = [{pipeline_mode = #tpu.pipeline_mode<synchronous>, transform_indices = @transform_0, window_bounds = array<i64: 256, 128>}, {transform_indices = @transform_1, window_bounds = array<i64: 256, 16, 128>}, {pipeline_mode = #tpu.pipeline_mode<synchronous>, transform_indices = @transform_2, window_bounds = array<i64: 128, 128>}, {pipeline_mode = #tpu.pipeline_mode<synchronous>, transform_indices = @transform_3, window_bounds = array<i64: 1, 128>}, {pipeline_mode = #tpu.pipeline_mode<synchronous>, transform_indices = @transform_4, window_bounds = array<i64: 1, 128>}, {pipeline_mode = #tpu.pipeline_mode<synchronous>, transform_indices = @transform_5, window_bounds = array<i64: 1, 128>}, {pipeline_mode = #tpu.pipeline_mode<synchronous>, transform_indices = @transform_6, window_bounds = array<i64: 256, 128>}]} {
    %c0_i32 = arith.constant 0 : i32
    %0 = arith.cmpi eq, %arg0, %c0_i32 : i32
    %1 = arith.extui %0 : i1 to i32
    %c0_i32_0 = arith.constant 0 : i32
    %2 = arith.cmpi ne, %1, %c0_i32_0 : i32
    scf.if %2 {
      %cst_9 = arith.constant 0.000000e+00 : f32
      %11 = vector.broadcast %cst_9 : f32 to vector<256x128xf32>
      %c0_10 = arith.constant 0 : index
      %c0_11 = arith.constant 0 : index
      %12 = vector.load %arg8[%c0_10, %c0_11] : memref<256x128xf32, #tpu.memory_space<vmem>>, vector<256x128xf32>
      tpu.vector_store %arg8[%c0_10, %c0_11], %11 {strides = array<i32>} : memref<256x128xf32, #tpu.memory_space<vmem>>, vector<256x128xf32>,
    } else {
    }
    %c0 = arith.constant 0 : index
    %c0_1 = arith.constant 0 : index
    %3 = vector.load %arg8[%c0, %c0_1] : memref<256x128xf32, #tpu.memory_space<vmem>>, vector<256x128xf32>
    %c0_2 = arith.constant 0 : index
    %c0_3 = arith.constant 0 : index
    %c0_4 = arith.constant 0 : index
    %4 = vector.load %arg2[%c0_2, %c0_3, %c0_4] : memref<256x16x128xf32, #tpu.memory_space<vmem>>, vector<256x16x128xf32>
    %cst = arith.constant dense<0.000000e+00> : vector<256x128xf32>
    %5 = vector.multi_reduction <add>, %4, %cst [1] : vector<256x16x128xf32> to vector<256x128xf32>
    %6 = arith.addf %3, %5 : vector<256x128xf32>
    %c0_5 = arith.constant 0 : index
    %c0_6 = arith.constant 0 : index
    %7 = vector.load %arg8[%c0_5, %c0_6] : memref<256x128xf32, #tpu.memory_space<vmem>>, vector<256x128xf32>
    tpu.vector_store %arg8[%c0_5, %c0_6], %6 {strides = array<i32>} : memref<256x128xf32, #tpu.memory_space<vmem>>, vector<256x128xf32>,
    %c0_i32_7 = arith.constant 0 : i32
    %8 = arith.cmpi eq, %arg0, %c0_i32_7 : i32
    %9 = arith.extui %8 : i1 to i32
    %c0_i32_8 = arith.constant 0 : i32
    %10 = arith.cmpi ne, %9, %c0_i32_8 : i32
    scf.if %10 {
      %c0_9 = arith.constant 0 : index
      %c0_10 = arith.constant 0 : index
      %11 = vector.load %arg8[%c0_9, %c0_10] : memref<256x128xf32, #tpu.memory_space<vmem>>, vector<256x128xf32>
      %c0_11 = arith.constant 0 : index
      %c0_12 = arith.constant 0 : index
      %12 = vector.load %arg1[%c0_11, %c0_12] : memref<256x128xf32, #tpu.memory_space<vmem>>, vector<256x128xf32>
      %13 = arith.addf %11, %12 : vector<256x128xf32>
      %cst_13 = arith.constant 0.0588235296 : f32
      %14 = vector.broadcast %cst_13 : f32 to vector<256x128xf32>
      %15 = arith.mulf %13, %14 : vector<256x128xf32>
      %c0_14 = arith.constant 0 : index
      %c0_15 = arith.constant 0 : index
      %16 = vector.load %arg3[%c0_14, %c0_15] : memref<128x128xf32, #tpu.memory_space<vmem>>, vector<128x128xf32>
      %cst_16 = arith.constant dense<0.000000e+00> : vector<256x128xf32>
      %17 = tpu.matmul %15, %16, %cst_16 {dimension_numbers = #tpu.dot_dimension_numbers<[1], [0], [0], [1], [0, 0, 1, 1], [], []>} : vector<256x128xf32>, vector<128x128xf32>, vector<256x128xf32> -> vector<256x128xf32>
      %c0_17 = arith.constant 0 : index
      %c0_18 = arith.constant 0 : index
      %18 = vector.load %arg4[%c0_17, %c0_18] : memref<1x128xf32, #tpu.memory_space<vmem>>, vector<1x128xf32>
      %19 = vector.broadcast %18 : vector<1x128xf32> to vector<256x128xf32>
      %20 = arith.addf %17, %19 : vector<256x128xf32>
      %cst_19 = arith.constant 0.000000e+00 : f32
      %21 = vector.broadcast %cst_19 : f32 to vector<256x128xf32>
      %22 = arith.maximumf %20, %21 : vector<256x128xf32>
      %cst_20 = arith.constant dense<0.000000e+00> : vector<128xf32>
      %23 = vector.multi_reduction <add>, %22, %cst_20 [0] : vector<256x128xf32> to vector<128xf32>
      %24 = vector.shape_cast %23 : vector<128xf32> to vector<1x128xf32>
      %cst_21 = arith.constant 3.906250e-03 : f32
      %25 = vector.broadcast %cst_21 : f32 to vector<1x128xf32>
      %26 = arith.mulf %24, %25 : vector<1x128xf32>
      %27 = vector.broadcast %26 : vector<1x128xf32> to vector<256x128xf32>
      %28 = arith.subf %22, %27 : vector<256x128xf32>
      %29 = arith.mulf %28, %28 : vector<256x128xf32>
      %cst_22 = arith.constant dense<0.000000e+00> : vector<128xf32>
      %30 = vector.multi_reduction <add>, %29, %cst_22 [0] : vector<256x128xf32> to vector<128xf32>
      %31 = vector.shape_cast %30 : vector<128xf32> to vector<1x128xf32>
      %cst_23 = arith.constant 3.906250e-03 : f32
      %32 = vector.broadcast %cst_23 : f32 to vector<1x128xf32>
      %33 = arith.mulf %31, %32 : vector<1x128xf32>
      %cst_24 = arith.constant 9.99999974E-6 : f32
      %34 = vector.broadcast %cst_24 : f32 to vector<1x128xf32>
      %35 = arith.addf %33, %34 : vector<1x128xf32>
      %36 = math.rsqrt %35 : vector<1x128xf32>
      %c0_25 = arith.constant 0 : index
      %c0_26 = arith.constant 0 : index
      %37 = vector.load %arg5[%c0_25, %c0_26] : memref<1x128xf32, #tpu.memory_space<vmem>>, vector<1x128xf32>
      %38 = arith.mulf %37, %36 : vector<1x128xf32>
      %39 = vector.broadcast %38 : vector<1x128xf32> to vector<256x128xf32>
      %40 = arith.mulf %28, %39 : vector<256x128xf32>
      %c0_27 = arith.constant 0 : index
      %c0_28 = arith.constant 0 : index
      %41 = vector.load %arg6[%c0_27, %c0_28] : memref<1x128xf32, #tpu.memory_space<vmem>>, vector<1x128xf32>
      %42 = vector.broadcast %41 : vector<1x128xf32> to vector<256x128xf32>
      %43 = arith.addf %40, %42 : vector<256x128xf32>
      %c0_29 = arith.constant 0 : index
      %c0_30 = arith.constant 0 : index
      %44 = vector.load %arg7[%c0_29, %c0_30] : memref<256x128xf32, #tpu.memory_space<vmem>>, vector<256x128xf32>
      tpu.vector_store %arg7[%c0_29, %c0_30], %43 {strides = array<i32>} : memref<256x128xf32, #tpu.memory_space<vmem>>, vector<256x128xf32>,
    } else {
    }
    return
  }
  func.func @transform_0(%arg0: i32) -> (i32, i32) {
    %c0_i32 = arith.constant 0 : i32
    %c0_i32_0 = arith.constant 0 : i32
    %c0_i32_1 = arith.constant 0 : i32
    return %c0_i32, %c0_i32_0 : i32, i32
  }
  func.func @transform_1(%arg0: i32) -> (i32, i32, i32) {
    %c0_i32 = arith.constant 0 : i32
    %c0_i32_0 = arith.constant 0 : i32
    %c0_i32_1 = arith.constant 0 : i32
    return %c0_i32, %arg0, %c0_i32_0 : i32, i32, i32
  }
  func.func @transform_2(%arg0: i32) -> (i32, i32) {
    %c0_i32 = arith.constant 0 : i32
    %c0_i32_0 = arith.constant 0 : i32
    %c0_i32_1 = arith.constant 0 : i32
    return %c0_i32, %c0_i32_0 : i32, i32
  }
  func.func @transform_3(%arg0: i32) -> (i32, i32) {
    %c0_i32 = arith.constant 0 : i32
    %c0_i32_0 = arith.constant 0 : i32
    %c0_i32_1 = arith.constant 0 : i32
    return %c0_i32, %c0_i32_0 : i32, i32
  }
  func.func @transform_4(%arg0: i32) -> (i32, i32) {
    %c0_i32 = arith.constant 0 : i32
    %c0_i32_0 = arith.constant 0 : i32
    %c0_i32_1 = arith.constant 0 : i32
    return %c0_i32, %c0_i32_0 : i32, i32
  }
  func.func @transform_5(%arg0: i32) -> (i32, i32) {
    %c0_i32 = arith.constant 0 : i32
    %c0_i32_0 = arith.constant 0 : i32
    %c0_i32_1 = arith.constant 0 : i32
    return %c0_i32, %c0_i32_0 : i32, i32
  }
  func.func @transform_6(%arg0: i32) -> (i32, i32) {
    %c0_i32 = arith.constant 0 : i32
    %c0_i32_0 = arith.constant 0 : i32
    %c0_i32_1 = arith.constant 0 : i32
    return %c0_i32, %c0_i32_0 : i32, i32
  }
}

</mosaic_0001>

<bundles_post_ra>
// kernel: mean_aggregator.1
= control target key start
LH: loop header
LB: loop body
LE: loop exit
PB: predicated region body
PF: predicated region fallthrough
CT: control target
= control target key end

     0   :  { %11 = vsyncpa [#allocation4], 0  ;;  %s5025_s0 = inlined_call_operand.hbm [shape: f32[256,128], index: 0, kind: input, shape index: {}]   ;;  %s5026_s1 = inlined_call_operand.hbm [shape: f32[256,16,128], index: 1, kind: input, shape index: {}]   ;;  %s5027_s2 = inlined_call_operand.hbm [shape: f32[128,128], index: 2, kind: input, shape index: {}]   ;;  %s5028_s3 = inlined_call_operand.hbm [shape: f32[1,128], index: 3, kind: input, shape index: {}]   ;;  %s5029_s4 = inlined_call_operand.hbm [shape: f32[1,128], index: 4, kind: input, shape index: {}]   ;;  %s5030_s5 = inlined_call_operand.hbm [shape: f32[1,128], index: 5, kind: input, shape index: {}]   ;;  %s5031_s6 = inlined_call_operand.hbm [shape: f32[256,128], index: 6, kind: output, shape index: {}]  }
   0x1   :  { %12 = vsyncpa [#allocation7], 0 }
   0x2   :  { %13 = vsyncpa [#allocation10], 0 }
   0x3   :  { %14 = vsyncpa [#allocation13], 0 }
   0x4   :  { %15 = vsyncpa [#allocation5], 0  ;;  %s4092_s21 = smov [#allocation6]   ;;  %s4093_s23 = smov [#allocation9]  }
   0x5   :  { %s33_s22 = sshll.u32 %s4092_s21, 4  ;;  %s58_s24 = sshll.u32 %s4093_s23, 4  ;;  %s34_s22 = int_to_ptr.vmem [resolvable:$true] %s33_s22  ;;  %s4136_s24 = int_to_ptr.vmem [resolvable:$true] %s58_s24 }
   0x6   :  { %s3928_s27 = scalar_lea.hbm %s5026_s1, 65536 }
   0x7   :  { %p3929_p0 = scmp.ne.s32.totalorder %s5026_s1, %s3928_s27  ;;  %p3932_p1 = scmp.lt.u32.totalorder %s3928_s27, %s5026_s1 }
   0x9   :  { %p3934_p2 = pnand %p3932_p1, %p3929_p0 }
   0xb   :  { %3937 = shalt.err (!%p3934_p2)
}
   0xc   :  { %s3938_s8 = scalar_lea.vmem %s34_s22, 65536  ;;  %p3943_p4 = scmp.lt.s32.totalorder %s34_s22, %s34_s22 }
   0xd   :  { %p3939_p3 = scmp.ne.s32.totalorder %s34_s22, %s3938_s8  ;;  %p3944_p5 = scmp.lt.s32.totalorder %s3938_s8, %s3938_s8 }
   0xf   :  { %p3945_p6 = por %p3944_p5, %p3943_p4 }
  0x11   :  { %p3946_p7 = pnand %p3945_p6, %p3939_p3 }
  0x13   :  { %3949 = shalt.err (!%p3946_p7)
}
  0x14   :  { %s4094_s9 = smov 128   ;;  %s4095_s10 = smov 8  }
  0x15   :  { %39 = dma.hbm_to_vmem [thread:$0]  %s5026_s1, 65536, %s34_s22, [#allocation7], %s4094_s9, %s4094_s9, %s4095_s10  }
  0x16   :  { %s3950_s15 = scalar_lea.hbm %s5028_s3, 16 }
  0x17   :  { %p3951_p8 = scmp.ne.s32.totalorder %s5028_s3, %s3950_s15  ;;  %p3954_p9 = scmp.lt.u32.totalorder %s3950_s15, %s5028_s3 }
  0x19   :  { %p3956_p10 = pnand %p3954_p9, %p3951_p8 }
  0x1b   :  { %3959 = shalt.err (!%p3956_p10)
}
  0x1c   :  { %s3960_s20 = scalar_lea.vmem %s4136_s24, 16  ;;  %s3964_s1 = scalar_lea.vmem %s4136_s24, 32 }
  0x1d   :  { %p3961_p11 = scmp.ne.s32.totalorder %s4136_s24, %s3960_s20  ;;  %p3965_p12 = scmp.lt.s32.totalorder %s4136_s24, %s4136_s24 }
  0x1e   :  { %p3966_p13 = scmp.lt.s32.totalorder %s3964_s1, %s3960_s20 }
  0x20   :  { %p3967_p0 = por %p3966_p13, %p3965_p12 }
  0x22   :  { %p3968_p1 = pnand %p3967_p0, %p3961_p11 }
  0x24   :  { %3971 = shalt.err (!%p3968_p1)
}
  0x25   :  { %61 = dma.hbm_to_vmem [thread:$0]  %s5028_s3, 16, %s4136_s24, [#allocation10]  }
  0x26   :  { %s4096_s23 = smov [#allocation3]   ;;  %s4097_s26 = smov [#allocation8]  }
  0x27   :  { %s21_s25 = sshll.u32 %s4096_s23, 4  ;;  %s45_s27 = sshll.u32 %s4097_s26, 4  ;;  %s22_s25 = int_to_ptr.vmem [resolvable:$true] %s21_s25  ;;  %s4171_s27 = int_to_ptr.vmem [resolvable:$true] %s45_s27 }
  0x28   :  { %s3972_s30 = scalar_lea.hbm %s5025_s0, 4096 }
  0x29   :  { %p3973_p2 = scmp.ne.s32.totalorder %s5025_s0, %s3972_s30  ;;  %p3976_p3 = scmp.lt.u32.totalorder %s3972_s30, %s5025_s0 }
  0x2b   :  { %p3978_p4 = pnand %p3976_p3, %p3973_p2 }
  0x2d   :  { %3981 = shalt.err (!%p3978_p4)
}
  0x2e   :  { %s3982_s3 = scalar_lea.vmem %s22_s25, 4096  ;;  %p3987_p6 = scmp.lt.s32.totalorder %s22_s25, %s22_s25 }
  0x2f   :  { %p3983_p5 = scmp.ne.s32.totalorder %s22_s25, %s3982_s3  ;;  %p3988_p7 = scmp.lt.s32.totalorder %s3982_s3, %s3982_s3 }
  0x31   :  { %p3989_p8 = por %p3988_p7, %p3987_p6 }
  0x33   :  { %p3990_p9 = pnand %p3989_p8, %p3983_p5 }
  0x35   :  { %3993 = shalt.err (!%p3990_p9)
}
  0x36   :  { %27 = dma.hbm_to_vmem [thread:$0]  %s5025_s0, 4096, %s22_s25, [#allocation4], %s4094_s9, %s4094_s9, %s4095_s10  }
  0x37   :  { %s3994_s16 = scalar_lea.hbm %s5027_s2, 2048 }
  0x38   :  { %p3995_p10 = scmp.ne.s32.totalorder %s5027_s2, %s3994_s16  ;;  %p3998_p11 = scmp.lt.u32.totalorder %s3994_s16, %s5027_s2 }
  0x3a   :  { %p4000_p12 = pnand %p3998_p11, %p3995_p10 }
  0x3c   :  { %4003 = shalt.err (!%p4000_p12)
}
  0x3d   :  { %s4004_s1 = scalar_lea.vmem %s4171_s27, 2048  ;;  %p4009_p0 = scmp.lt.s32.totalorder %s4171_s27, %s4171_s27 }
  0x3e   :  { %p4005_p13 = scmp.ne.s32.totalorder %s4171_s27, %s4004_s1  ;;  %p4010_p1 = scmp.lt.s32.totalorder %s4004_s1, %s4004_s1 }
  0x40   :  { %p4011_p2 = por %p4010_p1, %p4009_p0 }
  0x42   :  { %p4012_p3 = pnand %p4011_p2, %p4005_p13 }
  0x44   :  { %4015 = shalt.err (!%p4012_p3)
}
  0x45   :  { %51 = dma.hbm_to_vmem [thread:$0]  %s5027_s2, 2048, %s4171_s27, [#allocation7], %s4094_s9, %s4094_s9, %s4095_s10  }
  0x46   :  { %s4098_s22 = smov [#allocation11]   ;;  %s4099_s25 = smov [#allocation12]  }
  0x47   :  { %s68_s23 = sshll.u32 %s4098_s22, 4  ;;  %s78_s26 = sshll.u32 %s4099_s25, 4  ;;  %s69_s23 = int_to_ptr.vmem [resolvable:$true] %s68_s23  ;;  %s79_s26 = int_to_ptr.vmem [resolvable:$true] %s78_s26 }
  0x48   :  { %s4016_s30 = scalar_lea.hbm %s5029_s4, 16 }
  0x49   :  { %p4017_p4 = scmp.ne.s32.totalorder %s5029_s4, %s4016_s30  ;;  %p4020_p5 = scmp.lt.u32.totalorder %s4016_s30, %s5029_s4 }
  0x4b   :  { %p4022_p6 = pnand %p4020_p5, %p4017_p4 }
  0x4d   :  { %4025 = shalt.err (!%p4022_p6)
}
  0x4e   :  { %s4026_s2 = scalar_lea.vmem %s69_s23, 16  ;;  %s4030_s27 = scalar_lea.vmem %s69_s23, 32 }
  0x4f   :  { %p4027_p7 = scmp.ne.s32.totalorder %s69_s23, %s4026_s2  ;;  %p4031_p8 = scmp.lt.s32.totalorder %s69_s23, %s69_s23 }
  0x50   :  { %p4032_p9 = scmp.lt.s32.totalorder %s4030_s27, %s4026_s2 }
  0x52   :  { %p4033_p10 = por %p4032_p9, %p4031_p8 }
  0x54   :  { %p4034_p11 = pnand %p4033_p10, %p4027_p7 }
  0x56   :  { %4037 = shalt.err (!%p4034_p11)
}
  0x57   :  { %71 = dma.hbm_to_vmem [thread:$0]  %s5029_s4, 16, %s69_s23, [#allocation10]  }
  0x58   :  { %s4038_s15 = scalar_lea.hbm %s5030_s5, 16 }
  0x59   :  { %p4039_p12 = scmp.ne.s32.totalorder %s5030_s5, %s4038_s15  ;;  %p4042_p13 = scmp.lt.u32.totalorder %s4038_s15, %s5030_s5 }
  0x5b   :  { %p4044_p0 = pnand %p4042_p13, %p4039_p12 }
  0x5d   :  { %4047 = shalt.err (!%p4044_p0)
}
  0x5e   :  { %s4048_s20 = scalar_lea.vmem %s79_s26, 16  ;;  %s4052_s1 = scalar_lea.vmem %s79_s26, 32 }
  0x5f   :  { %p4049_p1 = scmp.ne.s32.totalorder %s79_s26, %s4048_s20  ;;  %p4053_p2 = scmp.lt.s32.totalorder %s79_s26, %s79_s26 }
  0x60   :  { %p4054_p3 = scmp.lt.s32.totalorder %s4052_s1, %s4048_s20 }
  0x62   :  { %p4055_p4 = por %p4054_p3, %p4053_p2 }
  0x64   :  { %p4056_p5 = pnand %p4055_p4, %p4049_p1 }
  0x66   :  { %4059 = shalt.err (!%p4056_p5)
}
  0x67   :  { %81 = dma.hbm_to_vmem [thread:$0]  %s5030_s5, 16, %s79_s26, [#allocation13]  }
  0x68   :  { %4082 = dma.done.wait [#allocation4], 4096  }
  0x69   :  { %4083 = vsyncadd [#allocation4], 4294963200 }
  0x6a   :  { %4084 = dma.done.wait [#allocation7], 67584  }
  0x6b   :  { %4085 = vsyncadd [#allocation7], 4294899712 }
  0x6c   :  { %4086 = dma.done.wait [#allocation10], 32  }
  0x6d   :  { %4087 = vsyncadd [#allocation10], 4294967264 }
  0x6e   :  { %4088 = dma.done.wait [#allocation13], 16  }
  0x6f   :  { %4089 = vsyncadd [#allocation13], 4294967280  ;;  %v3186_v0 = vld [vmem:[#allocation8] sm:$0xff]  ;;  %v3187_v1 = vld [vmem:[#allocation8 + $0x8] sm:$0xff]  ;;  %vm2728_vm0 = vcmask 1041409   ;;  %vm2730_vm1 = vcmask 1042434  }
  0x70   :  { %v3188_v2 = vld [vmem:[#allocation8 + $0x10] sm:$0xff]  ;;  %v3869_v3 = vpack.c.bf16 %v3187_v1, %v3186_v0  ;;  %v3189_v4 = vld [vmem:[#allocation8 + $0x18] sm:$0xff]  ;;  %v3190_v5 = vld [vmem:[#allocation8 + $0x20] sm:$0xff]  ;;  %vm2732_vm2 = vcmask 1043459   ;;  %vm2734_vm3 = vcmask 1044484   ;;  %vm2736_vm4 = vcmask 1045509  }
  0x71   :  { %v3191_v6 = vld [vmem:[#allocation8 + $0x28] sm:$0xff]  ;;  %v3873_v7 = vpack.c.bf16 %v3189_v4, %v3188_v2  ;;  %v3192_v8 = vld [vmem:[#allocation8 + $0x30] sm:$0xff]  ;;  %v3193_v9 = vld [vmem:[#allocation8 + $0x38] sm:$0xff]  ;;  %vm2738_vm5 = vcmask 1046534   ;;  %vm2740_vm6 = vcmask 1047559   ;;  %s4100_s5 = smov [#allocation14]  }
  0x72   :  { %v3194_v10 = vld [vmem:[#allocation8 + $0x40] sm:$0xff]  ;;  %3870 = vmatprep.subr.bf16.mxu0 %v3869_v3  ;;  %v3195_v11 = vld [vmem:[#allocation8 + $0x48] sm:$0xff]  ;;  %v3196_v12 = vld [vmem:[#allocation8 + $0x50] sm:$0xff]  ;;  %3901 = vmatprep.subr.bf16.mxu1 %v3869_v3  ;;  %v3877_v17 = vpack.c.bf16 %v3191_v6, %v3190_v5  ;;  %v4232_v25 = vpack.c.bf16 %v3193_v9, %v3192_v8  ;;  %s3724_s21 = sshll.u32 %s4100_s5, 4  ;;  %s3725_s21 = int_to_ptr.vmem [resolvable:$true] %s3724_s21 }
  0x73   :  { %v3197_v13 = vld [vmem:[#allocation8 + $0x58] sm:$0xff]  ;;  %3872 = vmatpush3.bf16.msra.mxu0 %v3869_v3  ;;  %v3198_v14 = vld [vmem:[#allocation8 + $0x60] sm:$0xff]  ;;  %v3199_v15 = vld [vmem:[#allocation8 + $0x68] sm:$0xff]  ;;  %3909 = vmatpush3.bf16.msra.mxu1 %v3869_v3  ;;  %v4234_v26 = vpack.c.bf16 %v3195_v11, %v3194_v10  ;;  %s4060_s22 = scalar_lea.vmem %s3725_s21, 4096  ;;  %p4065_p7 = scmp.lt.s32.totalorder %s3725_s21, %s3725_s21 }
  0x74   :  { %v3200_v16 = vld [vmem:[#allocation8 + $0x70] sm:$0xff]  ;;  %3874 = vmatprep.subr.bf16.mxu0 %v3873_v7  ;;  %v3201_v18 = vld [vmem:[#allocation8 + $0x78] sm:$0xff]  ;;  %v168_v19 = vld [vmem:[#allocation6] sm:$0xff]  ;;  %3902 = vmatprep.subr.bf16.mxu1 %v3873_v7  ;;  %v4236_v31 = vpack.c.bf16 %v3197_v13, %v3196_v12  ;;  %v4238_v38 = vpack.c.bf16 %v3199_v15, %v3198_v14  ;;  %p4061_p6 = scmp.ne.s32.totalorder %s3725_s21, %s4060_s22  ;;  %p4066_p8 = scmp.lt.s32.totalorder %s4060_s22, %s4060_s22 }
  0x75   :  { %v169_v20 = vld [vmem:[#allocation6 + $0x8] sm:$0xff]  ;;  %v170_v21 = vld [vmem:[#allocation6 + $0x10] sm:$0xff]  ;;  %v171_v22 = vld [vmem:[#allocation6 + $0x18] sm:$0xff]  ;;  %v4240_v39 = vpack.c.bf16 %v3201_v18, %v3200_v16 }
  0x76   :  { %v172_v23 = vld [vmem:[#allocation6 + $0x20] sm:$0xff]  ;;  %v680_v24 = vadd.f32 %v169_v20, %v168_v19  ;;  %v173_v27 = vld [vmem:[#allocation6 + $0x28] sm:$0xff]  ;;  %v174_v28 = vld [vmem:[#allocation6 + $0x30] sm:$0xff]  ;;  %v687_v30 = vadd.f32 %v171_v22, %v170_v21  ;;  %p4067_p9 = por %p4066_p8, %p4065_p7 }
  0x77   :  { %v175_v29 = vld [vmem:[#allocation6 + $0x38] sm:$0xff]  ;;  %3876 = vmatpush3.bf16.msra.mxu0 %v3873_v7  ;;  %v176_v32 = vld [vmem:[#allocation6 + $0x40] sm:$0xff]  ;;  %v177_v33 = vld [vmem:[#allocation6 + $0x48] sm:$0xff]  ;;  %v694_v36 = vadd.f32 %v173_v27, %v172_v23  ;;  %3910 = vmatpush3.bf16.msra.mxu1 %v3873_v7 }
  0x78   :  { %v178_v34 = vld [vmem:[#allocation6 + $0x50] sm:$0xff]  ;;  %v681_v35 = vrot.slane %v680_v24, 4  ;;  %v701_v37 = vadd.f32 %v175_v29, %v174_v28  ;;  %3878 = vmatprep.subr.bf16.mxu0 %v3877_v17  ;;  %v179_v40 = vld [vmem:[#allocation6 + $0x58] sm:$0xff]  ;;  %v180_v41 = vld [vmem:[#allocation6 + $0x60] sm:$0xff]  ;;  %v688_v43 = vrot.slane %v687_v30, 4  ;;  %v708_v44 = vadd.f32 %v177_v33, %v176_v32  ;;  %3903 = vmatprep.subr.bf16.mxu1 %v3877_v17  ;;  %p4068_p10 = pnand %p4067_p9, %p4061_p6 }
  0x79   :  { %v181_v42 = vld [vmem:[#allocation6 + $0x68] sm:$0xff]  ;;  %v182_v45 = vld [vmem:[#allocation6 + $0x70] sm:$0xff]  ;;  %v183_v46 = vld [vmem:[#allocation6 + $0x78] sm:$0xff]  ;;  %v695_v48 = vrot.slane %v694_v36, 4  ;;  %v715_v50 = vadd.f32 %v179_v40, %v178_v34 }
  0x7a   :  { %v682_v47 = vadd.f32 %v681_v35, %v680_v24  ;;  %v702_v49 = vrot.slane %v701_v37, 4  ;;  %v689_v51 = vadd.f32 %v688_v43, %v687_v30  ;;  %v709_v52 = vrot.slane %v708_v44, 4  ;;  %v184_v15 = vld [vmem:[#allocation6 + $0x80] sm:$0xff]  ;;  %v185_v16 = vld [vmem:[#allocation6 + $0x88] sm:$0xff]  ;;  %v186_v27 = vld [vmem:[#allocation6 + $0x90] sm:$0xff] }
  0x7b   :  { %v722_v53 = vadd.f32 %v181_v42, %v180_v41  ;;  %v729_v54 = vadd.f32 %v183_v46, %v182_v45  ;;  %3880 = vmatpush3.bf16.msra.mxu0 %v3877_v17  ;;  %v696_v56 = vadd.f32 %v695_v48, %v694_v36  ;;  %v716_v58 = vrot.slane %v715_v50, 4  ;;  %3911 = vmatpush3.bf16.msra.mxu1 %v3877_v17  ;;  %v188_v32 = vld [vmem:[#allocation6 + $0xa0] sm:$0xff]  ;;  %v189_v33 = vld [vmem:[#allocation6 + $0xa8] sm:$0xff]  ;;  %v190_v41 = vld [vmem:[#allocation6 + $0xb0] sm:$0xff] }
  0x7c   :  { %v683_v55 = vrot.slane %v682_v47, 2  ;;  %v703_v57 = vadd.f32 %v702_v49, %v701_v37  ;;  %3882 = vmatprep.subr.bf16.mxu0 %v4232_v25  ;;  %v690_v59 = vrot.slane %v689_v51, 2  ;;  %v710_v60 = vadd.f32 %v709_v52, %v708_v44  ;;  %3904 = vmatprep.subr.bf16.mxu1 %v4232_v25  ;;  %v191_v42 = vld [vmem:[#allocation6 + $0xb8] sm:$0xff]  ;;  %v192_v43 = vld [vmem:[#allocation6 + $0xc0] sm:$0xff]  ;;  %v193_v46 = vld [vmem:[#allocation6 + $0xc8] sm:$0xff] }
  0x7d   :  { %v723_v61 = vrot.slane %v722_v53, 4  ;;  %v730_v62 = vrot.slane %v729_v54, 4  ;;  %v697_v0 = vrot.slane %v696_v56, 2  ;;  %v717_v2 = vadd.f32 %v716_v58, %v715_v50  ;;  %v195_v48 = vld [vmem:[#allocation6 + $0xd8] sm:$0xff] }
  0x7e   :  { %v684_v63 = vadd.f32 %v683_v55, %v682_v47  ;;  %v704_v1 = vrot.slane %v703_v57, 2  ;;  %v691_v3 = vadd.f32 %v690_v59, %v689_v51  ;;  %v711_v4 = vrot.slane %v710_v60, 2  ;;  %v194_v47 = vld [vmem:[#allocation6 + $0xd0] sm:$0xff]  ;;  %v3090_v59 = vld [vmem:[#allocation3] sm:$0xff] }
  0x7f   :  { %v724_v5 = vadd.f32 %v723_v61, %v722_v53  ;;  %v731_v6 = vadd.f32 %v730_v62, %v729_v54  ;;  %3884 = vmatpush3.bf16.msra.mxu0 %v4232_v25  ;;  %v698_v8 = vadd.f32 %v697_v0, %v696_v56  ;;  %v718_v10 = vrot.slane %v717_v2, 2  ;;  %3912 = vmatpush3.bf16.msra.mxu1 %v4232_v25  ;;  %v187_v25 = vld [vmem:[#allocation6 + $0x98] sm:$0xff]  ;;  %v196_v0 = vld [vmem:[#allocation6 + $0xe0] sm:$0xff] }
  0x80   :  { %v685_v7 = vrot.slane %v684_v63, 1  ;;  %v705_v9 = vadd.f32 %v704_v1, %v703_v57  ;;  %3886 = vmatprep.subr.bf16.mxu0 %v4234_v26  ;;  %v692_v11 = vrot.slane %v691_v3, 1  ;;  %v712_v12 = vadd.f32 %v711_v4, %v710_v60  ;;  %3905 = vmatprep.subr.bf16.mxu1 %v4234_v26  ;;  %v197_v1 = vld [vmem:[#allocation6 + $0xe8] sm:$0xff] }
  0x81   :  { %v725_v13 = vrot.slane %v724_v5, 2  ;;  %v732_v14 = vrot.slane %v731_v6, 2  ;;  %v699_v18 = vrot.slane %v698_v8, 1  ;;  %v719_v20 = vadd.f32 %v718_v10, %v717_v2 }
  0x82   :  { %v686_v17 = vadd.f32 %v685_v7, %v684_v63  ;;  %v706_v19 = vrot.slane %v705_v9, 1  ;;  %v693_v21 = vadd.f32 %v692_v11, %v691_v3  ;;  %v713_v22 = vrot.slane %v712_v12, 1 }
  0x83   :  { %v726_v23 = vadd.f32 %v725_v13, %v724_v5  ;;  %v733_v24 = vadd.f32 %v732_v14, %v731_v6  ;;  %3888 = vmatpush3.bf16.msra.mxu0 %v4234_v26  ;;  %v700_v28 = vadd.f32 %v699_v18, %v698_v8  ;;  %v720_v30 = vrot.slane %v719_v20, 1  ;;  %3913 = vmatpush3.bf16.msra.mxu1 %v4234_v26  ;;  %v199_v13 = vld [vmem:[#allocation6 + $0xf8] sm:$0xff] }
  0x84   :  { %v707_v29 = vadd.f32 %v706_v19, %v705_v9  ;;  %v736_v34 = vadd.f32 %v185_v16, %v184_v15  ;;  %3890 = vmatprep.subr.bf16.mxu0 %v4236_v31  ;;  %v714_v35 = vadd.f32 %v713_v22, %v712_v12  ;;  %v2729_v40 = vsel %vm2728_vm0, %v693_v21, %v686_v17  ;;  %v198_v12 = vld [vmem:[#allocation6 + $0xf0] sm:$0xff] }
  0x85   :  { %v727_v36 = vrot.slane %v726_v23, 1  ;;  %v734_v37 = vrot.slane %v733_v24, 1  ;;  %3906 = vmatprep.subr.bf16.mxu1 %v4236_v31  ;;  %v721_v44 = vadd.f32 %v720_v30, %v719_v20  ;;  %v2731_v45 = vsel %vm2730_vm1, %v700_v28, %v2729_v40 }
  0x86   :  { %v737_v49 = vrot.slane %v736_v34, 4  ;;  %v743_v26 = vadd.f32 %v187_v25, %v186_v27  ;;  %v2733_v52 = vsel %vm2732_vm2, %v707_v29, %v2731_v45  ;;  %v750_v53 = vadd.f32 %v189_v33, %v188_v32  ;;  %v200_v25 = vld [vmem:[#allocation6 + $0x100] sm:$0xff] }
  0x87   :  { %v728_v50 = vadd.f32 %v727_v36, %v726_v23  ;;  %v735_v51 = vadd.f32 %v734_v37, %v733_v24  ;;  %3892 = vmatpush3.bf16.msra.mxu0 %v4236_v31  ;;  %v2735_v54 = vsel %vm2734_vm3, %v714_v35, %v2733_v52  ;;  %v757_v57 = vadd.f32 %v191_v42, %v190_v41  ;;  %v205_v52 = vld [vmem:[#allocation6 + $0x128] sm:$0xff] }
  0x88   :  { %v738_v55 = vadd.f32 %v737_v49, %v736_v34  ;;  %v744_v56 = vrot.slane %v743_v26, 4  ;;  %3914 = vmatpush3.bf16.msra.mxu1 %v4236_v31  ;;  %3894 = vmatprep.subr.bf16.mxu0 %v4238_v38  ;;  %v2737_v58 = vsel %vm2736_vm4, %v721_v44, %v2735_v54  ;;  %v751_v60 = vrot.slane %v750_v53, 4  ;;  %v204_v49 = vld [vmem:[#allocation6 + $0x120] sm:$0xff]  ;;  %v207_v54 = vld [vmem:[#allocation6 + $0x138] sm:$0xff] }
  0x89   :  { %v764_v61 = vadd.f32 %v193_v46, %v192_v43  ;;  %v771_v62 = vadd.f32 %v195_v48, %v194_v47  ;;  %3907 = vmatprep.subr.bf16.mxu1 %v4238_v38  ;;  %v2739_v63 = vsel %vm2738_vm5, %v728_v50, %v2737_v58  ;;  %v758_v4 = vrot.slane %v757_v57, 4  ;;  %v202_v47 = vld [vmem:[#allocation6 + $0x110] sm:$0xff]  ;;  %v203_v48 = vld [vmem:[#allocation6 + $0x118] sm:$0xff] }
  0x8a   :  { %v739_v2 = vrot.slane %v738_v55, 2  ;;  %v745_v3 = vadd.f32 %v744_v56, %v743_v26  ;;  %v2741_v5 = vsel %vm2740_vm6, %v735_v51, %v2739_v63  ;;  %v752_v31 = vadd.f32 %v751_v60, %v750_v53  ;;  %v206_v53 = vld [vmem:[#allocation6 + $0x130] sm:$0xff] }
  0x8b   :  { %v765_v6 = vrot.slane %v764_v61, 4  ;;  %v772_v7 = vrot.slane %v771_v62, 4  ;;  %3896 = vmatpush3.bf16.msra.mxu0 %v4238_v38  ;;  %v3122_v8 = vadd.f32 %v3090_v59, %v2741_v5  ;;  %v759_v11 = vadd.f32 %v758_v4, %v757_v57  ;;  %v211_v4 = vld [vmem:[#allocation6 + $0x158] sm:$0xff] }
  0x8c   :  { %v740_v9 = vadd.f32 %v739_v2, %v738_v55  ;;  %v746_v10 = vrot.slane %v745_v3, 2  ;;  %3915 = vmatpush3.bf16.msra.mxu1 %v4238_v38  ;;  %3898 = vmatprep.subr.bf16.mxu0 %v4240_v39  ;;  %v753_v14 = vrot.slane %v752_v31, 2  ;;  %v778_v17 = vadd.f32 %v197_v1, %v196_v0  ;;  %v201_v38 = vld [vmem:[#allocation6 + $0x108] sm:$0xff] }
  0x8d   :  { %v766_v15 = vadd.f32 %v765_v6, %v764_v61  ;;  %v773_v16 = vadd.f32 %v772_v7, %v771_v62  ;;  %3908 = vmatprep.subr.bf16.mxu1 %v4240_v39  ;;  %v3154_v18 = vmul.f32 0.05882353, %v3122_v8  ;;  %v760_v21 = vrot.slane %v759_v11, 2  ;;  %v208_v61 = vld [vmem:[#allocation6 + $0x140] sm:$0xff]  ;;  %v209_v62 = vld [vmem:[#allocation6 + $0x148] sm:$0xff] }
  0x8e   :  { %v741_v19 = vrot.slane %v740_v9, 1  ;;  %v747_v20 = vadd.f32 %v746_v10, %v745_v3  ;;  %v754_v22 = vadd.f32 %v753_v14, %v752_v31  ;;  %v779_v27 = vrot.slane %v778_v17, 4  ;;  %v210_v3 = vld [vmem:[#allocation6 + $0x150] sm:$0xff] }
  0x8f   :  { %v767_v23 = vrot.slane %v766_v15, 2  ;;  %v774_v24 = vrot.slane %v773_v16, 2  ;;  %3900 = vmatpush3.bf16.msra.mxu0 %v4240_v39  ;;  %3821 = vmatprep.mubr.f32.mxu0 %v3154_v18  ;;  %v761_v30 = vadd.f32 %v760_v21, %v759_v11  ;;  %v785_v32 = vadd.f32 %v199_v13, %v198_v12 }
  0x90   :  { %v742_v28 = vadd.f32 %v741_v19, %v740_v9  ;;  %v748_v29 = vrot.slane %v747_v20, 1  ;;  %v755_v33 = vrot.slane %v754_v22, 1  ;;  %v780_v36 = vadd.f32 %v779_v27, %v778_v17  ;;  %3916 = vmatpush3.bf16.msra.mxu1 %v4240_v39  ;;  %v3091_v27 = vld [vmem:[#allocation3 + $0x8] sm:$0xff] }
  0x91   :  { %v768_v34 = vadd.f32 %v767_v23, %v766_v15  ;;  %v775_v35 = vadd.f32 %v774_v24, %v773_v16  ;;  %v762_v40 = vrot.slane %v761_v30, 1  ;;  %v786_v41 = vrot.slane %v785_v32, 4  ;;  %v212_v15 = vld [vmem:[#allocation6 + $0x160] sm:$0xff]  ;;  %v213_v16 = vld [vmem:[#allocation6 + $0x168] sm:$0xff] }
  0x92   :  { %v749_v37 = vadd.f32 %v748_v29, %v747_v20  ;;  %v792_v42 = vadd.f32 %v201_v38, %v200_v25  ;;  %v756_v43 = vadd.f32 %v755_v33, %v754_v22  ;;  %v781_v46 = vrot.slane %v780_v36, 2  ;;  %v214_v29 = vld [vmem:[#allocation6 + $0x170] sm:$0xff] }
  0x93   :  { %v769_v44 = vrot.slane %v768_v34, 1  ;;  %v776_v45 = vrot.slane %v775_v35, 1  ;;  %v763_v26 = vadd.f32 %v762_v40, %v761_v30  ;;  %v787_v50 = vadd.f32 %v786_v41, %v785_v32  ;;  %v215_v30 = vld [vmem:[#allocation6 + $0x178] sm:$0xff] }
  0x94   :  { %v2742_v51 = vsel %vm2728_vm0, %v749_v37, %v742_v28  ;;  %v793_v55 = vrot.slane %v792_v42, 4  ;;  %v782_v57 = vadd.f32 %v781_v46, %v780_v36  ;;  %v799_v0 = vadd.f32 %v203_v48, %v202_v47 }
  0x95   :  { %v770_v39 = vadd.f32 %v769_v44, %v768_v34  ;;  %v777_v56 = vadd.f32 %v776_v45, %v775_v35  ;;  %v2743_v58 = vsel %vm2730_vm1, %v756_v43, %v2742_v51  ;;  %v788_v59 = vrot.slane %v787_v50, 2 }
  0x96   :  { %v2744_v60 = vsel %vm2732_vm2, %v763_v26, %v2743_v58  ;;  %v794_v63 = vadd.f32 %v793_v55, %v792_v42  ;;  %v783_v1 = vrot.slane %v782_v57, 1  ;;  %v806_v5 = vadd.f32 %v205_v52, %v204_v49  ;;  %v216_v26 = vld [vmem:[#allocation6 + $0x180] sm:$0xff]  ;;  %v218_v58 = vld [vmem:[#allocation6 + $0x190] sm:$0xff] }
  0x97   :  { %v2745_v2 = vsel %vm2734_vm3, %v770_v39, %v2744_v60  ;;  %v813_v31 = vadd.f32 %v207_v54, %v206_v53  ;;  %v789_v6 = vadd.f32 %v788_v59, %v787_v50  ;;  %v800_v9 = vrot.slane %v799_v0, 4  ;;  %v217_v50 = vld [vmem:[#allocation6 + $0x188] sm:$0xff]  ;;  %v219_v59 = vld [vmem:[#allocation6 + $0x198] sm:$0xff] }
  0x98   :  { %v2746_v7 = vsel %vm2736_vm4, %v777_v56, %v2745_v2  ;;  %v795_v8 = vrot.slane %v794_v63, 2  ;;  %v784_v10 = vadd.f32 %v783_v1, %v782_v57  ;;  %v807_v11 = vrot.slane %v806_v5, 4 }
  0x99   :  { %v814_v12 = vrot.slane %v813_v31, 4  ;;  %v820_v13 = vadd.f32 %v209_v62, %v208_v61  ;;  %v790_v14 = vrot.slane %v789_v6, 1  ;;  %v801_v18 = vadd.f32 %v800_v9, %v799_v0 }
  0x9a   :  { %v796_v17 = vadd.f32 %v795_v8, %v794_v63  ;;  %v827_v19 = vadd.f32 %v211_v4, %v210_v3  ;;  %v2747_v20 = vsel %vm2738_vm5, %v784_v10, %v2746_v7  ;;  %v808_v21 = vadd.f32 %v807_v11, %v806_v5  ;;  %v220_v4 = vld [vmem:[#allocation6 + $0x1a0] sm:$0xff]  ;;  %v221_v5 = vld [vmem:[#allocation6 + $0x1a8] sm:$0xff]  ;;  %v222_v7 = vld [vmem:[#allocation6 + $0x1b0] sm:$0xff] }
  0x9b   :  { %v815_v22 = vadd.f32 %v814_v12, %v813_v31  ;;  %v821_v23 = vrot.slane %v820_v13, 4  ;;  %v791_v24 = vadd.f32 %v790_v14, %v789_v6  ;;  %v802_v38 = vrot.slane %v801_v18, 2  ;;  %v223_v8 = vld [vmem:[#allocation6 + $0x1b8] sm:$0xff] }
  0x9c   :  { %v797_v25 = vrot.slane %v796_v17, 1  ;;  %v828_v28 = vrot.slane %v827_v19, 4  ;;  %v809_v32 = vrot.slane %v808_v21, 2  ;;  %v834_v35 = vadd.f32 %v213_v16, %v212_v15  ;;  %v224_v15 = vld [vmem:[#allocation6 + $0x1c0] sm:$0xff]  ;;  %v225_v16 = vld [vmem:[#allocation6 + $0x1c8] sm:$0xff] }
  0x9d   :  { %v816_v33 = vrot.slane %v815_v22, 2  ;;  %v822_v34 = vadd.f32 %v821_v23, %v820_v13  ;;  %v2748_v36 = vsel %vm2740_vm6, %v791_v24, %v2747_v20  ;;  %v803_v40 = vadd.f32 %v802_v38, %v801_v18  ;;  %v226_v18 = vld [vmem:[#allocation6 + $0x1d0] sm:$0xff] }
  0x9e   :  { %v798_v37 = vadd.f32 %v797_v25, %v796_v17  ;;  %v829_v41 = vadd.f32 %v828_v28, %v827_v19  ;;  %v3123_v42 = vadd.f32 %v3091_v27, %v2748_v36  ;;  %v810_v43 = vadd.f32 %v809_v32, %v808_v21  ;;  %v227_v19 = vld [vmem:[#allocation6 + $0x1d8] sm:$0xff]  ;;  %v228_v36 = vld [vmem:[#allocation6 + $0x1e0] sm:$0xff] }
  0x9f   :  { %v817_v44 = vadd.f32 %v816_v33, %v815_v22  ;;  %v823_v45 = vrot.slane %v822_v34, 2  ;;  %v804_v46 = vrot.slane %v803_v40, 1  ;;  %v835_v48 = vrot.slane %v834_v35, 4 }
  0xa0   :  { %v830_v47 = vrot.slane %v829_v41, 2  ;;  %v841_v49 = vadd.f32 %v215_v30, %v214_v29  ;;  %v3155_v51 = vmul.f32 0.05882353, %v3123_v42  ;;  %v811_v52 = vrot.slane %v810_v43, 1 }
  0xa1   :  { %v818_v53 = vrot.slane %v817_v44, 1  ;;  %v824_v54 = vadd.f32 %v823_v45, %v822_v34  ;;  %v805_v55 = vadd.f32 %v804_v46, %v803_v40  ;;  %v836_v56 = vadd.f32 %v835_v48, %v834_v35  ;;  %v3092_v46 = vld [vmem:[#allocation3 + $0x10] sm:$0xff] }
  0xa2   :  { %v831_v39 = vadd.f32 %v830_v47, %v829_v41  ;;  %v842_v57 = vrot.slane %v841_v49, 4  ;;  %3822 = vmatmul.mubr.f32.vlgmr.msra.gmra.mrb[0].mxu0 %v3155_v51  ;;  %v812_v60 = vadd.f32 %v811_v52, %v810_v43  ;;  %v848_v63 = vadd.f32 %v217_v50, %v216_v26 }
  0xa3   :  { %v819_v61 = vadd.f32 %v818_v53, %v817_v44  ;;  %v825_v62 = vrot.slane %v824_v54, 1  ;;  %v837_v1 = vrot.slane %v836_v56, 2  ;;  %v2749_v3 = vsel %vm2728_vm0, %v805_v55, %v798_v37  ;;  %v229_v37 = vld [vmem:[#allocation6 + $0x1e8] sm:$0xff]  ;;  %v230_v53 = vld [vmem:[#allocation6 + $0x1f0] sm:$0xff] }
  0xa4   :  { %v832_v0 = vrot.slane %v831_v39, 1  ;;  %v843_v2 = vadd.f32 %v842_v57, %v841_v49  ;;  %v2750_v6 = vsel %vm2730_vm1, %v812_v60, %v2749_v3  ;;  %v849_v9 = vrot.slane %v848_v63, 4 }
  0xa5   :  { %v826_v31 = vadd.f32 %v825_v62, %v824_v54  ;;  %v855_v10 = vadd.f32 %v219_v59, %v218_v58  ;;  %v838_v12 = vadd.f32 %v837_v1, %v836_v56  ;;  %v2751_v14 = vsel %vm2732_vm2, %v819_v61, %v2750_v6  ;;  %v231_v54 = vld [vmem:[#allocation6 + $0x1f8] sm:$0xff]  ;;  %v232_v1 = vld [vmem:[#allocation6 + $0x200] sm:$0xff] }
  0xa6   :  { %v833_v11 = vadd.f32 %v832_v0, %v831_v39  ;;  %v844_v13 = vrot.slane %v843_v2, 2  ;;  %v850_v20 = vadd.f32 %v849_v9, %v848_v63  ;;  %v862_v22 = vadd.f32 %v221_v5, %v220_v4 }
  0xa7   :  { %v2752_v17 = vsel %vm2734_vm3, %v826_v31, %v2751_v14  ;;  %v856_v21 = vrot.slane %v855_v10, 4  ;;  %v839_v23 = vrot.slane %v838_v12, 1  ;;  %v869_v25 = vadd.f32 %v223_v8, %v222_v7 }
  0xa8   :  { %v845_v24 = vadd.f32 %v844_v13, %v843_v2  ;;  %v2753_v27 = vsel %vm2736_vm4, %v833_v11, %v2752_v17  ;;  %v851_v38 = vrot.slane %v850_v20, 2  ;;  %v863_v29 = vrot.slane %v862_v22, 4  ;;  %v233_v2 = vld [vmem:[#allocation6 + $0x208] sm:$0xff]  ;;  %v235_v11 = vld [vmem:[#allocation6 + $0x218] sm:$0xff] }
  0xa9   :  { %v857_v28 = vadd.f32 %v856_v21, %v855_v10  ;;  %v876_v30 = vadd.f32 %v225_v16, %v224_v15  ;;  %v840_v32 = vadd.f32 %v839_v23, %v838_v12  ;;  %v870_v34 = vrot.slane %v869_v25, 4  ;;  %v234_v10 = vld [vmem:[#allocation6 + $0x210] sm:$0xff]  ;;  %v237_v21 = vld [vmem:[#allocation6 + $0x228] sm:$0xff] }
  0xaa   :  { %v846_v33 = vrot.slane %v845_v24, 1  ;;  %v883_v35 = vadd.f32 %v227_v19, %v226_v18  ;;  %v852_v40 = vadd.f32 %v851_v38, %v850_v20  ;;  %v864_v42 = vadd.f32 %v863_v29, %v862_v22  ;;  %v236_v20 = vld [vmem:[#allocation6 + $0x220] sm:$0xff]  ;;  %v238_v22 = vld [vmem:[#allocation6 + $0x230] sm:$0xff]  ;;  %v241_v38 = vld [vmem:[#allocation6 + $0x248] sm:$0xff] }
  0xab   :  { %v858_v41 = vrot.slane %v857_v28, 2  ;;  %v877_v43 = vrot.slane %v876_v30, 4  ;;  %v2754_v45 = vsel %vm2738_vm5, %v840_v32, %v2753_v27  ;;  %v871_v47 = vadd.f32 %v870_v34, %v869_v25  ;;  %v239_v27 = vld [vmem:[#allocation6 + $0x238] sm:$0xff]  ;;  %v240_v25 = vld [vmem:[#allocation6 + $0x240] sm:$0xff] }
  0xac   :  { %v847_v44 = vadd.f32 %v846_v33, %v845_v24  ;;  %v884_v48 = vrot.slane %v883_v35, 4  ;;  %v853_v49 = vrot.slane %v852_v40, 1  ;;  %v865_v50 = vrot.slane %v864_v42, 2 }
  0xad   :  { %v859_v26 = vadd.f32 %v858_v41, %v857_v28  ;;  %v878_v51 = vadd.f32 %v877_v43, %v876_v30  ;;  %v872_v55 = vrot.slane %v871_v47, 2  ;;  %v890_v56 = vadd.f32 %v229_v37, %v228_v36  ;;  %v242_v43 = vld [vmem:[#allocation6 + $0x250] sm:$0xff] }
  0xae   :  { %v2755_v52 = vsel %vm2740_vm6, %v847_v44, %v2754_v45  ;;  %v885_v39 = vadd.f32 %v884_v48, %v883_v35  ;;  %v854_v58 = vadd.f32 %v853_v49, %v852_v40  ;;  %v866_v60 = vadd.f32 %v865_v50, %v864_v42  ;;  %v243_v44 = vld [vmem:[#allocation6 + $0x258] sm:$0xff] }
  0xaf   :  { %v3124_v57 = vadd.f32 %v3092_v46, %v2755_v52  ;;  %v860_v59 = vrot.slane %v859_v26, 1  ;;  %v873_v61 = vadd.f32 %v872_v55, %v871_v47  ;;  %v879_v62 = vrot.slane %v878_v51, 2  ;;  %v244_v55 = vld [vmem:[#allocation6 + $0x260] sm:$0xff] }
  0xb0   :  { %v886_v63 = vrot.slane %v885_v39, 2  ;;  %v891_v0 = vrot.slane %v890_v56, 4  ;;  %v867_v5 = vrot.slane %v866_v60, 1  ;;  %v897_v31 = vadd.f32 %v231_v54, %v230_v53 }
  0xb1   :  { %v3156_v3 = vmul.f32 0.05882353, %v3124_v57  ;;  %v861_v4 = vadd.f32 %v860_v59, %v859_v26  ;;  %v874_v6 = vrot.slane %v873_v61, 1  ;;  %v880_v7 = vadd.f32 %v879_v62, %v878_v51 }
  0xb2   :  { %v887_v8 = vadd.f32 %v886_v63, %v885_v39  ;;  %v892_v9 = vadd.f32 %v891_v0, %v890_v56  ;;  %v868_v12 = vadd.f32 %v867_v5, %v866_v60  ;;  %v898_v13 = vrot.slane %v897_v31, 4  ;;  %v245_v39 = vld [vmem:[#allocation6 + $0x268] sm:$0xff]  ;;  %v3093_v0 = vld [vmem:[#allocation3 + $0x18] sm:$0xff] }
  0xb3   :  { %3824 = vmatprep.mubr.f32.mxu0 %v3156_v3  ;;  %v2756_v14 = vsel %vm2728_vm0, %v861_v4, %v854_v58  ;;  %v904_v15 = vadd.f32 %v233_v2, %v232_v1  ;;  %v875_v16 = vadd.f32 %v874_v6, %v873_v61  ;;  %v881_v17 = vrot.slane %v880_v7, 1  ;;  %v246_v4 = vld [vmem:[#allocation6 + $0x270] sm:$0xff]  ;;  %v247_v5 = vld [vmem:[#allocation6 + $0x278] sm:$0xff] }
  0xb4   :  { %v888_v18 = vrot.slane %v887_v8, 1  ;;  %v893_v19 = vrot.slane %v892_v9, 2  ;;  %v899_v23 = vadd.f32 %v898_v13, %v897_v31  ;;  %v2757_v24 = vsel %vm2730_vm1, %v868_v12, %v2756_v14 }
  0xb5   :  { %v905_v28 = vrot.slane %v904_v15, 4  ;;  %v911_v29 = vadd.f32 %v235_v11, %v234_v10  ;;  %v882_v30 = vadd.f32 %v881_v17, %v880_v7  ;;  %v2758_v34 = vsel %vm2732_vm2, %v875_v16, %v2757_v24  ;;  %v248_v17 = vld [vmem:[#allocation6 + $0x280] sm:$0xff]  ;;  %v251_v24 = vld [vmem:[#allocation6 + $0x298] sm:$0xff] }
  0xb6   :  { %v889_v32 = vadd.f32 %v888_v18, %v887_v8  ;;  %v894_v33 = vadd.f32 %v893_v19, %v892_v9  ;;  %v900_v35 = vrot.slane %v899_v23, 2  ;;  %v918_v40 = vadd.f32 %v237_v21, %v236_v20 }
  0xb7   :  { %v906_v36 = vadd.f32 %v905_v28, %v904_v15  ;;  %v912_v37 = vrot.slane %v911_v29, 4  ;;  %v2759_v42 = vsel %vm2734_vm3, %v882_v30, %v2758_v34  ;;  %v925_v45 = vadd.f32 %v239_v27, %v238_v22  ;;  %v249_v22 = vld [vmem:[#allocation6 + $0x288] sm:$0xff] }
  0xb8   :  { %v895_v41 = vrot.slane %v894_v33, 1  ;;  %v932_v46 = vadd.f32 %v241_v38, %v240_v25  ;;  %v901_v47 = vadd.f32 %v900_v35, %v899_v23  ;;  %v2760_v48 = vsel %vm2736_vm4, %v889_v32, %v2759_v42  ;;  %v250_v23 = vld [vmem:[#allocation6 + $0x290] sm:$0xff]  ;;  %v253_v35 = vld [vmem:[#allocation6 + $0x2a8] sm:$0xff] }
  0xb9   :  { %v907_v49 = vrot.slane %v906_v36, 2  ;;  %v913_v26 = vadd.f32 %v912_v37, %v911_v29  ;;  %v919_v51 = vrot.slane %v918_v40, 4  ;;  %v926_v52 = vrot.slane %v925_v45, 4  ;;  %v252_v29 = vld [vmem:[#allocation6 + $0x2a0] sm:$0xff]  ;;  %v255_v37 = vld [vmem:[#allocation6 + $0x2b8] sm:$0xff] }
  0xba   :  { %v896_v50 = vadd.f32 %v895_v41, %v894_v33  ;;  %v933_v53 = vrot.slane %v932_v46, 4  ;;  %v902_v54 = vrot.slane %v901_v47, 1  ;;  %v939_v58 = vadd.f32 %v243_v44, %v242_v43 }
  0xbb   :  { %v908_v56 = vadd.f32 %v907_v49, %v906_v36  ;;  %v914_v57 = vrot.slane %v913_v26, 2  ;;  %v920_v60 = vadd.f32 %v919_v51, %v918_v40  ;;  %v927_v61 = vadd.f32 %v926_v52, %v925_v45  ;;  %v254_v36 = vld [vmem:[#allocation6 + $0x2b0] sm:$0xff] }
  0xbc   :  { %v2761_v59 = vsel %vm2738_vm5, %v896_v50, %v2760_v48  ;;  %v934_v62 = vadd.f32 %v933_v53, %v932_v46  ;;  %v903_v63 = vadd.f32 %v902_v54, %v901_v47  ;;  %v940_v3 = vrot.slane %v939_v58, 4 }
  0xbd   :  { %v909_v1 = vrot.slane %v908_v56, 1  ;;  %v915_v2 = vadd.f32 %v914_v57, %v913_v26  ;;  %v921_v31 = vrot.slane %v920_v60, 2  ;;  %v928_v6 = vrot.slane %v927_v61, 2  ;;  %v258_v57 = vld [vmem:[#allocation6 + $0x2d0] sm:$0xff] }
  0xbe   :  { %v935_v7 = vrot.slane %v934_v62, 2  ;;  %v946_v8 = vadd.f32 %v245_v39, %v244_v55  ;;  %v2762_v9 = vsel %vm2740_vm6, %v903_v63, %v2761_v59  ;;  %v941_v12 = vadd.f32 %v940_v3, %v939_v58  ;;  %v256_v55 = vld [vmem:[#allocation6 + $0x2c0] sm:$0xff]  ;;  %v257_v39 = vld [vmem:[#allocation6 + $0x2c8] sm:$0xff]  ;;  %v259_v58 = vld [vmem:[#allocation6 + $0x2d8] sm:$0xff] }
  0xbf   :  { %v910_v10 = vadd.f32 %v909_v1, %v908_v56  ;;  %v916_v11 = vrot.slane %v915_v2, 1  ;;  %v3125_v13 = vadd.f32 %v3093_v0, %v2762_v9  ;;  %v922_v14 = vadd.f32 %v921_v31, %v920_v60  ;;  %v260_v9 = vld [vmem:[#allocation6 + $0x2e0] sm:$0xff] }
  0xc0   :  { %v929_v15 = vadd.f32 %v928_v6, %v927_v61  ;;  %v936_v16 = vadd.f32 %v935_v7, %v934_v62  ;;  %v942_v19 = vrot.slane %v941_v12, 2  ;;  %v947_v20 = vrot.slane %v946_v8, 4 }
  0xc1   :  { %v917_v18 = vadd.f32 %v916_v11, %v915_v2  ;;  %v953_v21 = vadd.f32 %v247_v5, %v246_v4  ;;  %v3157_v27 = vmul.f32 0.05882353, %v3125_v13  ;;  %v923_v25 = vrot.slane %v922_v14, 1 }
  0xc2   :  { %v930_v38 = vrot.slane %v929_v15, 1  ;;  %v937_v28 = vrot.slane %v936_v16, 1  ;;  %v943_v30 = vadd.f32 %v942_v19, %v941_v12  ;;  %v948_v32 = vadd.f32 %v947_v20, %v946_v8 }
  0xc3   :  { %v954_v33 = vrot.slane %v953_v21, 4  ;;  %v2763_v34 = vsel %vm2728_vm0, %v917_v18, %v910_v10  ;;  %3825 = vmatmul.mubr.f32.gmra.mrb[2].mxu0 %v3157_v27  ;;  %v924_v40 = vadd.f32 %v923_v25, %v922_v14  ;;  %v960_v43 = vadd.f32 %v249_v22, %v248_v17  ;;  %v261_v10 = vld [vmem:[#allocation6 + $0x2e8] sm:$0xff]  ;;  %v3094_v17 = vld [vmem:[#allocation3 + $0x20] sm:$0xff]  ;;  %v262_v27 = vld [vmem:[#allocation6 + $0x2f0] sm:$0xff] }
  0xc4   :  { %v931_v41 = vadd.f32 %v930_v38, %v929_v15  ;;  %v938_v42 = vadd.f32 %v937_v28, %v936_v16  ;;  %v944_v44 = vrot.slane %v943_v30, 1  ;;  %v949_v45 = vrot.slane %v948_v32, 2  ;;  %v263_v25 = vld [vmem:[#allocation6 + $0x2f8] sm:$0xff] }
  0xc5   :  { %v955_v46 = vadd.f32 %v954_v33, %v953_v21  ;;  %v967_v47 = vadd.f32 %v251_v24, %v250_v23  ;;  %v2764_v48 = vsel %vm2730_vm1, %v924_v40, %v2763_v34  ;;  %v961_v49 = vrot.slane %v960_v43, 4 }
  0xc6   :  { %v974_v26 = vadd.f32 %v253_v35, %v252_v29  ;;  %v981_v50 = vadd.f32 %v255_v37, %v254_v36  ;;  %v945_v51 = vadd.f32 %v944_v44, %v943_v30  ;;  %v950_v52 = vadd.f32 %v949_v45, %v948_v32  ;;  %v264_v35 = vld [vmem:[#allocation6 + $0x300] sm:$0xff]  ;;  %v265_v36 = vld [vmem:[#allocation6 + $0x308] sm:$0xff]  ;;  %v267_v44 = vld [vmem:[#allocation6 + $0x318] sm:$0xff] }
  0xc7   :  { %v956_v53 = vrot.slane %v955_v46, 2  ;;  %v2765_v54 = vsel %vm2732_vm2, %v931_v41, %v2764_v48  ;;  %v962_v59 = vadd.f32 %v961_v49, %v960_v43  ;;  %v968_v60 = vrot.slane %v967_v47, 4  ;;  %v266_v43 = vld [vmem:[#allocation6 + $0x310] sm:$0xff] }
  0xc8   :  { %v2766_v56 = vsel %vm2734_vm3, %v938_v42, %v2765_v54  ;;  %v975_v61 = vrot.slane %v974_v26, 4  ;;  %v951_v62 = vrot.slane %v950_v52, 1  ;;  %v982_v1 = vrot.slane %v981_v50, 4  ;;  %v268_v54 = vld [vmem:[#allocation6 + $0x320] sm:$0xff] }
  0xc9   :  { %v957_v63 = vadd.f32 %v956_v53, %v955_v46  ;;  %v2767_v0 = vsel %vm2736_vm4, %v945_v51, %v2766_v56  ;;  %v963_v2 = vrot.slane %v962_v59, 2  ;;  %v969_v3 = vadd.f32 %v968_v60, %v967_v47 }
  0xca   :  { %v976_v4 = vadd.f32 %v975_v61, %v974_v26  ;;  %v988_v5 = vadd.f32 %v257_v39, %v256_v55  ;;  %v952_v31 = vadd.f32 %v951_v62, %v950_v52  ;;  %v983_v7 = vadd.f32 %v982_v1, %v981_v50  ;;  %v269_v55 = vld [vmem:[#allocation6 + $0x328] sm:$0xff]  ;;  %v270_v61 = vld [vmem:[#allocation6 + $0x330] sm:$0xff]  ;;  %v271_v62 = vld [vmem:[#allocation6 + $0x338] sm:$0xff] }
  0xcb   :  { %v958_v6 = vrot.slane %v957_v63, 1  ;;  %v995_v8 = vadd.f32 %v259_v58, %v258_v57  ;;  %v964_v11 = vadd.f32 %v963_v2, %v962_v59  ;;  %v970_v12 = vrot.slane %v969_v3, 2  ;;  %v272_v1 = vld [vmem:[#allocation6 + $0x340] sm:$0xff]  ;;  %v273_v2 = vld [vmem:[#allocation6 + $0x348] sm:$0xff] }
  0xcc   :  { %v977_v13 = vrot.slane %v976_v4, 2  ;;  %v989_v14 = vrot.slane %v988_v5, 4  ;;  %v2768_v16 = vsel %vm2738_vm5, %v952_v31, %v2767_v0  ;;  %v984_v18 = vrot.slane %v983_v7, 2 }
  0xcd   :  { %v959_v15 = vadd.f32 %v958_v6, %v957_v63  ;;  %v996_v19 = vrot.slane %v995_v8, 4  ;;  %v965_v20 = vrot.slane %v964_v11, 1  ;;  %v971_v21 = vadd.f32 %v970_v12, %v969_v3 }
  0xce   :  { %v978_v22 = vadd.f32 %v977_v13, %v976_v4  ;;  %v990_v23 = vadd.f32 %v989_v14, %v988_v5  ;;  %v985_v38 = vadd.f32 %v984_v18, %v983_v7  ;;  %v1002_v29 = vadd.f32 %v261_v10, %v260_v9  ;;  %v274_v14 = vld [vmem:[#allocation6 + $0x350] sm:$0xff] }
  0xcf   :  { %v2769_v24 = vsel %vm2740_vm6, %v959_v15, %v2768_v16  ;;  %v997_v28 = vadd.f32 %v996_v19, %v995_v8  ;;  %v966_v32 = vadd.f32 %v965_v20, %v964_v11  ;;  %v972_v33 = vrot.slane %v971_v21, 1  ;;  %v275_v15 = vld [vmem:[#allocation6 + $0x358] sm:$0xff] }
  0xd0   :  { %v3126_v30 = vadd.f32 %v3094_v17, %v2769_v24  ;;  %v979_v34 = vrot.slane %v978_v22, 1  ;;  %v986_v37 = vrot.slane %v985_v38, 1  ;;  %v991_v40 = vrot.slane %v990_v23, 2 }
  0xd1   :  { %v998_v41 = vrot.slane %v997_v28, 2  ;;  %v1003_v42 = vrot.slane %v1002_v29, 4  ;;  %v973_v46 = vadd.f32 %v972_v33, %v971_v21  ;;  %v1009_v48 = vadd.f32 %v263_v25, %v262_v27 }
  0xd2   :  { %v3158_v45 = vmul.f32 0.05882353, %v3126_v30  ;;  %v980_v47 = vadd.f32 %v979_v34, %v978_v22  ;;  %v987_v49 = vadd.f32 %v986_v37, %v985_v38  ;;  %v992_v26 = vadd.f32 %v991_v40, %v990_v23  ;;  %v276_v38 = vld [vmem:[#allocation6 + $0x360] sm:$0xff]  ;;  %v3095_v40 = vld [vmem:[#allocation3 + $0x28] sm:$0xff] }
  0xd3   :  { %v999_v50 = vadd.f32 %v998_v41, %v997_v28  ;;  %v1004_v51 = vadd.f32 %v1003_v42, %v1002_v29  ;;  %v1010_v52 = vrot.slane %v1009_v48, 4  ;;  %v2770_v53 = vsel %vm2728_vm0, %v973_v46, %v966_v32  ;;  %v277_v28 = vld [vmem:[#allocation6 + $0x368] sm:$0xff] }
  0xd4   :  { %3827 = vmatprep.mubr.f32.mxu0 %v3158_v45  ;;  %v1016_v39 = vadd.f32 %v265_v36, %v264_v35  ;;  %v1023_v56 = vadd.f32 %v267_v44, %v266_v43  ;;  %v993_v57 = vrot.slane %v992_v26, 1  ;;  %v2771_v60 = vsel %vm2730_vm1, %v980_v47, %v2770_v53  ;;  %v278_v44 = vld [vmem:[#allocation6 + $0x370] sm:$0xff]  ;;  %v279_v45 = vld [vmem:[#allocation6 + $0x378] sm:$0xff] }
  0xd5   :  { %v1000_v58 = vrot.slane %v999_v50, 1  ;;  %v1005_v59 = vrot.slane %v1004_v51, 2  ;;  %v1011_v63 = vadd.f32 %v1010_v52, %v1009_v48  ;;  %v2772_v0 = vsel %vm2732_vm2, %v987_v49, %v2771_v60 }
  0xd6   :  { %v1017_v3 = vrot.slane %v1016_v39, 4  ;;  %v1024_v4 = vrot.slane %v1023_v56, 4  ;;  %v994_v5 = vadd.f32 %v993_v57, %v992_v26  ;;  %v1030_v7 = vadd.f32 %v269_v55, %v268_v54  ;;  %v281_v57 = vld [vmem:[#allocation6 + $0x388] sm:$0xff] }
  0xd7   :  { %v1001_v31 = vadd.f32 %v1000_v58, %v999_v50  ;;  %v1006_v6 = vadd.f32 %v1005_v59, %v1004_v51  ;;  %v1012_v8 = vrot.slane %v1011_v63, 2  ;;  %v1037_v11 = vadd.f32 %v271_v62, %v270_v61  ;;  %v282_v62 = vld [vmem:[#allocation6 + $0x390] sm:$0xff] }
  0xd8   :  { %v1018_v9 = vadd.f32 %v1017_v3, %v1016_v39  ;;  %v1025_v10 = vadd.f32 %v1024_v4, %v1023_v56  ;;  %v2773_v13 = vsel %vm2734_vm3, %v994_v5, %v2772_v0  ;;  %v1031_v16 = vrot.slane %v1030_v7, 4  ;;  %v280_v56 = vld [vmem:[#allocation6 + $0x380] sm:$0xff] }
  0xd9   :  { %v1007_v12 = vrot.slane %v1006_v6, 1  ;;  %v1044_v17 = vadd.f32 %v273_v2, %v272_v1  ;;  %v1013_v18 = vadd.f32 %v1012_v8, %v1011_v63  ;;  %v2774_v19 = vsel %vm2736_vm4, %v1001_v31, %v2773_v13  ;;  %v283_v63 = vld [vmem:[#allocation6 + $0x398] sm:$0xff]  ;;  %v284_v4 = vld [vmem:[#allocation6 + $0x3a0] sm:$0xff]  ;;  %v286_v8 = vld [vmem:[#allocation6 + $0x3b0] sm:$0xff] }
  0xda   :  { %v1019_v20 = vrot.slane %v1018_v9, 2  ;;  %v1026_v21 = vrot.slane %v1025_v10, 2  ;;  %v1032_v23 = vadd.f32 %v1031_v16, %v1030_v7  ;;  %v1038_v24 = vrot.slane %v1037_v11, 4  ;;  %v285_v7 = vld [vmem:[#allocation6 + $0x3a8] sm:$0xff] }
  0xdb   :  { %v1008_v22 = vadd.f32 %v1007_v12, %v1006_v6  ;;  %v1045_v27 = vrot.slane %v1044_v17, 4  ;;  %v1014_v25 = vrot.slane %v1013_v18, 1  ;;  %v1051_v32 = vadd.f32 %v275_v15, %v274_v14 }
  0xdc   :  { %v1020_v29 = vadd.f32 %v1019_v20, %v1018_v9  ;;  %v1027_v30 = vadd.f32 %v1026_v21, %v1025_v10  ;;  %v1033_v34 = vrot.slane %v1032_v23, 2  ;;  %v1039_v35 = vadd.f32 %v1038_v24, %v1037_v11  ;;  %v287_v9 = vld [vmem:[#allocation6 + $0x3b8] sm:$0xff]  ;;  %v288_v20 = vld [vmem:[#allocation6 + $0x3c0] sm:$0xff]  ;;  %v289_v21 = vld [vmem:[#allocation6 + $0x3c8] sm:$0xff] }
  0xdd   :  { %v2775_v33 = vsel %vm2738_vm5, %v1008_v22, %v2774_v19  ;;  %v1046_v36 = vadd.f32 %v1045_v27, %v1044_v17  ;;  %v1015_v37 = vadd.f32 %v1014_v25, %v1013_v18  ;;  %v1052_v43 = vrot.slane %v1051_v32, 4 }
  0xde   :  { %v1021_v41 = vrot.slane %v1020_v29, 1  ;;  %v1028_v42 = vrot.slane %v1027_v30, 1  ;;  %v1034_v46 = vadd.f32 %v1033_v34, %v1032_v23  ;;  %v1040_v47 = vrot.slane %v1039_v35, 2 }
  0xdf   :  { %v1047_v48 = vrot.slane %v1046_v36, 2  ;;  %v1058_v49 = vadd.f32 %v277_v28, %v276_v38  ;;  %v2776_v26 = vsel %vm2740_vm6, %v1015_v37, %v2775_v33  ;;  %v1053_v52 = vadd.f32 %v1052_v43, %v1051_v32 }
  0xe0   :  { %v1022_v50 = vadd.f32 %v1021_v41, %v1020_v29  ;;  %v1029_v51 = vadd.f32 %v1028_v42, %v1027_v30  ;;  %v3127_v53 = vadd.f32 %v3095_v40, %v2776_v26  ;;  %v1035_v54 = vrot.slane %v1034_v46, 1  ;;  %v290_v29 = vld [vmem:[#allocation6 + $0x3d0] sm:$0xff]  ;;  %v291_v30 = vld [vmem:[#allocation6 + $0x3d8] sm:$0xff]  ;;  %v292_v26 = vld [vmem:[#allocation6 + $0x3e0] sm:$0xff] }
  0xe1   :  { %v1041_v55 = vadd.f32 %v1040_v47, %v1039_v35  ;;  %v1048_v39 = vadd.f32 %v1047_v48, %v1046_v36  ;;  %v1054_v58 = vrot.slane %v1053_v52, 2  ;;  %v1059_v59 = vrot.slane %v1058_v49, 4 }
  0xe2   :  { %v1065_v60 = vadd.f32 %v279_v45, %v278_v44  ;;  %v2777_v61 = vsel %vm2728_vm0, %v1029_v51, %v1022_v50  ;;  %v3159_v0 = vmul.f32 0.05882353, %v3127_v53  ;;  %v1036_v1 = vadd.f32 %v1035_v54, %v1034_v46  ;;  %v293_v50 = vld [vmem:[#allocation6 + $0x3e8] sm:$0xff] }
  0xe3   :  { %v1042_v2 = vrot.slane %v1041_v55, 1  ;;  %v1049_v3 = vrot.slane %v1048_v39, 1  ;;  %v1055_v5 = vadd.f32 %v1054_v58, %v1053_v52  ;;  %v1060_v31 = vadd.f32 %v1059_v59, %v1058_v49 }
  0xe4   :  { %v1066_v6 = vrot.slane %v1065_v60, 4  ;;  %v1072_v10 = vadd.f32 %v281_v57, %v280_v56  ;;  %3828 = vmatmul.mubr.f32.gmra.mrb[4].mxu0 %v3159_v0  ;;  %v2778_v13 = vsel %vm2730_vm1, %v1036_v1, %v2777_v61  ;;  %v1079_v14 = vadd.f32 %v283_v63, %v282_v62  ;;  %v3096_v56 = vld [vmem:[#allocation3 + $0x30] sm:$0xff]  ;;  %v295_v1 = vld [vmem:[#allocation6 + $0x3f8] sm:$0xff] }
  0xe5   :  { %v1043_v11 = vadd.f32 %v1042_v2, %v1041_v55  ;;  %v1050_v12 = vadd.f32 %v1049_v3, %v1048_v39  ;;  %v1056_v15 = vrot.slane %v1055_v5, 1  ;;  %v1061_v16 = vrot.slane %v1060_v31, 2  ;;  %v294_v0 = vld [vmem:[#allocation6 + $0x3f0] sm:$0xff] }
  0xe6   :  { %v1067_v17 = vadd.f32 %v1066_v6, %v1065_v60  ;;  %v1073_v18 = vrot.slane %v1072_v10, 4  ;;  %v1080_v22 = vrot.slane %v1079_v14, 4  ;;  %v1086_v23 = vadd.f32 %v285_v7, %v284_v4 }
  0xe7   :  { %v2779_v19 = vsel %vm2732_vm2, %v1043_v11, %v2778_v13  ;;  %v1093_v24 = vadd.f32 %v287_v9, %v286_v8  ;;  %v1057_v27 = vadd.f32 %v1056_v15, %v1055_v5  ;;  %v1062_v25 = vadd.f32 %v1061_v16, %v1060_v31  ;;  %v296_v8 = vld [vmem:[#allocation6 + $0x400] sm:$0xff]  ;;  %v297_v13 = vld [vmem:[#allocation6 + $0x408] sm:$0xff]  ;;  %v299_v15 = vld [vmem:[#allocation6 + $0x418] sm:$0xff] }
  0xe8   :  { %v1068_v38 = vrot.slane %v1067_v17, 2  ;;  %v2780_v28 = vsel %vm2734_vm3, %v1050_v12, %v2779_v19  ;;  %v1074_v32 = vadd.f32 %v1073_v18, %v1072_v10  ;;  %v1081_v33 = vadd.f32 %v1080_v22, %v1079_v14  ;;  %v298_v14 = vld [vmem:[#allocation6 + $0x410] sm:$0xff] }
  0xe9   :  { %v1087_v34 = vrot.slane %v1086_v23, 4  ;;  %v1094_v35 = vrot.slane %v1093_v24, 4  ;;  %v1063_v36 = vrot.slane %v1062_v25, 1  ;;  %v2781_v40 = vsel %vm2736_vm4, %v1057_v27, %v2780_v28  ;;  %v301_v27 = vld [vmem:[#allocation6 + $0x428] sm:$0xff]  ;;  %v302_v28 = vld [vmem:[#allocation6 + $0x430] sm:$0xff] }
  0xea   :  { %v1069_v37 = vadd.f32 %v1068_v38, %v1067_v17  ;;  %v1100_v41 = vadd.f32 %v289_v21, %v288_v20  ;;  %v1075_v42 = vrot.slane %v1074_v32, 2  ;;  %v1082_v43 = vrot.slane %v1081_v33, 2 }
  0xeb   :  { %v1088_v44 = vadd.f32 %v1087_v34, %v1086_v23  ;;  %v1095_v45 = vadd.f32 %v1094_v35, %v1093_v24  ;;  %v1064_v46 = vadd.f32 %v1063_v36, %v1062_v25  ;;  %v1107_v49 = vadd.f32 %v291_v30, %v290_v29  ;;  %v300_v24 = vld [vmem:[#allocation6 + $0x420] sm:$0xff]  ;;  %v303_v29 = vld [vmem:[#allocation6 + $0x438] sm:$0xff] }
  0xec   :  { %v1070_v47 = vrot.slane %v1069_v37, 1  ;;  %v1101_v48 = vrot.slane %v1100_v41, 4  ;;  %v1076_v51 = vadd.f32 %v1075_v42, %v1074_v32  ;;  %v1083_v52 = vadd.f32 %v1082_v43, %v1081_v33 }
  0xed   :  { %v1089_v53 = vrot.slane %v1088_v44, 2  ;;  %v1096_v54 = vrot.slane %v1095_v45, 2  ;;  %v2782_v39 = vsel %vm2738_vm5, %v1064_v46, %v2781_v40  ;;  %v1108_v58 = vrot.slane %v1107_v49, 4  ;;  %v304_v40 = vld [vmem:[#allocation6 + $0x440] sm:$0xff] }
  0xee   :  { %v1071_v55 = vadd.f32 %v1070_v47, %v1069_v37  ;;  %v1102_v57 = vadd.f32 %v1101_v48, %v1100_v41  ;;  %v1077_v59 = vrot.slane %v1076_v51, 1  ;;  %v1084_v60 = vrot.slane %v1083_v52, 1  ;;  %v305_v41 = vld [vmem:[#allocation6 + $0x448] sm:$0xff] }
  0xef   :  { %v1090_v61 = vadd.f32 %v1089_v53, %v1088_v44  ;;  %v1097_v62 = vadd.f32 %v1096_v54, %v1095_v45  ;;  %v1109_v3 = vadd.f32 %v1108_v58, %v1107_v49  ;;  %v1114_v4 = vadd.f32 %v293_v50, %v292_v26  ;;  %v306_v26 = vld [vmem:[#allocation6 + $0x450] sm:$0xff]  ;;  %v307_v50 = vld [vmem:[#allocation6 + $0x458] sm:$0xff] }
  0xf0   :  { %v2783_v63 = vsel %vm2740_vm6, %v1071_v55, %v2782_v39  ;;  %v1103_v2 = vrot.slane %v1102_v57, 2  ;;  %v1078_v31 = vadd.f32 %v1077_v59, %v1076_v51  ;;  %v1085_v6 = vadd.f32 %v1084_v60, %v1083_v52 }
  0xf1   :  { %v3128_v5 = vadd.f32 %v3096_v56, %v2783_v63  ;;  %v1091_v7 = vrot.slane %v1090_v61, 1  ;;  %v1098_v9 = vrot.slane %v1097_v62, 1  ;;  %v1110_v11 = vrot.slane %v1109_v3, 2 }
  0xf2   :  { %v1104_v10 = vadd.f32 %v1103_v2, %v1102_v57  ;;  %v1115_v12 = vrot.slane %v1114_v4, 4  ;;  %v1121_v18 = vadd.f32 %v295_v1, %v294_v0  ;;  %v2784_v19 = vsel %vm2728_vm0, %v1085_v6, %v1078_v31  ;;  %v308_v2 = vld [vmem:[#allocation6 + $0x460] sm:$0xff] }
  0xf3   :  { %v3160_v16 = vmul.f32 0.05882353, %v3128_v5  ;;  %v1092_v17 = vadd.f32 %v1091_v7, %v1090_v61  ;;  %v1099_v20 = vadd.f32 %v1098_v9, %v1097_v62  ;;  %v1111_v22 = vadd.f32 %v1110_v11, %v1109_v3  ;;  %v309_v3 = vld [vmem:[#allocation6 + $0x468] sm:$0xff]  ;;  %v3097_v11 = vld [vmem:[#allocation3 + $0x38] sm:$0xff] }
  0xf4   :  { %v1105_v21 = vrot.slane %v1104_v10, 1  ;;  %v1116_v23 = vadd.f32 %v1115_v12, %v1114_v4  ;;  %v1122_v25 = vrot.slane %v1121_v18, 4  ;;  %v1128_v30 = vadd.f32 %v297_v13, %v296_v8 }
  0xf5   :  { %3830 = vmatprep.mubr.f32.mxu0 %v3160_v16  ;;  %v2785_v38 = vsel %vm2730_vm1, %v1092_v17, %v2784_v19  ;;  %v1135_v32 = vadd.f32 %v299_v15, %v298_v14  ;;  %v1112_v34 = vrot.slane %v1111_v22, 1  ;;  %v1142_v44 = vadd.f32 %v301_v27, %v300_v24  ;;  %v310_v15 = vld [vmem:[#allocation6 + $0x470] sm:$0xff]  ;;  %v311_v16 = vld [vmem:[#allocation6 + $0x478] sm:$0xff] }
  0xf6   :  { %v1106_v33 = vadd.f32 %v1105_v21, %v1104_v10  ;;  %v1117_v35 = vrot.slane %v1116_v23, 2  ;;  %v2786_v36 = vsel %vm2732_vm2, %v1099_v20, %v2785_v38  ;;  %v1123_v37 = vadd.f32 %v1122_v25, %v1121_v18 }
  0xf7   :  { %v1129_v42 = vrot.slane %v1128_v30, 4  ;;  %v1136_v43 = vrot.slane %v1135_v32, 4  ;;  %v1113_v45 = vadd.f32 %v1112_v34, %v1111_v22  ;;  %v1149_v48 = vadd.f32 %v303_v29, %v302_v28  ;;  %v312_v29 = vld [vmem:[#allocation6 + $0x480] sm:$0xff] }
  0xf8   :  { %v1118_v46 = vadd.f32 %v1117_v35, %v1116_v23  ;;  %v2787_v47 = vsel %vm2734_vm3, %v1106_v33, %v2786_v36  ;;  %v1124_v49 = vrot.slane %v1123_v37, 2  ;;  %v1143_v53 = vrot.slane %v1142_v44, 4  ;;  %v314_v36 = vld [vmem:[#allocation6 + $0x490] sm:$0xff] }
  0xf9   :  { %v1130_v51 = vadd.f32 %v1129_v42, %v1128_v30  ;;  %v1137_v52 = vadd.f32 %v1136_v43, %v1135_v32  ;;  %v2788_v55 = vsel %vm2736_vm4, %v1113_v45, %v2787_v47  ;;  %v1150_v39 = vrot.slane %v1149_v48, 4  ;;  %v313_v30 = vld [vmem:[#allocation6 + $0x488] sm:$0xff] }
  0xfa   :  { %v1119_v54 = vrot.slane %v1118_v46, 1  ;;  %v1156_v56 = vadd.f32 %v305_v41, %v304_v40  ;;  %v1125_v57 = vadd.f32 %v1124_v49, %v1123_v37  ;;  %v1144_v60 = vadd.f32 %v1143_v53, %v1142_v44  ;;  %v315_v37 = vld [vmem:[#allocation6 + $0x498] sm:$0xff]  ;;  %v316_v44 = vld [vmem:[#allocation6 + $0x4a0] sm:$0xff]  ;;  %v317_v45 = vld [vmem:[#allocation6 + $0x4a8] sm:$0xff] }
  0xfb   :  { %v1131_v58 = vrot.slane %v1130_v51, 2  ;;  %v1138_v59 = vrot.slane %v1137_v52, 2  ;;  %v1151_v62 = vadd.f32 %v1150_v39, %v1149_v48  ;;  %v1163_v0 = vadd.f32 %v307_v50, %v306_v26  ;;  %v318_v49 = vld [vmem:[#allocation6 + $0x4b0] sm:$0xff]  ;;  %v319_v26 = vld [vmem:[#allocation6 + $0x4b8] sm:$0xff] }
  0xfc   :  { %v1120_v61 = vadd.f32 %v1119_v54, %v1118_v46  ;;  %v1157_v63 = vrot.slane %v1156_v56, 4  ;;  %v1126_v1 = vrot.slane %v1125_v57, 1  ;;  %v1145_v31 = vrot.slane %v1144_v60, 2 }
  0xfd   :  { %v1132_v4 = vadd.f32 %v1131_v58, %v1130_v51  ;;  %v1139_v5 = vadd.f32 %v1138_v59, %v1137_v52  ;;  %v1152_v7 = vrot.slane %v1151_v62, 2  ;;  %v1164_v9 = vrot.slane %v1163_v0, 4 }
  0xfe   :  { %v2789_v6 = vsel %vm2738_vm5, %v1120_v61, %v2788_v55  ;;  %v1158_v8 = vadd.f32 %v1157_v63, %v1156_v56  ;;  %v1127_v10 = vadd.f32 %v1126_v1, %v1125_v57  ;;  %v1146_v14 = vadd.f32 %v1145_v31, %v1144_v60  ;;  %v320_v56 = vld [vmem:[#allocation6 + $0x4c0] sm:$0xff]  ;;  %v321_v57 = vld [vmem:[#allocation6 + $0x4c8] sm:$0xff] }
  0xff   :  { %v1133_v12 = vrot.slane %v1132_v4, 1  ;;  %v1140_v13 = vrot.slane %v1139_v5, 1  ;;  %v1153_v17 = vadd.f32 %v1152_v7, %v1151_v62  ;;  %v1165_v19 = vadd.f32 %v1164_v9, %v1163_v0 }
 0x100   :  { %v1159_v18 = vrot.slane %v1158_v8, 2  ;;  %v1170_v20 = vadd.f32 %v309_v3, %v308_v2  ;;  %v2790_v21 = vsel %vm2740_vm6, %v1127_v10, %v2789_v6  ;;  %v1147_v24 = vrot.slane %v1146_v14, 1  ;;  %v322_v2 = vld [vmem:[#allocation6 + $0x4d0] sm:$0xff]  ;;  %v323_v3 = vld [vmem:[#allocation6 + $0x4d8] sm:$0xff] }
 0x101   :  { %v1134_v22 = vadd.f32 %v1133_v12, %v1132_v4  ;;  %v1141_v23 = vadd.f32 %v1140_v13, %v1139_v5  ;;  %v3129_v27 = vadd.f32 %v3097_v11, %v2790_v21  ;;  %v1154_v25 = vrot.slane %v1153_v17, 1  ;;  %v324_v21 = vld [vmem:[#allocation6 + $0x4e0] sm:$0xff] }
 0x102   :  { %v1160_v38 = vadd.f32 %v1159_v18, %v1158_v8  ;;  %v1166_v28 = vrot.slane %v1165_v19, 2  ;;  %v1148_v32 = vadd.f32 %v1147_v24, %v1146_v14  ;;  %v1171_v33 = vrot.slane %v1170_v20, 4 }
 0x103   :  { %v1177_v34 = vadd.f32 %v311_v16, %v310_v15  ;;  %v2791_v35 = vsel %vm2728_vm0, %v1141_v23, %v1134_v22  ;;  %v3161_v40 = vmul.f32 0.05882353, %v3129_v27  ;;  %v1155_v41 = vadd.f32 %v1154_v25, %v1153_v17  ;;  %v325_v22 = vld [vmem:[#allocation6 + $0x4e8] sm:$0xff] }
 0x104   :  { %v1161_v42 = vrot.slane %v1160_v38, 1  ;;  %v1167_v43 = vadd.f32 %v1166_v28, %v1165_v19  ;;  %v1172_v46 = vadd.f32 %v1171_v33, %v1170_v20  ;;  %v2792_v48 = vsel %vm2730_vm1, %v1148_v32, %v2791_v35  ;;  %v326_v33 = vld [vmem:[#allocation6 + $0x4f0] sm:$0xff] }
 0x105   :  { %v1178_v47 = vrot.slane %v1177_v34, 4  ;;  %v1184_v50 = vadd.f32 %v313_v30, %v312_v29  ;;  %3831 = vmatmul.mubr.f32.gmra.mrb[6].mxu0 %v3161_v40  ;;  %v2793_v53 = vsel %vm2732_vm2, %v1155_v41, %v2792_v48  ;;  %v1191_v54 = vadd.f32 %v315_v37, %v314_v36  ;;  %v3098_v29 = vld [vmem:[#allocation3 + $0x40] sm:$0xff] }
 0x106   :  { %v1162_v51 = vadd.f32 %v1161_v42, %v1160_v38  ;;  %v1168_v52 = vrot.slane %v1167_v43, 1  ;;  %v1173_v55 = vrot.slane %v1172_v46, 2  ;;  %v1198_v59 = vadd.f32 %v317_v45, %v316_v44 }
 0x107   :  { %v1179_v39 = vadd.f32 %v1178_v47, %v1177_v34  ;;  %v1185_v58 = vrot.slane %v1184_v50, 4  ;;  %v1192_v62 = vrot.slane %v1191_v54, 4  ;;  %v1205_v63 = vadd.f32 %v319_v26, %v318_v49  ;;  %v327_v34 = vld [vmem:[#allocation6 + $0x4f8] sm:$0xff]  ;;  %v328_v49 = vld [vmem:[#allocation6 + $0x500] sm:$0xff] }
 0x108   :  { %v1169_v60 = vadd.f32 %v1168_v52, %v1167_v43  ;;  %v2794_v61 = vsel %vm2734_vm3, %v1162_v51, %v2793_v53  ;;  %v1174_v0 = vadd.f32 %v1173_v55, %v1172_v46  ;;  %v1199_v5 = vrot.slane %v1198_v59, 4  ;;  %v329_v53 = vld [vmem:[#allocation6 + $0x508] sm:$0xff]  ;;  %v331_v55 = vld [vmem:[#allocation6 + $0x518] sm:$0xff] }
 0x109   :  { %v1180_v1 = vrot.slane %v1179_v39, 2  ;;  %v1186_v4 = vadd.f32 %v1185_v58, %v1184_v50  ;;  %v1193_v6 = vadd.f32 %v1192_v62, %v1191_v54  ;;  %v1206_v7 = vrot.slane %v1205_v63, 4  ;;  %v330_v54 = vld [vmem:[#allocation6 + $0x510] sm:$0xff] }
 0x10a   :  { %v2795_v31 = vsel %vm2736_vm4, %v1169_v60, %v2794_v61  ;;  %v1212_v8 = vadd.f32 %v321_v57, %v320_v56  ;;  %v1175_v9 = vrot.slane %v1174_v0, 1  ;;  %v1200_v12 = vadd.f32 %v1199_v5, %v1198_v59  ;;  %v332_v59 = vld [vmem:[#allocation6 + $0x520] sm:$0xff]  ;;  %v333_v60 = vld [vmem:[#allocation6 + $0x528] sm:$0xff] }
 0x10b   :  { %v1181_v10 = vadd.f32 %v1180_v1, %v1179_v39  ;;  %v1187_v11 = vrot.slane %v1186_v4, 2  ;;  %v1194_v13 = vrot.slane %v1193_v6, 2  ;;  %v1207_v14 = vadd.f32 %v1206_v7, %v1205_v63  ;;  %v334_v1 = vld [vmem:[#allocation6 + $0x530] sm:$0xff] }
 0x10c   :  { %v1213_v15 = vrot.slane %v1212_v8, 4  ;;  %v1219_v16 = vadd.f32 %v323_v3, %v322_v2  ;;  %v1176_v17 = vadd.f32 %v1175_v9, %v1174_v0  ;;  %v1201_v20 = vrot.slane %v1200_v12, 2  ;;  %v335_v2 = vld [vmem:[#allocation6 + $0x538] sm:$0xff]  ;;  %v336_v9 = vld [vmem:[#allocation6 + $0x540] sm:$0xff] }
 0x10d   :  { %v1182_v18 = vrot.slane %v1181_v10, 1  ;;  %v1188_v19 = vadd.f32 %v1187_v11, %v1186_v4  ;;  %v1195_v23 = vadd.f32 %v1194_v13, %v1193_v6  ;;  %v1208_v24 = vrot.slane %v1207_v14, 2 }
 0x10e   :  { %v1214_v27 = vadd.f32 %v1213_v15, %v1212_v8  ;;  %v1220_v25 = vrot.slane %v1219_v16, 4  ;;  %v2796_v28 = vsel %vm2738_vm5, %v1176_v17, %v2795_v31  ;;  %v1202_v32 = vadd.f32 %v1201_v20, %v1200_v12  ;;  %v338_v20 = vld [vmem:[#allocation6 + $0x550] sm:$0xff] }
 0x10f   :  { %v1183_v38 = vadd.f32 %v1182_v18, %v1181_v10  ;;  %v1189_v30 = vrot.slane %v1188_v19, 1  ;;  %v1196_v35 = vrot.slane %v1195_v23, 1  ;;  %v1209_v36 = vadd.f32 %v1208_v24, %v1207_v14  ;;  %v337_v10 = vld [vmem:[#allocation6 + $0x548] sm:$0xff] }
 0x110   :  { %v1215_v37 = vrot.slane %v1214_v27, 2  ;;  %v1221_v40 = vadd.f32 %v1220_v25, %v1219_v16  ;;  %v1203_v43 = vrot.slane %v1202_v32, 1  ;;  %v1226_v44 = vadd.f32 %v325_v22, %v324_v21  ;;  %v339_v21 = vld [vmem:[#allocation6 + $0x558] sm:$0xff] }
 0x111   :  { %v2797_v41 = vsel %vm2740_vm6, %v1183_v38, %v2796_v28  ;;  %v1190_v42 = vadd.f32 %v1189_v30, %v1188_v19  ;;  %v1197_v46 = vadd.f32 %v1196_v35, %v1195_v23  ;;  %v1210_v47 = vrot.slane %v1209_v36, 1 }
 0x112   :  { %v3130_v45 = vadd.f32 %v3098_v29, %v2797_v41  ;;  %v1216_v48 = vadd.f32 %v1215_v37, %v1214_v27  ;;  %v1204_v26 = vadd.f32 %v1203_v43, %v1202_v32  ;;  %v1222_v50 = vrot.slane %v1221_v40, 2  ;;  %v340_v41 = vld [vmem:[#allocation6 + $0x560] sm:$0xff] }
 0x113   :  { %v1227_v51 = vrot.slane %v1226_v44, 4  ;;  %v1233_v52 = vadd.f32 %v327_v34, %v326_v33  ;;  %v1211_v56 = vadd.f32 %v1210_v47, %v1209_v36  ;;  %v2798_v58 = vsel %vm2728_vm0, %v1197_v46, %v1190_v42  ;;  %v341_v42 = vld [vmem:[#allocation6 + $0x568] sm:$0xff] }
 0x114   :  { %v3162_v39 = vmul.f32 0.05882353, %v3130_v45  ;;  %v1217_v57 = vrot.slane %v1216_v48, 1  ;;  %v1223_v61 = vadd.f32 %v1222_v50, %v1221_v40  ;;  %v2799_v0 = vsel %vm2730_vm1, %v1204_v26, %v2798_v58 }
 0x115   :  { %v1228_v62 = vadd.f32 %v1227_v51, %v1226_v44  ;;  %v1234_v63 = vrot.slane %v1233_v52, 4  ;;  %v2800_v4 = vsel %vm2732_vm2, %v1211_v56, %v2799_v0  ;;  %v1240_v5 = vadd.f32 %v329_v53, %v328_v49  ;;  %v3099_v49 = vld [vmem:[#allocation3 + $0x48] sm:$0xff]  ;;  %v343_v56 = vld [vmem:[#allocation6 + $0x578] sm:$0xff]  ;;  %v344_v0 = vld [vmem:[#allocation6 + $0x580] sm:$0xff] }
 0x116   :  { %3833 = vmatprep.mubr.f32.mxu0 %v3162_v39  ;;  %v1218_v3 = vadd.f32 %v1217_v57, %v1216_v48  ;;  %v1247_v31 = vadd.f32 %v331_v55, %v330_v54  ;;  %v1224_v6 = vrot.slane %v1223_v61, 1  ;;  %v1254_v11 = vadd.f32 %v333_v60, %v332_v59  ;;  %v342_v39 = vld [vmem:[#allocation6 + $0x570] sm:$0xff] }
 0x117   :  { %v1229_v7 = vrot.slane %v1228_v62, 2  ;;  %v1235_v8 = vadd.f32 %v1234_v63, %v1233_v52  ;;  %v1241_v13 = vrot.slane %v1240_v5, 4  ;;  %v1261_v15 = vadd.f32 %v335_v2, %v334_v1 }
 0x118   :  { %v2801_v12 = vsel %vm2734_vm3, %v1218_v3, %v2800_v4  ;;  %v1248_v14 = vrot.slane %v1247_v31, 4  ;;  %v1225_v16 = vadd.f32 %v1224_v6, %v1223_v61  ;;  %v1255_v19 = vrot.slane %v1254_v11, 4  ;;  %v347_v6 = vld [vmem:[#allocation6 + $0x598] sm:$0xff] }
 0x119   :  { %v1230_v17 = vadd.f32 %v1229_v7, %v1228_v62  ;;  %v1236_v18 = vrot.slane %v1235_v8, 2  ;;  %v1242_v22 = vadd.f32 %v1241_v13, %v1240_v5  ;;  %v1262_v24 = vrot.slane %v1261_v15, 4  ;;  %v345_v5 = vld [vmem:[#allocation6 + $0x588] sm:$0xff] }
 0x11a   :  { %v1249_v23 = vadd.f32 %v1248_v14, %v1247_v31  ;;  %v1268_v27 = vadd.f32 %v337_v10, %v336_v9  ;;  %v2802_v28 = vsel %vm2736_vm4, %v1225_v16, %v2801_v12  ;;  %v1256_v29 = vadd.f32 %v1255_v19, %v1254_v11  ;;  %v346_v31 = vld [vmem:[#allocation6 + $0x590] sm:$0xff]  ;;  %v348_v11 = vld [vmem:[#allocation6 + $0x5a0] sm:$0xff]  ;;  %v349_v12 = vld [vmem:[#allocation6 + $0x5a8] sm:$0xff] }
 0x11b   :  { %v1231_v25 = vrot.slane %v1230_v17, 1  ;;  %v1237_v38 = vadd.f32 %v1236_v18, %v1235_v8  ;;  %v1243_v30 = vrot.slane %v1242_v22, 2  ;;  %v1263_v33 = vadd.f32 %v1262_v24, %v1261_v15  ;;  %v351_v18 = vld [vmem:[#allocation6 + $0x5b8] sm:$0xff] }
 0x11c   :  { %v1250_v32 = vrot.slane %v1249_v23, 2  ;;  %v1269_v34 = vrot.slane %v1268_v27, 4  ;;  %v1257_v37 = vrot.slane %v1256_v29, 2  ;;  %v1275_v40 = vadd.f32 %v339_v21, %v338_v20 }
 0x11d   :  { %v1232_v35 = vadd.f32 %v1231_v25, %v1230_v17  ;;  %v1238_v36 = vrot.slane %v1237_v38, 1  ;;  %v1244_v43 = vadd.f32 %v1243_v30, %v1242_v22  ;;  %v1264_v45 = vrot.slane %v1263_v33, 2  ;;  %v350_v17 = vld [vmem:[#allocation6 + $0x5b0] sm:$0xff] }
 0x11e   :  { %v1251_v44 = vadd.f32 %v1250_v32, %v1249_v23  ;;  %v1270_v46 = vadd.f32 %v1269_v34, %v1268_v27  ;;  %v1258_v26 = vadd.f32 %v1257_v37, %v1256_v29  ;;  %v1276_v50 = vrot.slane %v1275_v40, 4  ;;  %v353_v29 = vld [vmem:[#allocation6 + $0x5c8] sm:$0xff] }
 0x11f   :  { %v1239_v47 = vadd.f32 %v1238_v36, %v1237_v38  ;;  %v2803_v48 = vsel %vm2738_vm5, %v1232_v35, %v2802_v28  ;;  %v1245_v51 = vrot.slane %v1244_v43, 1  ;;  %v1265_v53 = vadd.f32 %v1264_v45, %v1263_v33  ;;  %v352_v28 = vld [vmem:[#allocation6 + $0x5c0] sm:$0xff] }
 0x120   :  { %v1252_v52 = vrot.slane %v1251_v44, 1  ;;  %v1271_v54 = vrot.slane %v1270_v46, 2  ;;  %v1259_v57 = vrot.slane %v1258_v26, 1  ;;  %v1277_v58 = vadd.f32 %v1276_v50, %v1275_v40 }
 0x121   :  { %v2804_v55 = vsel %vm2740_vm6, %v1239_v47, %v2803_v48  ;;  %v1282_v59 = vadd.f32 %v341_v42, %v340_v41  ;;  %v1246_v61 = vadd.f32 %v1245_v51, %v1244_v43  ;;  %v1266_v63 = vrot.slane %v1265_v53, 1  ;;  %v354_v41 = vld [vmem:[#allocation6 + $0x5d0] sm:$0xff]  ;;  %v355_v42 = vld [vmem:[#allocation6 + $0x5d8] sm:$0xff] }
 0x122   :  { %v3131_v60 = vadd.f32 %v3099_v49, %v2804_v55  ;;  %v1253_v62 = vadd.f32 %v1252_v52, %v1251_v44  ;;  %v1260_v1 = vadd.f32 %v1259_v57, %v1258_v26  ;;  %v1272_v2 = vadd.f32 %v1271_v54, %v1270_v46  ;;  %v356_v57 = vld [vmem:[#allocation6 + $0x5e0] sm:$0xff] }
 0x123   :  { %v1278_v3 = vrot.slane %v1277_v58, 2  ;;  %v1283_v4 = vrot.slane %v1282_v59, 4  ;;  %v1267_v8 = vadd.f32 %v1266_v63, %v1265_v53  ;;  %v1289_v9 = vadd.f32 %v343_v56, %v342_v39 }
 0x124   :  { %v3163_v7 = vmul.f32 0.05882353, %v3131_v60  ;;  %v2805_v10 = vsel %vm2728_vm0, %v1253_v62, %v1246_v61  ;;  %v1273_v13 = vrot.slane %v1272_v2, 1  ;;  %v1296_v21 = vadd.f32 %v345_v5, %v344_v0 }
 0x125   :  { %v1279_v14 = vadd.f32 %v1278_v3, %v1277_v58  ;;  %v1284_v15 = vadd.f32 %v1283_v4, %v1282_v59  ;;  %v2806_v16 = vsel %vm2730_vm1, %v1260_v1, %v2805_v10  ;;  %v1290_v19 = vrot.slane %v1289_v9, 4  ;;  %v357_v58 = vld [vmem:[#allocation6 + $0x5e8] sm:$0xff]  ;;  %v3100_v3 = vld [vmem:[#allocation3 + $0x50] sm:$0xff] }
 0x126   :  { %3834 = vmatmul.mubr.f32.gmra.mrb[8].mxu0 %v3163_v7  ;;  %v2807_v20 = vsel %vm2732_vm2, %v1267_v8, %v2806_v16  ;;  %v1303_v22 = vadd.f32 %v347_v6, %v346_v31  ;;  %v1274_v23 = vadd.f32 %v1273_v13, %v1272_v2  ;;  %v1310_v25 = vadd.f32 %v349_v12, %v348_v11  ;;  %v358_v6 = vld [vmem:[#allocation6 + $0x5f0] sm:$0xff]  ;;  %v359_v7 = vld [vmem:[#allocation6 + $0x5f8] sm:$0xff] }
 0x127   :  { %v1280_v24 = vrot.slane %v1279_v14, 1  ;;  %v1285_v27 = vrot.slane %v1284_v15, 2  ;;  %v1291_v38 = vadd.f32 %v1290_v19, %v1289_v9  ;;  %v1297_v30 = vrot.slane %v1296_v21, 4 }
 0x128   :  { %v1304_v32 = vrot.slane %v1303_v22, 4  ;;  %v1317_v33 = vadd.f32 %v351_v18, %v350_v17  ;;  %v2808_v36 = vsel %vm2734_vm3, %v1274_v23, %v2807_v20  ;;  %v1311_v37 = vrot.slane %v1310_v25, 4  ;;  %v360_v20 = vld [vmem:[#allocation6 + $0x600] sm:$0xff] }
 0x129   :  { %v1281_v34 = vadd.f32 %v1280_v24, %v1279_v14  ;;  %v1286_v35 = vadd.f32 %v1285_v27, %v1284_v15  ;;  %v1292_v40 = vrot.slane %v1291_v38, 2  ;;  %v1298_v43 = vadd.f32 %v1297_v30, %v1296_v21  ;;  %v361_v21 = vld [vmem:[#allocation6 + $0x608] sm:$0xff] }
 0x12a   :  { %v1305_v44 = vadd.f32 %v1304_v32, %v1303_v22  ;;  %v1318_v45 = vrot.slane %v1317_v33, 4  ;;  %v1312_v48 = vadd.f32 %v1311_v37, %v1310_v25  ;;  %v1324_v49 = vadd.f32 %v353_v29, %v352_v28  ;;  %v362_v22 = vld [vmem:[#allocation6 + $0x610] sm:$0xff]  ;;  %v364_v28 = vld [vmem:[#allocation6 + $0x620] sm:$0xff]  ;;  %v365_v29 = vld [vmem:[#allocation6 + $0x628] sm:$0xff] }
 0x12b   :  { %v1287_v46 = vrot.slane %v1286_v35, 1  ;;  %v2809_v47 = vsel %vm2736_vm4, %v1281_v34, %v2808_v36  ;;  %v1293_v26 = vadd.f32 %v1292_v40, %v1291_v38  ;;  %v1299_v50 = vrot.slane %v1298_v43, 2  ;;  %v363_v38 = vld [vmem:[#allocation6 + $0x618] sm:$0xff] }
 0x12c   :  { %v1306_v51 = vrot.slane %v1305_v44, 2  ;;  %v1319_v52 = vadd.f32 %v1318_v45, %v1317_v33  ;;  %v1313_v54 = vrot.slane %v1312_v48, 2  ;;  %v1325_v55 = vrot.slane %v1324_v49, 4  ;;  %v367_v36 = vld [vmem:[#allocation6 + $0x638] sm:$0xff] }
 0x12d   :  { %v1288_v53 = vadd.f32 %v1287_v46, %v1286_v35  ;;  %v1331_v39 = vadd.f32 %v355_v42, %v354_v41  ;;  %v1294_v56 = vrot.slane %v1293_v26, 1  ;;  %v1300_v59 = vadd.f32 %v1299_v50, %v1298_v43  ;;  %v366_v35 = vld [vmem:[#allocation6 + $0x630] sm:$0xff] }
 0x12e   :  { %v1307_v60 = vadd.f32 %v1306_v51, %v1305_v44  ;;  %v1320_v61 = vrot.slane %v1319_v52, 2  ;;  %v1314_v63 = vadd.f32 %v1313_v54, %v1312_v48  ;;  %v1326_v0 = vadd.f32 %v1325_v55, %v1324_v49  ;;  %v368_v49 = vld [vmem:[#allocation6 + $0x640] sm:$0xff] }
 0x12f   :  { %v2810_v62 = vsel %vm2738_vm5, %v1288_v53, %v2809_v47  ;;  %v1332_v1 = vrot.slane %v1331_v39, 4  ;;  %v1295_v2 = vadd.f32 %v1294_v56, %v1293_v26  ;;  %v1301_v4 = vrot.slane %v1300_v59, 1  ;;  %v369_v26 = vld [vmem:[#allocation6 + $0x648] sm:$0xff] }
 0x130   :  { %v1308_v5 = vrot.slane %v1307_v60, 1  ;;  %v1321_v31 = vadd.f32 %v1320_v61, %v1319_v52  ;;  %v1315_v8 = vrot.slane %v1314_v63, 1  ;;  %v1327_v9 = vrot.slane %v1326_v0, 2 }
 0x131   :  { %v1333_v10 = vadd.f32 %v1332_v1, %v1331_v39  ;;  %v1338_v11 = vadd.f32 %v357_v58, %v356_v57  ;;  %v2811_v12 = vsel %vm2740_vm6, %v1295_v2, %v2810_v62  ;;  %v1302_v13 = vadd.f32 %v1301_v4, %v1300_v59  ;;  %v370_v57 = vld [vmem:[#allocation6 + $0x650] sm:$0xff]  ;;  %v371_v58 = vld [vmem:[#allocation6 + $0x658] sm:$0xff] }
 0x132   :  { %v1309_v14 = vadd.f32 %v1308_v5, %v1307_v60  ;;  %v1322_v15 = vrot.slane %v1321_v31, 1  ;;  %v3132_v16 = vadd.f32 %v3100_v3, %v2811_v12  ;;  %v1316_v17 = vadd.f32 %v1315_v8, %v1314_v63  ;;  %v372_v12 = vld [vmem:[#allocation6 + $0x660] sm:$0xff] }
 0x133   :  { %v1328_v18 = vadd.f32 %v1327_v9, %v1326_v0  ;;  %v1334_v19 = vrot.slane %v1333_v10, 2  ;;  %v1339_v24 = vrot.slane %v1338_v11, 4  ;;  %v1345_v27 = vadd.f32 %v359_v7, %v358_v6 }
 0x134   :  { %v1323_v23 = vadd.f32 %v1322_v15, %v1321_v31  ;;  %v2812_v25 = vsel %vm2728_vm0, %v1309_v14, %v1302_v13  ;;  %v3164_v30 = vmul.f32 0.05882353, %v3132_v16  ;;  %v1352_v42 = vadd.f32 %v361_v21, %v360_v20  ;;  %v373_v13 = vld [vmem:[#allocation6 + $0x668] sm:$0xff]  ;;  %v3101_v20 = vld [vmem:[#allocation3 + $0x58] sm:$0xff] }
 0x135   :  { %v1329_v32 = vrot.slane %v1328_v18, 1  ;;  %v1335_v33 = vadd.f32 %v1334_v19, %v1333_v10  ;;  %v2813_v34 = vsel %vm2730_vm1, %v1316_v17, %v2812_v25  ;;  %v1340_v37 = vadd.f32 %v1339_v24, %v1338_v11  ;;  %v375_v24 = vld [vmem:[#allocation6 + $0x678] sm:$0xff] }
 0x136   :  { %v1346_v40 = vrot.slane %v1345_v27, 4  ;;  %v2814_v41 = vsel %vm2732_vm2, %v1323_v23, %v2813_v34  ;;  %3836 = vmatprep.mubr.f32.mxu0 %v3164_v30  ;;  %v1359_v45 = vadd.f32 %v363_v38, %v362_v22  ;;  %v1366_v46 = vadd.f32 %v365_v29, %v364_v28  ;;  %v374_v23 = vld [vmem:[#allocation6 + $0x670] sm:$0xff]  ;;  %v376_v34 = vld [vmem:[#allocation6 + $0x680] sm:$0xff] }
 0x137   :  { %v1330_v43 = vadd.f32 %v1329_v32, %v1328_v18  ;;  %v1336_v44 = vrot.slane %v1335_v33, 1  ;;  %v1341_v47 = vrot.slane %v1340_v37, 2  ;;  %v1353_v50 = vrot.slane %v1352_v42, 4 }
 0x138   :  { %v1347_v48 = vadd.f32 %v1346_v40, %v1345_v27  ;;  %v1373_v51 = vadd.f32 %v367_v36, %v366_v35  ;;  %v1360_v54 = vrot.slane %v1359_v45, 4  ;;  %v1367_v55 = vrot.slane %v1366_v46, 4  ;;  %v377_v35 = vld [vmem:[#allocation6 + $0x688] sm:$0xff] }
 0x139   :  { %v1337_v52 = vadd.f32 %v1336_v44, %v1335_v33  ;;  %v2815_v53 = vsel %vm2734_vm3, %v1330_v43, %v2814_v41  ;;  %v1342_v39 = vadd.f32 %v1341_v47, %v1340_v37  ;;  %v1354_v59 = vadd.f32 %v1353_v50, %v1352_v42  ;;  %v379_v47 = vld [vmem:[#allocation6 + $0x698] sm:$0xff]  ;;  %v380_v50 = vld [vmem:[#allocation6 + $0x6a0] sm:$0xff] }
 0x13a   :  { %v1348_v56 = vrot.slane %v1347_v48, 2  ;;  %v1374_v60 = vrot.slane %v1373_v51, 4  ;;  %v1361_v62 = vadd.f32 %v1360_v54, %v1359_v45  ;;  %v1368_v63 = vadd.f32 %v1367_v55, %v1366_v46  ;;  %v378_v46 = vld [vmem:[#allocation6 + $0x690] sm:$0xff] }
 0x13b   :  { %v2816_v61 = vsel %vm2736_vm4, %v1337_v52, %v2815_v53  ;;  %v1380_v0 = vadd.f32 %v369_v26, %v368_v49  ;;  %v1343_v1 = vrot.slane %v1342_v39, 1  ;;  %v1355_v3 = vrot.slane %v1354_v59, 2 }
 0x13c   :  { %v1349_v2 = vadd.f32 %v1348_v56, %v1347_v48  ;;  %v1375_v4 = vadd.f32 %v1374_v60, %v1373_v51  ;;  %v1362_v5 = vrot.slane %v1361_v62, 2  ;;  %v1369_v31 = vrot.slane %v1368_v63, 2  ;;  %v381_v51 = vld [vmem:[#allocation6 + $0x6a8] sm:$0xff]  ;;  %v382_v56 = vld [vmem:[#allocation6 + $0x6b0] sm:$0xff] }
 0x13d   :  { %v1381_v6 = vrot.slane %v1380_v0, 4  ;;  %v1387_v7 = vadd.f32 %v371_v58, %v370_v57  ;;  %v1344_v8 = vadd.f32 %v1343_v1, %v1342_v39  ;;  %v1356_v10 = vadd.f32 %v1355_v3, %v1354_v59  ;;  %v383_v57 = vld [vmem:[#allocation6 + $0x6b8] sm:$0xff]  ;;  %v384_v1 = vld [vmem:[#allocation6 + $0x6c0] sm:$0xff] }
 0x13e   :  { %v1350_v9 = vrot.slane %v1349_v2, 1  ;;  %v1376_v11 = vrot.slane %v1375_v4, 2  ;;  %v1363_v14 = vadd.f32 %v1362_v5, %v1361_v62  ;;  %v1370_v15 = vadd.f32 %v1369_v31, %v1368_v63 }
 0x13f   :  { %v1382_v16 = vadd.f32 %v1381_v6, %v1380_v0  ;;  %v1388_v17 = vrot.slane %v1387_v7, 4  ;;  %v2817_v19 = vsel %vm2738_vm5, %v1344_v8, %v2816_v61  ;;  %v1357_v21 = vrot.slane %v1356_v10, 1 }
 0x140   :  { %v1351_v18 = vadd.f32 %v1350_v9, %v1349_v2  ;;  %v1377_v22 = vadd.f32 %v1376_v11, %v1375_v4  ;;  %v1364_v27 = vrot.slane %v1363_v14, 1  ;;  %v1371_v25 = vrot.slane %v1370_v15, 1  ;;  %v385_v2 = vld [vmem:[#allocation6 + $0x6c8] sm:$0xff]  ;;  %v386_v11 = vld [vmem:[#allocation6 + $0x6d0] sm:$0xff] }
 0x141   :  { %v1383_v38 = vrot.slane %v1382_v16, 2  ;;  %v1389_v28 = vadd.f32 %v1388_v17, %v1387_v7  ;;  %v1358_v30 = vadd.f32 %v1357_v21, %v1356_v10  ;;  %v1394_v33 = vadd.f32 %v373_v13, %v372_v12  ;;  %v387_v12 = vld [vmem:[#allocation6 + $0x6d8] sm:$0xff] }
 0x142   :  { %v2818_v29 = vsel %vm2740_vm6, %v1351_v18, %v2817_v19  ;;  %v1378_v32 = vrot.slane %v1377_v22, 1  ;;  %v1365_v37 = vadd.f32 %v1364_v27, %v1363_v14  ;;  %v1372_v40 = vadd.f32 %v1371_v25, %v1370_v15 }
 0x143   :  { %v3133_v36 = vadd.f32 %v3101_v20, %v2818_v29  ;;  %v1384_v41 = vadd.f32 %v1383_v38, %v1382_v16  ;;  %v1390_v43 = vrot.slane %v1389_v28, 2  ;;  %v1395_v44 = vrot.slane %v1394_v33, 4  ;;  %v388_v29 = vld [vmem:[#allocation6 + $0x6e0] sm:$0xff] }
 0x144   :  { %v1379_v42 = vadd.f32 %v1378_v32, %v1377_v22  ;;  %v1401_v45 = vadd.f32 %v375_v24, %v374_v23  ;;  %v2819_v26 = vsel %vm2728_vm0, %v1365_v37, %v1358_v30  ;;  %v1408_v52 = vadd.f32 %v377_v35, %v376_v34  ;;  %v389_v30 = vld [vmem:[#allocation6 + $0x6e8] sm:$0xff] }
 0x145   :  { %v3165_v48 = vmul.f32 0.05882353, %v3133_v36  ;;  %v1385_v49 = vrot.slane %v1384_v41, 1  ;;  %v1391_v53 = vadd.f32 %v1390_v43, %v1389_v28  ;;  %v1396_v54 = vadd.f32 %v1395_v44, %v1394_v33  ;;  %v390_v43 = vld [vmem:[#allocation6 + $0x6f0] sm:$0xff]  ;;  %v391_v44 = vld [vmem:[#allocation6 + $0x6f8] sm:$0xff] }
 0x146   :  { %v1402_v55 = vrot.slane %v1401_v45, 4  ;;  %v2820_v39 = vsel %vm2730_vm1, %v1372_v40, %v2819_v26  ;;  %v1409_v60 = vrot.slane %v1408_v52, 4  ;;  %v1415_v61 = vadd.f32 %v379_v47, %v378_v46  ;;  %v3102_v40 = vld [vmem:[#allocation3 + $0x60] sm:$0xff] }
 0x147   :  { %3837 = vmatmul.mubr.f32.gmra.mrb[10].mxu0 %v3165_v48  ;;  %v1386_v58 = vadd.f32 %v1385_v49, %v1384_v41  ;;  %v2821_v59 = vsel %vm2732_vm2, %v1379_v42, %v2820_v39  ;;  %v1392_v62 = vrot.slane %v1391_v53, 1  ;;  %v1397_v63 = vrot.slane %v1396_v54, 2  ;;  %v392_v39 = vld [vmem:[#allocation6 + $0x700] sm:$0xff] }
 0x148   :  { %v1403_v0 = vadd.f32 %v1402_v55, %v1401_v45  ;;  %v1422_v3 = vadd.f32 %v381_v51, %v380_v50  ;;  %v1410_v5 = vadd.f32 %v1409_v60, %v1408_v52  ;;  %v1416_v31 = vrot.slane %v1415_v61, 4  ;;  %v393_v60 = vld [vmem:[#allocation6 + $0x708] sm:$0xff] }
 0x149   :  { %v2822_v4 = vsel %vm2734_vm3, %v1386_v58, %v2821_v59  ;;  %v1429_v6 = vadd.f32 %v383_v57, %v382_v56  ;;  %v1393_v7 = vadd.f32 %v1392_v62, %v1391_v53  ;;  %v1398_v8 = vadd.f32 %v1397_v63, %v1396_v54  ;;  %v395_v62 = vld [vmem:[#allocation6 + $0x718] sm:$0xff] }
 0x14a   :  { %v1404_v9 = vrot.slane %v1403_v0, 2  ;;  %v1423_v10 = vrot.slane %v1422_v3, 4  ;;  %v1411_v13 = vrot.slane %v1410_v5, 2  ;;  %v1417_v14 = vadd.f32 %v1416_v31, %v1415_v61  ;;  %v394_v61 = vld [vmem:[#allocation6 + $0x710] sm:$0xff] }
 0x14b   :  { %v1430_v15 = vrot.slane %v1429_v6, 4  ;;  %v1436_v16 = vadd.f32 %v385_v2, %v384_v1  ;;  %v1399_v17 = vrot.slane %v1398_v8, 1  ;;  %v2823_v19 = vsel %vm2736_vm4, %v1393_v7, %v2822_v4  ;;  %v397_v4 = vld [vmem:[#allocation6 + $0x728] sm:$0xff] }
 0x14c   :  { %v1405_v18 = vadd.f32 %v1404_v9, %v1403_v0  ;;  %v1424_v20 = vadd.f32 %v1423_v10, %v1422_v3  ;;  %v1412_v21 = vadd.f32 %v1411_v13, %v1410_v5  ;;  %v1418_v22 = vrot.slane %v1417_v14, 2  ;;  %v396_v3 = vld [vmem:[#allocation6 + $0x720] sm:$0xff]  ;;  %v399_v9 = vld [vmem:[#allocation6 + $0x738] sm:$0xff] }
 0x14d   :  { %v1431_v23 = vadd.f32 %v1430_v15, %v1429_v6  ;;  %v1437_v24 = vrot.slane %v1436_v16, 4  ;;  %v1400_v27 = vadd.f32 %v1399_v17, %v1398_v8  ;;  %v1443_v28 = vadd.f32 %v387_v12, %v386_v11  ;;  %v398_v8 = vld [vmem:[#allocation6 + $0x730] sm:$0xff]  ;;  %v400_v17 = vld [vmem:[#allocation6 + $0x740] sm:$0xff] }
 0x14e   :  { %v1406_v25 = vrot.slane %v1405_v18, 1  ;;  %v1425_v38 = vrot.slane %v1424_v20, 2  ;;  %v1413_v32 = vrot.slane %v1412_v21, 1  ;;  %v1419_v33 = vadd.f32 %v1418_v22, %v1417_v14 }
 0x14f   :  { %v1432_v34 = vrot.slane %v1431_v23, 2  ;;  %v1438_v35 = vadd.f32 %v1437_v24, %v1436_v16  ;;  %v2824_v37 = vsel %vm2738_vm5, %v1400_v27, %v2823_v19  ;;  %v1444_v42 = vrot.slane %v1443_v28, 4 }
 0x150   :  { %v1407_v36 = vadd.f32 %v1406_v25, %v1405_v18  ;;  %v1426_v41 = vadd.f32 %v1425_v38, %v1424_v20  ;;  %v1414_v45 = vadd.f32 %v1413_v32, %v1412_v21  ;;  %v1420_v46 = vrot.slane %v1419_v33, 1  ;;  %v401_v18 = vld [vmem:[#allocation6 + $0x748] sm:$0xff] }
 0x151   :  { %v1433_v47 = vadd.f32 %v1432_v34, %v1431_v23  ;;  %v1439_v48 = vrot.slane %v1438_v35, 2  ;;  %v1445_v50 = vadd.f32 %v1444_v42, %v1443_v28  ;;  %v1450_v51 = vadd.f32 %v389_v30, %v388_v29  ;;  %v402_v28 = vld [vmem:[#allocation6 + $0x750] sm:$0xff]  ;;  %v403_v29 = vld [vmem:[#allocation6 + $0x758] sm:$0xff] }
 0x152   :  { %v2825_v49 = vsel %vm2740_vm6, %v1407_v36, %v2824_v37  ;;  %v1427_v26 = vrot.slane %v1426_v41, 1  ;;  %v1421_v53 = vadd.f32 %v1420_v46, %v1419_v33  ;;  %v1457_v59 = vadd.f32 %v391_v44, %v390_v43 }
 0x153   :  { %v3134_v52 = vadd.f32 %v3102_v40, %v2825_v49  ;;  %v1434_v54 = vrot.slane %v1433_v47, 1  ;;  %v1440_v55 = vadd.f32 %v1439_v48, %v1438_v35  ;;  %v1446_v57 = vrot.slane %v1445_v50, 2  ;;  %v404_v49 = vld [vmem:[#allocation6 + $0x760] sm:$0xff] }
 0x154   :  { %v1428_v56 = vadd.f32 %v1427_v26, %v1426_v41  ;;  %v1451_v58 = vrot.slane %v1450_v51, 4  ;;  %v2826_v2 = vsel %vm2728_vm0, %v1421_v53, %v1414_v45  ;;  %v1458_v6 = vrot.slane %v1457_v59, 4  ;;  %v405_v26 = vld [vmem:[#allocation6 + $0x768] sm:$0xff] }
 0x155   :  { %v3166_v63 = vmul.f32 0.05882353, %v3134_v52  ;;  %v1435_v0 = vadd.f32 %v1434_v54, %v1433_v47  ;;  %v1441_v1 = vrot.slane %v1440_v55, 1  ;;  %v1447_v5 = vadd.f32 %v1446_v57, %v1445_v50 }
 0x156   :  { %v1452_v31 = vadd.f32 %v1451_v58, %v1450_v51  ;;  %v2827_v7 = vsel %vm2730_vm1, %v1428_v56, %v2826_v2  ;;  %v1464_v12 = vadd.f32 %v393_v60, %v392_v39  ;;  %v1471_v13 = vadd.f32 %v395_v62, %v394_v61  ;;  %v3103_v39 = vld [vmem:[#allocation3 + $0x68] sm:$0xff] }
 0x157   :  { %3839 = vmatprep.mubr.f32.mxu0 %v3166_v63  ;;  %v1442_v10 = vadd.f32 %v1441_v1, %v1440_v55  ;;  %v2828_v11 = vsel %vm2732_vm2, %v1435_v0, %v2827_v7  ;;  %v1448_v14 = vrot.slane %v1447_v5, 1  ;;  %v1459_v16 = vadd.f32 %v1458_v6, %v1457_v59  ;;  %v406_v63 = vld [vmem:[#allocation6 + $0x770] sm:$0xff]  ;;  %v407_v0 = vld [vmem:[#allocation6 + $0x778] sm:$0xff]  ;;  %v408_v7 = vld [vmem:[#allocation6 + $0x780] sm:$0xff] }
 0x158   :  { %v1453_v15 = vrot.slane %v1452_v31, 2  ;;  %v1478_v19 = vadd.f32 %v397_v4, %v396_v3  ;;  %v1465_v21 = vrot.slane %v1464_v12, 4  ;;  %v1472_v22 = vrot.slane %v1471_v13, 4 }
 0x159   :  { %v2829_v20 = vsel %vm2734_vm3, %v1442_v10, %v2828_v11  ;;  %v1485_v23 = vadd.f32 %v399_v9, %v398_v8  ;;  %v1449_v24 = vadd.f32 %v1448_v14, %v1447_v5  ;;  %v1460_v25 = vrot.slane %v1459_v16, 2  ;;  %v411_v14 = vld [vmem:[#allocation6 + $0x798] sm:$0xff] }
 0x15a   :  { %v1454_v27 = vadd.f32 %v1453_v15, %v1452_v31  ;;  %v1479_v38 = vrot.slane %v1478_v19, 4  ;;  %v1466_v30 = vadd.f32 %v1465_v21, %v1464_v12  ;;  %v1473_v32 = vadd.f32 %v1472_v22, %v1471_v13  ;;  %v409_v12 = vld [vmem:[#allocation6 + $0x788] sm:$0xff]  ;;  %v410_v13 = vld [vmem:[#allocation6 + $0x790] sm:$0xff] }
 0x15b   :  { %v1486_v33 = vrot.slane %v1485_v23, 4  ;;  %v1492_v34 = vadd.f32 %v401_v18, %v400_v17  ;;  %v1461_v36 = vadd.f32 %v1460_v25, %v1459_v16  ;;  %v2830_v37 = vsel %vm2736_vm4, %v1449_v24, %v2829_v20  ;;  %v413_v20 = vld [vmem:[#allocation6 + $0x7a8] sm:$0xff]  ;;  %v415_v25 = vld [vmem:[#allocation6 + $0x7b8] sm:$0xff] }
 0x15c   :  { %v1455_v35 = vrot.slane %v1454_v27, 1  ;;  %v1480_v40 = vadd.f32 %v1479_v38, %v1478_v19  ;;  %v1467_v41 = vrot.slane %v1466_v30, 2  ;;  %v1474_v42 = vrot.slane %v1473_v32, 2  ;;  %v412_v19 = vld [vmem:[#allocation6 + $0x7a0] sm:$0xff] }
 0x15d   :  { %v1487_v43 = vadd.f32 %v1486_v33, %v1485_v23  ;;  %v1493_v44 = vrot.slane %v1492_v34, 4  ;;  %v1462_v46 = vrot.slane %v1461_v36, 1  ;;  %v1499_v48 = vadd.f32 %v403_v29, %v402_v28 }
 0x15e   :  { %v1456_v45 = vadd.f32 %v1455_v35, %v1454_v27  ;;  %v1481_v47 = vrot.slane %v1480_v40, 2  ;;  %v1468_v50 = vadd.f32 %v1467_v41, %v1466_v30  ;;  %v1475_v51 = vadd.f32 %v1474_v42, %v1473_v32  ;;  %v414_v27 = vld [vmem:[#allocation6 + $0x7b0] sm:$0xff] }
 0x15f   :  { %v1488_v52 = vrot.slane %v1487_v43, 2  ;;  %v1494_v53 = vadd.f32 %v1493_v44, %v1492_v34  ;;  %v1463_v54 = vadd.f32 %v1462_v46, %v1461_v36  ;;  %v1500_v57 = vrot.slane %v1499_v48, 4 }
 0x160   :  { %v2831_v55 = vsel %vm2738_vm5, %v1456_v45, %v2830_v37  ;;  %v1482_v56 = vadd.f32 %v1481_v47, %v1480_v40  ;;  %v1469_v58 = vrot.slane %v1468_v50, 1  ;;  %v1476_v59 = vrot.slane %v1475_v51, 1  ;;  %v416_v37 = vld [vmem:[#allocation6 + $0x7c0] sm:$0xff]  ;;  %v417_v40 = vld [vmem:[#allocation6 + $0x7c8] sm:$0xff] }
 0x161   :  { %v1489_v60 = vadd.f32 %v1488_v52, %v1487_v43  ;;  %v1495_v61 = vrot.slane %v1494_v53, 2  ;;  %v2832_v62 = vsel %vm2740_vm6, %v1463_v54, %v2831_v55  ;;  %v1501_v2 = vadd.f32 %v1500_v57, %v1499_v48 }
 0x162   :  { %v1483_v1 = vrot.slane %v1482_v56, 1  ;;  %v1506_v3 = vadd.f32 %v405_v26, %v404_v49  ;;  %v3135_v4 = vadd.f32 %v3103_v39, %v2832_v62  ;;  %v1470_v5 = vadd.f32 %v1469_v58, %v1468_v50  ;;  %v418_v49 = vld [vmem:[#allocation6 + $0x7d0] sm:$0xff]  ;;  %v419_v26 = vld [vmem:[#allocation6 + $0x7d8] sm:$0xff] }
 0x163   :  { %v1477_v31 = vadd.f32 %v1476_v59, %v1475_v51  ;;  %v1490_v6 = vrot.slane %v1489_v60, 1  ;;  %v1496_v9 = vadd.f32 %v1495_v61, %v1494_v53  ;;  %v1502_v10 = vrot.slane %v1501_v2, 2 }
 0x164   :  { %v1484_v8 = vadd.f32 %v1483_v1, %v1482_v56  ;;  %v1507_v11 = vrot.slane %v1506_v3, 4  ;;  %v3167_v15 = vmul.f32 0.05882353, %v3135_v4  ;;  %v1513_v17 = vadd.f32 %v407_v0, %v406_v63  ;;  %v420_v1 = vld [vmem:[#allocation6 + $0x7e0] sm:$0xff] }
 0x165   :  { %v1491_v16 = vadd.f32 %v1490_v6, %v1489_v60  ;;  %v2833_v18 = vsel %vm2728_vm0, %v1477_v31, %v1470_v5  ;;  %v1497_v21 = vrot.slane %v1496_v9, 1  ;;  %v1503_v22 = vadd.f32 %v1502_v10, %v1501_v2  ;;  %v421_v2 = vld [vmem:[#allocation6 + $0x7e8] sm:$0xff]  ;;  %v3104_v10 = vld [vmem:[#allocation3 + $0x70] sm:$0xff] }
 0x166   :  { %v1508_v23 = vadd.f32 %v1507_v11, %v1506_v3  ;;  %v2834_v24 = vsel %vm2730_vm1, %v1484_v8, %v2833_v18  ;;  %3840 = vmatmul.mubr.f32.gmra.mrb[12].mxu0 %v3167_v15  ;;  %v1514_v38 = vrot.slane %v1513_v17, 4  ;;  %v1520_v29 = vadd.f32 %v409_v12, %v408_v7  ;;  %v423_v15 = vld [vmem:[#allocation6 + $0x7f8] sm:$0xff] }
 0x167   :  { %v2835_v28 = vsel %vm2732_vm2, %v1491_v16, %v2834_v24  ;;  %v1527_v30 = vadd.f32 %v411_v14, %v410_v13  ;;  %v1498_v32 = vadd.f32 %v1497_v21, %v1496_v9  ;;  %v1504_v33 = vrot.slane %v1503_v22, 1  ;;  %v422_v14 = vld [vmem:[#allocation6 + $0x7f0] sm:$0xff] }
 0x168   :  { %v1509_v34 = vrot.slane %v1508_v23, 2  ;;  %v1534_v35 = vadd.f32 %v413_v20, %v412_v19  ;;  %v1515_v36 = vadd.f32 %v1514_v38, %v1513_v17  ;;  %v1521_v41 = vrot.slane %v1520_v29, 4 }
 0x169   :  { %v1528_v42 = vrot.slane %v1527_v30, 4  ;;  %v1541_v43 = vadd.f32 %v415_v25, %v414_v27  ;;  %v1505_v44 = vadd.f32 %v1504_v33, %v1503_v22  ;;  %v2836_v46 = vsel %vm2734_vm3, %v1498_v32, %v2835_v28  ;;  %v424_v28 = vld [vmem:[#allocation6 + $0x800] sm:$0xff] }
 0x16a   :  { %v1510_v45 = vadd.f32 %v1509_v34, %v1508_v23  ;;  %v1535_v47 = vrot.slane %v1534_v35, 4  ;;  %v1516_v48 = vrot.slane %v1515_v36, 2  ;;  %v1522_v50 = vadd.f32 %v1521_v41, %v1520_v29  ;;  %v425_v29 = vld [vmem:[#allocation6 + $0x808] sm:$0xff] }
 0x16b   :  { %v1529_v51 = vadd.f32 %v1528_v42, %v1527_v30  ;;  %v1542_v52 = vrot.slane %v1541_v43, 4  ;;  %v2837_v54 = vsel %vm2736_vm4, %v1505_v44, %v2836_v46  ;;  %v1548_v39 = vadd.f32 %v417_v40, %v416_v37  ;;  %v426_v30 = vld [vmem:[#allocation6 + $0x810] sm:$0xff]  ;;  %v428_v37 = vld [vmem:[#allocation6 + $0x820] sm:$0xff]  ;;  %v429_v40 = vld [vmem:[#allocation6 + $0x828] sm:$0xff] }
 0x16c   :  { %v1511_v53 = vrot.slane %v1510_v45, 1  ;;  %v1536_v55 = vadd.f32 %v1535_v47, %v1534_v35  ;;  %v1517_v56 = vadd.f32 %v1516_v48, %v1515_v36  ;;  %v1523_v57 = vrot.slane %v1522_v50, 2  ;;  %v427_v36 = vld [vmem:[#allocation6 + $0x818] sm:$0xff] }
 0x16d   :  { %v1530_v58 = vrot.slane %v1529_v51, 2  ;;  %v1543_v59 = vadd.f32 %v1542_v52, %v1541_v43  ;;  %v1549_v62 = vrot.slane %v1548_v39, 4  ;;  %v1555_v63 = vadd.f32 %v419_v26, %v418_v49  ;;  %v431_v46 = vld [vmem:[#allocation6 + $0x838] sm:$0xff] }
 0x16e   :  { %v1512_v60 = vadd.f32 %v1511_v53, %v1510_v45  ;;  %v1537_v61 = vrot.slane %v1536_v55, 2  ;;  %v1518_v0 = vrot.slane %v1517_v56, 1  ;;  %v1524_v3 = vadd.f32 %v1523_v57, %v1522_v50  ;;  %v430_v45 = vld [vmem:[#allocation6 + $0x830] sm:$0xff] }
 0x16f   :  { %v1531_v4 = vadd.f32 %v1530_v58, %v1529_v51  ;;  %v1544_v5 = vrot.slane %v1543_v59, 2  ;;  %v1550_v7 = vadd.f32 %v1549_v62, %v1548_v39  ;;  %v1556_v8 = vrot.slane %v1555_v63, 4  ;;  %v432_v39 = vld [vmem:[#allocation6 + $0x840] sm:$0xff] }
 0x170   :  { %v2838_v31 = vsel %vm2738_vm5, %v1512_v60, %v2837_v54  ;;  %v1538_v6 = vadd.f32 %v1537_v61, %v1536_v55  ;;  %v1519_v9 = vadd.f32 %v1518_v0, %v1517_v56  ;;  %v1525_v11 = vrot.slane %v1524_v3, 1  ;;  %v433_v56 = vld [vmem:[#allocation6 + $0x848] sm:$0xff] }
 0x171   :  { %v1532_v12 = vrot.slane %v1531_v4, 1  ;;  %v1545_v13 = vadd.f32 %v1544_v5, %v1543_v59  ;;  %v1551_v17 = vrot.slane %v1550_v7, 2  ;;  %v1557_v18 = vadd.f32 %v1556_v8, %v1555_v63 }
 0x172   :  { %v1539_v16 = vrot.slane %v1538_v6, 1  ;;  %v1562_v19 = vadd.f32 %v421_v2, %v420_v1  ;;  %v2839_v20 = vsel %vm2740_vm6, %v1519_v9, %v2838_v31  ;;  %v1526_v21 = vadd.f32 %v1525_v11, %v1524_v3  ;;  %v434_v1 = vld [vmem:[#allocation6 + $0x850] sm:$0xff]  ;;  %v435_v2 = vld [vmem:[#allocation6 + $0x858] sm:$0xff] }
 0x173   :  { %v1533_v22 = vadd.f32 %v1532_v12, %v1531_v4  ;;  %v1546_v23 = vrot.slane %v1545_v13, 1  ;;  %v3136_v24 = vadd.f32 %v3104_v10, %v2839_v20  ;;  %v1552_v25 = vadd.f32 %v1551_v17, %v1550_v7  ;;  %v436_v20 = vld [vmem:[#allocation6 + $0x860] sm:$0xff] }
 0x174   :  { %v1540_v27 = vadd.f32 %v1539_v16, %v1538_v6  ;;  %v1558_v38 = vrot.slane %v1557_v18, 2  ;;  %v1563_v33 = vrot.slane %v1562_v19, 4  ;;  %v1569_v34 = vadd.f32 %v423_v15, %v422_v14 }
 0x175   :  { %v1547_v32 = vadd.f32 %v1546_v23, %v1545_v13  ;;  %v2840_v35 = vsel %vm2728_vm0, %v1533_v22, %v1526_v21  ;;  %v3168_v41 = vmul.f32 0.05882353, %v3136_v24  ;;  %v1553_v42 = vrot.slane %v1552_v25, 1  ;;  %v437_v21 = vld [vmem:[#allocation6 + $0x868] sm:$0xff] }
 0x176   :  { %v1559_v43 = vadd.f32 %v1558_v38, %v1557_v18  ;;  %v2841_v44 = vsel %vm2730_vm1, %v1540_v27, %v2840_v35  ;;  %v1564_v47 = vadd.f32 %v1563_v33, %v1562_v19  ;;  %v1570_v48 = vrot.slane %v1569_v34, 4  ;;  %v439_v33 = vld [vmem:[#allocation6 + $0x878] sm:$0xff] }
 0x177   :  { %v2842_v49 = vsel %vm2732_vm2, %v1547_v32, %v2841_v44  ;;  %v1576_v26 = vadd.f32 %v425_v29, %v424_v28  ;;  %3842 = vmatprep.mubr.f32.mxu0 %v3168_v41  ;;  %v1554_v50 = vadd.f32 %v1553_v42, %v1552_v25  ;;  %v1583_v52 = vadd.f32 %v427_v36, %v426_v30  ;;  %v3105_v28 = vld [vmem:[#allocation3 + $0x78] sm:$0xff]  ;;  %v438_v32 = vld [vmem:[#allocation6 + $0x870] sm:$0xff]  ;;  %v440_v44 = vld [vmem:[#allocation6 + $0x880] sm:$0xff] }
 0x178   :  { %v1560_v51 = vrot.slane %v1559_v43, 1  ;;  %v1590_v53 = vadd.f32 %v429_v40, %v428_v37  ;;  %v1565_v54 = vrot.slane %v1564_v47, 2  ;;  %v1571_v55 = vadd.f32 %v1570_v48, %v1569_v34 }
 0x179   :  { %v1577_v57 = vrot.slane %v1576_v26, 4  ;;  %v1597_v58 = vadd.f32 %v431_v46, %v430_v45  ;;  %v2843_v60 = vsel %vm2734_vm3, %v1554_v50, %v2842_v49  ;;  %v1584_v61 = vrot.slane %v1583_v52, 4  ;;  %v441_v45 = vld [vmem:[#allocation6 + $0x888] sm:$0xff] }
 0x17a   :  { %v1561_v59 = vadd.f32 %v1560_v51, %v1559_v43  ;;  %v1591_v62 = vrot.slane %v1590_v53, 4  ;;  %v1566_v63 = vadd.f32 %v1565_v54, %v1564_v47  ;;  %v1572_v0 = vrot.slane %v1571_v55, 2  ;;  %v443_v54 = vld [vmem:[#allocation6 + $0x898] sm:$0xff] }
 0x17b   :  { %v1578_v3 = vadd.f32 %v1577_v57, %v1576_v26  ;;  %v1598_v4 = vrot.slane %v1597_v58, 4  ;;  %v1585_v31 = vadd.f32 %v1584_v61, %v1583_v52  ;;  %v1604_v7 = vadd.f32 %v433_v56, %v432_v39  ;;  %v444_v57 = vld [vmem:[#allocation6 + $0x8a0] sm:$0xff] }
 0x17c   :  { %v2844_v5 = vsel %vm2736_vm4, %v1561_v59, %v2843_v60  ;;  %v1592_v6 = vadd.f32 %v1591_v62, %v1590_v53  ;;  %v1567_v8 = vrot.slane %v1566_v63, 1  ;;  %v1573_v9 = vadd.f32 %v1572_v0, %v1571_v55  ;;  %v442_v53 = vld [vmem:[#allocation6 + $0x890] sm:$0xff] }
 0x17d   :  { %v1579_v10 = vrot.slane %v1578_v3, 2  ;;  %v1599_v11 = vadd.f32 %v1598_v4, %v1597_v58  ;;  %v1586_v12 = vrot.slane %v1585_v31, 2  ;;  %v1605_v14 = vrot.slane %v1604_v7, 4  ;;  %v445_v58 = vld [vmem:[#allocation6 + $0x8a8] sm:$0xff]  ;;  %v446_v0 = vld [vmem:[#allocation6 + $0x8b0] sm:$0xff] }
 0x17e   :  { %v1593_v13 = vrot.slane %v1592_v6, 2  ;;  %v1611_v15 = vadd.f32 %v435_v2, %v434_v1  ;;  %v1568_v16 = vadd.f32 %v1567_v8, %v1566_v63  ;;  %v1574_v17 = vrot.slane %v1573_v9, 1  ;;  %v447_v1 = vld [vmem:[#allocation6 + $0x8b8] sm:$0xff]  ;;  %v448_v8 = vld [vmem:[#allocation6 + $0x8c0] sm:$0xff] }
 0x17f   :  { %v1580_v18 = vadd.f32 %v1579_v10, %v1578_v3  ;;  %v1600_v19 = vrot.slane %v1599_v11, 2  ;;  %v1587_v22 = vadd.f32 %v1586_v12, %v1585_v31  ;;  %v1606_v24 = vadd.f32 %v1605_v14, %v1604_v7 }
 0x180   :  { %v1594_v23 = vadd.f32 %v1593_v13, %v1592_v6  ;;  %v1612_v27 = vrot.slane %v1611_v15, 4  ;;  %v1575_v25 = vadd.f32 %v1574_v17, %v1573_v9  ;;  %v2845_v38 = vsel %vm2738_vm5, %v1568_v16, %v2844_v5  ;;  %v449_v9 = vld [vmem:[#allocation6 + $0x8c8] sm:$0xff] }
 0x181   :  { %v1581_v29 = vrot.slane %v1580_v18, 1  ;;  %v1601_v30 = vadd.f32 %v1600_v19, %v1599_v11  ;;  %v1588_v34 = vrot.slane %v1587_v22, 1  ;;  %v1607_v36 = vrot.slane %v1606_v24, 2  ;;  %v450_v19 = vld [vmem:[#allocation6 + $0x8d0] sm:$0xff] }
 0x182   :  { %v1595_v35 = vrot.slane %v1594_v23, 1  ;;  %v1613_v37 = vadd.f32 %v1612_v27, %v1611_v15  ;;  %v2846_v40 = vsel %vm2740_vm6, %v1575_v25, %v2845_v38  ;;  %v1618_v43 = vadd.f32 %v437_v21, %v436_v20  ;;  %v451_v20 = vld [vmem:[#allocation6 + $0x8d8] sm:$0xff] }
 0x183   :  { %v1582_v41 = vadd.f32 %v1581_v29, %v1580_v18  ;;  %v1602_v42 = vrot.slane %v1601_v30, 1  ;;  %v3137_v46 = vadd.f32 %v3105_v28, %v2846_v40  ;;  %v1589_v47 = vadd.f32 %v1588_v34, %v1587_v22  ;;  %v452_v40 = vld [vmem:[#allocation6 + $0x8e0] sm:$0xff] }
 0x184   :  { %v1596_v48 = vadd.f32 %v1595_v35, %v1594_v23  ;;  %v1608_v49 = vadd.f32 %v1607_v36, %v1606_v24  ;;  %v1614_v50 = vrot.slane %v1613_v37, 2  ;;  %v1619_v51 = vrot.slane %v1618_v43, 4 }
 0x185   :  { %v1603_v26 = vadd.f32 %v1602_v42, %v1601_v30  ;;  %v1625_v52 = vadd.f32 %v439_v33, %v438_v32  ;;  %v3169_v55 = vmul.f32 0.05882353, %v3137_v46  ;;  %v2847_v56 = vsel %vm2728_vm0, %v1589_v47, %v1582_v41  ;;  %v453_v41 = vld [vmem:[#allocation6 + $0x8e8] sm:$0xff] }
 0x186   :  { %v1609_v39 = vrot.slane %v1608_v49, 1  ;;  %v1632_v59 = vadd.f32 %v441_v45, %v440_v44  ;;  %v1615_v60 = vadd.f32 %v1614_v50, %v1613_v37  ;;  %v1620_v61 = vadd.f32 %v1619_v51, %v1618_v43  ;;  %v454_v50 = vld [vmem:[#allocation6 + $0x8f0] sm:$0xff]  ;;  %v455_v51 = vld [vmem:[#allocation6 + $0x8f8] sm:$0xff] }
 0x187   :  { %v1626_v62 = vrot.slane %v1625_v52, 4  ;;  %v2848_v63 = vsel %vm2730_vm1, %v1596_v48, %v2847_v56  ;;  %3843 = vmatmul.mubr.f32.gmra.mrb[14].mxu0 %v3169_v55  ;;  %v1639_v5 = vadd.f32 %v443_v54, %v442_v53  ;;  %v1646_v10 = vadd.f32 %v445_v58, %v444_v57  ;;  %v3106_v48 = vld [vmem:[#allocation3 + $0x80] sm:$0xff] }
 0x188   :  { %v1610_v2 = vadd.f32 %v1609_v39, %v1608_v49  ;;  %v2849_v3 = vsel %vm2732_vm2, %v1603_v26, %v2848_v63  ;;  %v1633_v4 = vrot.slane %v1632_v59, 4  ;;  %v1616_v31 = vrot.slane %v1615_v60, 1  ;;  %v456_v63 = vld [vmem:[#allocation6 + $0x900] sm:$0xff] }
 0x189   :  { %v1621_v6 = vrot.slane %v1620_v61, 2  ;;  %v1627_v7 = vadd.f32 %v1626_v62, %v1625_v52  ;;  %v1640_v13 = vrot.slane %v1639_v5, 4  ;;  %v1653_v14 = vadd.f32 %v447_v1, %v446_v0 }
 0x18a   :  { %v2850_v11 = vsel %vm2734_vm3, %v1610_v2, %v2849_v3  ;;  %v1634_v12 = vadd.f32 %v1633_v4, %v1632_v59  ;;  %v1617_v15 = vadd.f32 %v1616_v31, %v1615_v60  ;;  %v1647_v18 = vrot.slane %v1646_v10, 4  ;;  %v457_v4 = vld [vmem:[#allocation6 + $0x908] sm:$0xff]  ;;  %v459_v31 = vld [vmem:[#allocation6 + $0x918] sm:$0xff] }
 0x18b   :  { %v1622_v16 = vadd.f32 %v1621_v6, %v1620_v61  ;;  %v1628_v17 = vrot.slane %v1627_v7, 2  ;;  %v1641_v22 = vadd.f32 %v1640_v13, %v1639_v5  ;;  %v1654_v23 = vrot.slane %v1653_v14, 4  ;;  %v458_v5 = vld [vmem:[#allocation6 + $0x910] sm:$0xff] }
 0x18c   :  { %v1635_v21 = vrot.slane %v1634_v12, 2  ;;  %v1660_v24 = vadd.f32 %v449_v9, %v448_v8  ;;  %v2851_v38 = vsel %vm2736_vm4, %v1617_v15, %v2850_v11  ;;  %v1648_v28 = vadd.f32 %v1647_v18, %v1646_v10  ;;  %v460_v10 = vld [vmem:[#allocation6 + $0x920] sm:$0xff]  ;;  %v461_v11 = vld [vmem:[#allocation6 + $0x928] sm:$0xff] }
 0x18d   :  { %v1623_v27 = vrot.slane %v1622_v16, 1  ;;  %v1629_v25 = vadd.f32 %v1628_v17, %v1627_v7  ;;  %v1642_v30 = vrot.slane %v1641_v22, 2  ;;  %v1655_v32 = vadd.f32 %v1654_v23, %v1653_v14  ;;  %v463_v17 = vld [vmem:[#allocation6 + $0x938] sm:$0xff] }
 0x18e   :  { %v1636_v29 = vadd.f32 %v1635_v21, %v1634_v12  ;;  %v1661_v33 = vrot.slane %v1660_v24, 4  ;;  %v1649_v36 = vrot.slane %v1648_v28, 2  ;;  %v1667_v37 = vadd.f32 %v451_v20, %v450_v19 }
 0x18f   :  { %v1624_v34 = vadd.f32 %v1623_v27, %v1622_v16  ;;  %v1630_v35 = vrot.slane %v1629_v25, 1  ;;  %v1643_v43 = vadd.f32 %v1642_v30, %v1641_v22  ;;  %v1656_v44 = vrot.slane %v1655_v32, 2  ;;  %v462_v16 = vld [vmem:[#allocation6 + $0x930] sm:$0xff]  ;;  %v464_v27 = vld [vmem:[#allocation6 + $0x940] sm:$0xff] }
 0x190   :  { %v1637_v42 = vrot.slane %v1636_v29, 1  ;;  %v1662_v45 = vadd.f32 %v1661_v33, %v1660_v24  ;;  %v1650_v49 = vadd.f32 %v1649_v36, %v1648_v28  ;;  %v1668_v26 = vrot.slane %v1667_v37, 4 }
 0x191   :  { %v1631_v46 = vadd.f32 %v1630_v35, %v1629_v25  ;;  %v2852_v47 = vsel %vm2738_vm5, %v1624_v34, %v2851_v38  ;;  %v1644_v53 = vrot.slane %v1643_v43, 1  ;;  %v1657_v54 = vadd.f32 %v1656_v44, %v1655_v32  ;;  %v465_v25 = vld [vmem:[#allocation6 + $0x948] sm:$0xff] }
 0x192   :  { %v1638_v52 = vadd.f32 %v1637_v42, %v1636_v29  ;;  %v1663_v55 = vrot.slane %v1662_v45, 2  ;;  %v1651_v56 = vrot.slane %v1650_v49, 1  ;;  %v1669_v57 = vadd.f32 %v1668_v26, %v1667_v37  ;;  %v466_v37 = vld [vmem:[#allocation6 + $0x950] sm:$0xff] }
 0x193   :  { %v2853_v39 = vsel %vm2740_vm6, %v1631_v46, %v2852_v47  ;;  %v1674_v58 = vadd.f32 %v453_v41, %v452_v40  ;;  %v1645_v60 = vadd.f32 %v1644_v53, %v1643_v43  ;;  %v1658_v61 = vrot.slane %v1657_v54, 1  ;;  %v467_v40 = vld [vmem:[#allocation6 + $0x958] sm:$0xff] }
 0x194   :  { %v3138_v59 = vadd.f32 %v3106_v48, %v2853_v39  ;;  %v1664_v62 = vadd.f32 %v1663_v55, %v1662_v45  ;;  %v1652_v0 = vadd.f32 %v1651_v56, %v1650_v49  ;;  %v1670_v1 = vrot.slane %v1669_v57, 2  ;;  %v468_v39 = vld [vmem:[#allocation6 + $0x960] sm:$0xff]  ;;  %v469_v56 = vld [vmem:[#allocation6 + $0x968] sm:$0xff] }
 0x195   :  { %v1675_v2 = vrot.slane %v1674_v58, 4  ;;  %v1681_v3 = vadd.f32 %v455_v51, %v454_v50  ;;  %v1659_v7 = vadd.f32 %v1658_v61, %v1657_v54  ;;  %v2854_v9 = vsel %vm2728_vm0, %v1645_v60, %v1638_v52 }
 0x196   :  { %v3170_v6 = vmul.f32 0.05882353, %v3138_v59  ;;  %v1665_v8 = vrot.slane %v1664_v62, 1  ;;  %v1671_v12 = vadd.f32 %v1670_v1, %v1669_v57  ;;  %v2855_v15 = vsel %vm2730_vm1, %v1652_v0, %v2854_v9 }
 0x197   :  { %v1676_v13 = vadd.f32 %v1675_v2, %v1674_v58  ;;  %v1682_v14 = vrot.slane %v1681_v3, 4  ;;  %v2856_v19 = vsel %vm2732_vm2, %v1659_v7, %v2855_v15  ;;  %v1688_v20 = vadd.f32 %v457_v4, %v456_v63  ;;  %v3107_v63 = vld [vmem:[#allocation3 + $0x88] sm:$0xff]  ;;  %v471_v7 = vld [vmem:[#allocation6 + $0x978] sm:$0xff]  ;;  %v472_v15 = vld [vmem:[#allocation6 + $0x980] sm:$0xff] }
 0x198   :  { %3845 = vmatprep.mubr.f32.mxu1 %v3170_v6  ;;  %v1666_v18 = vadd.f32 %v1665_v8, %v1664_v62  ;;  %v1695_v21 = vadd.f32 %v459_v31, %v458_v5  ;;  %v1672_v22 = vrot.slane %v1671_v12, 1  ;;  %v1702_v38 = vadd.f32 %v461_v11, %v460_v10  ;;  %v470_v6 = vld [vmem:[#allocation6 + $0x970] sm:$0xff] }
 0x199   :  { %v1677_v23 = vrot.slane %v1676_v13, 2  ;;  %v1683_v24 = vadd.f32 %v1682_v14, %v1681_v3  ;;  %v1689_v29 = vrot.slane %v1688_v20, 4  ;;  %v1709_v32 = vadd.f32 %v463_v17, %v462_v16 }
 0x19a   :  { %v2857_v28 = vsel %vm2734_vm3, %v1666_v18, %v2856_v19  ;;  %v1696_v30 = vrot.slane %v1695_v21, 4  ;;  %v1673_v33 = vadd.f32 %v1672_v22, %v1671_v12  ;;  %v1703_v36 = vrot.slane %v1702_v38, 4  ;;  %v475_v22 = vld [vmem:[#allocation6 + $0x998] sm:$0xff] }
 0x19b   :  { %v1678_v34 = vadd.f32 %v1677_v23, %v1676_v13  ;;  %v1684_v35 = vrot.slane %v1683_v24, 2  ;;  %v1690_v41 = vadd.f32 %v1689_v29, %v1688_v20  ;;  %v1710_v43 = vrot.slane %v1709_v32, 4  ;;  %v473_v20 = vld [vmem:[#allocation6 + $0x988] sm:$0xff] }
 0x19c   :  { %v1697_v42 = vadd.f32 %v1696_v30, %v1695_v21  ;;  %v1716_v44 = vadd.f32 %v465_v25, %v464_v27  ;;  %v2858_v47 = vsel %vm2736_vm4, %v1673_v33, %v2857_v28  ;;  %v1704_v48 = vadd.f32 %v1703_v36, %v1702_v38  ;;  %v474_v21 = vld [vmem:[#allocation6 + $0x990] sm:$0xff]  ;;  %v476_v38 = vld [vmem:[#allocation6 + $0x9a0] sm:$0xff]  ;;  %v477_v28 = vld [vmem:[#allocation6 + $0x9a8] sm:$0xff] }
 0x19d   :  { %v1679_v45 = vrot.slane %v1678_v34, 1  ;;  %v1685_v46 = vadd.f32 %v1684_v35, %v1683_v24  ;;  %v1691_v49 = vrot.slane %v1690_v41, 2  ;;  %v1711_v50 = vadd.f32 %v1710_v43, %v1709_v32  ;;  %v479_v35 = vld [vmem:[#allocation6 + $0x9b8] sm:$0xff] }
 0x19e   :  { %v1698_v26 = vrot.slane %v1697_v42, 2  ;;  %v1717_v51 = vrot.slane %v1716_v44, 4  ;;  %v1705_v54 = vrot.slane %v1704_v48, 2  ;;  %v1723_v55 = vadd.f32 %v467_v40, %v466_v37 }
 0x19f   :  { %v1680_v52 = vadd.f32 %v1679_v45, %v1678_v34  ;;  %v1686_v53 = vrot.slane %v1685_v46, 1  ;;  %v1692_v57 = vadd.f32 %v1691_v49, %v1690_v41  ;;  %v1712_v59 = vrot.slane %v1711_v50, 2  ;;  %v478_v34 = vld [vmem:[#allocation6 + $0x9b0] sm:$0xff] }
 0x1a0   :  { %v1699_v58 = vadd.f32 %v1698_v26, %v1697_v42  ;;  %v1718_v60 = vadd.f32 %v1717_v51, %v1716_v44  ;;  %v1706_v0 = vadd.f32 %v1705_v54, %v1704_v48  ;;  %v1724_v1 = vrot.slane %v1723_v55, 4  ;;  %v481_v48 = vld [vmem:[#allocation6 + $0x9c8] sm:$0xff] }
 0x1a1   :  { %v1687_v61 = vadd.f32 %v1686_v53, %v1685_v46  ;;  %v2859_v62 = vsel %vm2738_vm5, %v1680_v52, %v2858_v47  ;;  %v1693_v2 = vrot.slane %v1692_v57, 1  ;;  %v1713_v4 = vadd.f32 %v1712_v59, %v1711_v50  ;;  %v480_v47 = vld [vmem:[#allocation6 + $0x9c0] sm:$0xff] }
 0x1a2   :  { %v1700_v3 = vrot.slane %v1699_v58, 1  ;;  %v1719_v5 = vrot.slane %v1718_v60, 2  ;;  %v1707_v8 = vrot.slane %v1706_v0, 1  ;;  %v1725_v9 = vadd.f32 %v1724_v1, %v1723_v55 }
 0x1a3   :  { %v2860_v31 = vsel %vm2740_vm6, %v1687_v61, %v2859_v62  ;;  %v1730_v10 = vadd.f32 %v469_v56, %v468_v39  ;;  %v1694_v12 = vadd.f32 %v1693_v2, %v1692_v57  ;;  %v1714_v14 = vrot.slane %v1713_v4, 1  ;;  %v482_v39 = vld [vmem:[#allocation6 + $0x9d0] sm:$0xff]  ;;  %v483_v56 = vld [vmem:[#allocation6 + $0x9d8] sm:$0xff] }
 0x1a4   :  { %v3139_v11 = vadd.f32 %v3107_v63, %v2860_v31  ;;  %v1701_v13 = vadd.f32 %v1700_v3, %v1699_v58  ;;  %v1708_v16 = vadd.f32 %v1707_v8, %v1706_v0  ;;  %v1720_v17 = vadd.f32 %v1719_v5, %v1718_v60  ;;  %v484_v8 = vld [vmem:[#allocation6 + $0x9e0] sm:$0xff] }
 0x1a5   :  { %v1726_v18 = vrot.slane %v1725_v9, 2  ;;  %v1731_v19 = vrot.slane %v1730_v10, 4  ;;  %v1715_v24 = vadd.f32 %v1714_v14, %v1713_v4  ;;  %v1737_v27 = vadd.f32 %v471_v7, %v470_v6 }
 0x1a6   :  { %v3171_v23 = vmul.f32 0.05882353, %v3139_v11  ;;  %v2861_v25 = vsel %vm2728_vm0, %v1701_v13, %v1694_v12  ;;  %v1721_v29 = vrot.slane %v1720_v17, 1  ;;  %v1744_v40 = vadd.f32 %v473_v20, %v472_v15 }
 0x1a7   :  { %v1727_v30 = vadd.f32 %v1726_v18, %v1725_v9  ;;  %v1732_v32 = vadd.f32 %v1731_v19, %v1730_v10  ;;  %v2862_v33 = vsel %vm2730_vm1, %v1708_v16, %v2861_v25  ;;  %v1738_v36 = vrot.slane %v1737_v27, 4  ;;  %v485_v9 = vld [vmem:[#allocation6 + $0x9e8] sm:$0xff]  ;;  %v3108_v18 = vld [vmem:[#allocation3 + $0x90] sm:$0xff] }
 0x1a8   :  { %3846 = vmatmul.mubr.f32.vlgmr.msra.gmra.mrb[0].mxu1 %v3171_v23  ;;  %v2863_v37 = vsel %vm2732_vm2, %v1715_v24, %v2862_v33  ;;  %v1751_v41 = vadd.f32 %v475_v22, %v474_v21  ;;  %v1722_v42 = vadd.f32 %v1721_v29, %v1720_v17  ;;  %v1758_v45 = vadd.f32 %v477_v28, %v476_v38  ;;  %v486_v22 = vld [vmem:[#allocation6 + $0x9f0] sm:$0xff]  ;;  %v487_v23 = vld [vmem:[#allocation6 + $0x9f8] sm:$0xff] }
 0x1a9   :  { %v1728_v43 = vrot.slane %v1727_v30, 1  ;;  %v1733_v44 = vrot.slane %v1732_v32, 2  ;;  %v1739_v46 = vadd.f32 %v1738_v36, %v1737_v27  ;;  %v1745_v49 = vrot.slane %v1744_v40, 4 }
 0x1aa   :  { %v1752_v26 = vrot.slane %v1751_v41, 4  ;;  %v1765_v50 = vadd.f32 %v479_v35, %v478_v34  ;;  %v2864_v53 = vsel %vm2734_vm3, %v1722_v42, %v2863_v37  ;;  %v1759_v54 = vrot.slane %v1758_v45, 4  ;;  %v488_v37 = vld [vmem:[#allocation6 + $0xa00] sm:$0xff] }
 0x1ab   :  { %v1729_v51 = vadd.f32 %v1728_v43, %v1727_v30  ;;  %v1734_v52 = vadd.f32 %v1733_v44, %v1732_v32  ;;  %v1740_v55 = vrot.slane %v1739_v46, 2  ;;  %v1746_v57 = vadd.f32 %v1745_v49, %v1744_v40  ;;  %v489_v40 = vld [vmem:[#allocation6 + $0xa08] sm:$0xff] }
 0x1ac   :  { %v1753_v58 = vadd.f32 %v1752_v26, %v1751_v41  ;;  %v1766_v59 = vrot.slane %v1765_v50, 4  ;;  %v1760_v62 = vadd.f32 %v1759_v54, %v1758_v45  ;;  %v1772_v63 = vadd.f32 %v481_v48, %v480_v47  ;;  %v490_v41 = vld [vmem:[#allocation6 + $0xa10] sm:$0xff]  ;;  %v492_v47 = vld [vmem:[#allocation6 + $0xa20] sm:$0xff]  ;;  %v493_v48 = vld [vmem:[#allocation6 + $0xa28] sm:$0xff] }
 0x1ad   :  { %v1735_v60 = vrot.slane %v1734_v52, 1  ;;  %v2865_v61 = vsel %vm2736_vm4, %v1729_v51, %v2864_v53  ;;  %v1741_v0 = vadd.f32 %v1740_v55, %v1739_v46  ;;  %v1747_v1 = vrot.slane %v1746_v57, 2  ;;  %v491_v46 = vld [vmem:[#allocation6 + $0xa18] sm:$0xff] }
 0x1ae   :  { %v1754_v2 = vrot.slane %v1753_v58, 2  ;;  %v1767_v3 = vadd.f32 %v1766_v59, %v1765_v50  ;;  %v1761_v5 = vrot.slane %v1760_v62, 2  ;;  %v1773_v31 = vrot.slane %v1772_v63, 4  ;;  %v495_v53 = vld [vmem:[#allocation6 + $0xa38] sm:$0xff] }
 0x1af   :  { %v1736_v4 = vadd.f32 %v1735_v60, %v1734_v52  ;;  %v1779_v6 = vadd.f32 %v483_v56, %v482_v39  ;;  %v1742_v7 = vrot.slane %v1741_v0, 1  ;;  %v1748_v10 = vadd.f32 %v1747_v1, %v1746_v57  ;;  %v494_v52 = vld [vmem:[#allocation6 + $0xa30] sm:$0xff] }
 0x1b0   :  { %v1755_v11 = vadd.f32 %v1754_v2, %v1753_v58  ;;  %v1768_v12 = vrot.slane %v1767_v3, 2  ;;  %v1762_v14 = vadd.f32 %v1761_v5, %v1760_v62  ;;  %v1774_v15 = vadd.f32 %v1773_v31, %v1772_v63  ;;  %v496_v63 = vld [vmem:[#allocation6 + $0xa40] sm:$0xff] }
 0x1b1   :  { %v2866_v13 = vsel %vm2738_vm5, %v1736_v4, %v2865_v61  ;;  %v1780_v16 = vrot.slane %v1779_v6, 4  ;;  %v1743_v17 = vadd.f32 %v1742_v7, %v1741_v0  ;;  %v1749_v19 = vrot.slane %v1748_v10, 1  ;;  %v497_v0 = vld [vmem:[#allocation6 + $0xa48] sm:$0xff] }
 0x1b2   :  { %v1756_v20 = vrot.slane %v1755_v11, 1  ;;  %v1769_v21 = vadd.f32 %v1768_v12, %v1767_v3  ;;  %v1763_v24 = vrot.slane %v1762_v14, 1  ;;  %v1775_v27 = vrot.slane %v1774_v15, 2 }
 0x1b3   :  { %v1781_v25 = vadd.f32 %v1780_v16, %v1779_v6  ;;  %v1786_v38 = vadd.f32 %v485_v9, %v484_v8  ;;  %v2867_v28 = vsel %vm2740_vm6, %v1743_v17, %v2866_v13  ;;  %v1750_v29 = vadd.f32 %v1749_v19, %v1748_v10  ;;  %v498_v8 = vld [vmem:[#allocation6 + $0xa50] sm:$0xff]  ;;  %v499_v9 = vld [vmem:[#allocation6 + $0xa58] sm:$0xff] }
 0x1b4   :  { %v1757_v30 = vadd.f32 %v1756_v20, %v1755_v11  ;;  %v1770_v32 = vrot.slane %v1769_v21, 1  ;;  %v3140_v33 = vadd.f32 %v3108_v18, %v2867_v28  ;;  %v1764_v34 = vadd.f32 %v1763_v24, %v1762_v14  ;;  %v500_v28 = vld [vmem:[#allocation6 + $0xa60] sm:$0xff] }
 0x1b5   :  { %v1776_v35 = vadd.f32 %v1775_v27, %v1774_v15  ;;  %v1782_v36 = vrot.slane %v1781_v25, 2  ;;  %v1787_v43 = vrot.slane %v1786_v38, 4  ;;  %v1793_v44 = vadd.f32 %v487_v23, %v486_v22 }
 0x1b6   :  { %v1771_v42 = vadd.f32 %v1770_v32, %v1769_v21  ;;  %v2868_v45 = vsel %vm2728_vm0, %v1757_v30, %v1750_v29  ;;  %v3172_v49 = vmul.f32 0.05882353, %v3140_v33  ;;  %v1800_v56 = vadd.f32 %v489_v40, %v488_v37  ;;  %v501_v29 = vld [vmem:[#allocation6 + $0xa68] sm:$0xff]  ;;  %v3109_v37 = vld [vmem:[#allocation3 + $0x98] sm:$0xff] }
 0x1b7   :  { %v1777_v26 = vrot.slane %v1776_v35, 1  ;;  %v1783_v50 = vadd.f32 %v1782_v36, %v1781_v25  ;;  %v2869_v51 = vsel %vm2730_vm1, %v1764_v34, %v2868_v45  ;;  %v1788_v54 = vadd.f32 %v1787_v43, %v1786_v38  ;;  %v503_v43 = vld [vmem:[#allocation6 + $0xa78] sm:$0xff] }
 0x1b8   :  { %v1794_v55 = vrot.slane %v1793_v44, 4  ;;  %v2870_v39 = vsel %vm2732_vm2, %v1771_v42, %v2869_v51  ;;  %3848 = vmatprep.mubr.f32.mxu1 %v3172_v49  ;;  %v1807_v59 = vadd.f32 %v491_v46, %v490_v41  ;;  %v1814_v60 = vadd.f32 %v493_v48, %v492_v47  ;;  %v502_v42 = vld [vmem:[#allocation6 + $0xa70] sm:$0xff]  ;;  %v504_v51 = vld [vmem:[#allocation6 + $0xa80] sm:$0xff] }
 0x1b9   :  { %v1778_v57 = vadd.f32 %v1777_v26, %v1776_v35  ;;  %v1784_v58 = vrot.slane %v1783_v50, 1  ;;  %v1789_v61 = vrot.slane %v1788_v54, 2  ;;  %v1801_v1 = vrot.slane %v1800_v56, 4 }
 0x1ba   :  { %v1795_v62 = vadd.f32 %v1794_v55, %v1793_v44  ;;  %v1821_v2 = vadd.f32 %v495_v53, %v494_v52  ;;  %v1808_v5 = vrot.slane %v1807_v59, 4  ;;  %v1815_v31 = vrot.slane %v1814_v60, 4  ;;  %v505_v52 = vld [vmem:[#allocation6 + $0xa88] sm:$0xff] }
 0x1bb   :  { %v1785_v3 = vadd.f32 %v1784_v58, %v1783_v50  ;;  %v2871_v4 = vsel %vm2734_vm3, %v1778_v57, %v2870_v39  ;;  %v1790_v6 = vadd.f32 %v1789_v61, %v1788_v54  ;;  %v1802_v10 = vadd.f32 %v1801_v1, %v1800_v56  ;;  %v507_v61 = vld [vmem:[#allocation6 + $0xa98] sm:$0xff]  ;;  %v508_v1 = vld [vmem:[#allocation6 + $0xaa0] sm:$0xff] }
 0x1bc   :  { %v1796_v7 = vrot.slane %v1795_v62, 2  ;;  %v1822_v11 = vrot.slane %v1821_v2, 4  ;;  %v1809_v13 = vadd.f32 %v1808_v5, %v1807_v59  ;;  %v1816_v14 = vadd.f32 %v1815_v31, %v1814_v60  ;;  %v506_v60 = vld [vmem:[#allocation6 + $0xa90] sm:$0xff] }
 0x1bd   :  { %v2872_v12 = vsel %vm2736_vm4, %v1785_v3, %v2871_v4  ;;  %v1828_v15 = vadd.f32 %v497_v0, %v496_v63  ;;  %v1791_v16 = vrot.slane %v1790_v6, 1  ;;  %v1803_v18 = vrot.slane %v1802_v10, 2 }
 0x1be   :  { %v1797_v17 = vadd.f32 %v1796_v7, %v1795_v62  ;;  %v1823_v19 = vadd.f32 %v1822_v11, %v1821_v2  ;;  %v1810_v20 = vrot.slane %v1809_v13, 2  ;;  %v1817_v21 = vrot.slane %v1816_v14, 2  ;;  %v509_v2 = vld [vmem:[#allocation6 + $0xaa8] sm:$0xff]  ;;  %v510_v7 = vld [vmem:[#allocation6 + $0xab0] sm:$0xff] }
 0x1bf   :  { %v1829_v22 = vrot.slane %v1828_v15, 4  ;;  %v1835_v23 = vadd.f32 %v499_v9, %v498_v8  ;;  %v1792_v24 = vadd.f32 %v1791_v16, %v1790_v6  ;;  %v1804_v25 = vadd.f32 %v1803_v18, %v1802_v10  ;;  %v511_v8 = vld [vmem:[#allocation6 + $0xab8] sm:$0xff]  ;;  %v512_v16 = vld [vmem:[#allocation6 + $0xac0] sm:$0xff] }
 0x1c0   :  { %v1798_v27 = vrot.slane %v1797_v17, 1  ;;  %v1824_v38 = vrot.slane %v1823_v19, 2  ;;  %v1811_v30 = vadd.f32 %v1810_v20, %v1809_v13  ;;  %v1818_v32 = vadd.f32 %v1817_v21, %v1816_v14 }
 0x1c1   :  { %v1830_v33 = vadd.f32 %v1829_v22, %v1828_v15  ;;  %v1836_v34 = vrot.slane %v1835_v23, 4  ;;  %v2873_v36 = vsel %vm2738_vm5, %v1792_v24, %v2872_v12  ;;  %v1805_v40 = vrot.slane %v1804_v25, 1 }
 0x1c2   :  { %v1799_v35 = vadd.f32 %v1798_v27, %v1797_v17  ;;  %v1825_v41 = vadd.f32 %v1824_v38, %v1823_v19  ;;  %v1812_v44 = vrot.slane %v1811_v30, 1  ;;  %v1819_v45 = vrot.slane %v1818_v32, 1  ;;  %v513_v17 = vld [vmem:[#allocation6 + $0xac8] sm:$0xff]  ;;  %v514_v38 = vld [vmem:[#allocation6 + $0xad0] sm:$0xff] }
 0x1c3   :  { %v1831_v46 = vrot.slane %v1830_v33, 2  ;;  %v1837_v47 = vadd.f32 %v1836_v34, %v1835_v23  ;;  %v1806_v49 = vadd.f32 %v1805_v40, %v1804_v25  ;;  %v1842_v50 = vadd.f32 %v501_v29, %v500_v28  ;;  %v515_v28 = vld [vmem:[#allocation6 + $0xad8] sm:$0xff] }
 0x1c4   :  { %v2874_v48 = vsel %vm2740_vm6, %v1799_v35, %v2873_v36  ;;  %v1826_v26 = vrot.slane %v1825_v41, 1  ;;  %v1813_v54 = vadd.f32 %v1812_v44, %v1811_v30  ;;  %v1820_v55 = vadd.f32 %v1819_v45, %v1818_v32 }
 0x1c5   :  { %v3141_v53 = vadd.f32 %v3109_v37, %v2874_v48  ;;  %v1832_v39 = vadd.f32 %v1831_v46, %v1830_v33  ;;  %v1838_v57 = vrot.slane %v1837_v47, 2  ;;  %v1843_v58 = vrot.slane %v1842_v50, 4  ;;  %v516_v48 = vld [vmem:[#allocation6 + $0xae0] sm:$0xff] }
 0x1c6   :  { %v1827_v56 = vadd.f32 %v1826_v26, %v1825_v41  ;;  %v1849_v59 = vadd.f32 %v503_v43, %v502_v42  ;;  %v2875_v0 = vsel %vm2728_vm0, %v1813_v54, %v1806_v49  ;;  %v1856_v3 = vadd.f32 %v505_v52, %v504_v51  ;;  %v517_v49 = vld [vmem:[#allocation6 + $0xae8] sm:$0xff] }
 0x1c7   :  { %v3173_v62 = vmul.f32 0.05882353, %v3141_v53  ;;  %v1833_v63 = vrot.slane %v1832_v39, 1  ;;  %v1839_v4 = vadd.f32 %v1838_v57, %v1837_v47  ;;  %v1844_v5 = vadd.f32 %v1843_v58, %v1842_v50  ;;  %v518_v57 = vld [vmem:[#allocation6 + $0xaf0] sm:$0xff]  ;;  %v519_v58 = vld [vmem:[#allocation6 + $0xaf8] sm:$0xff] }
 0x1c8   :  { %v1850_v31 = vrot.slane %v1849_v59, 4  ;;  %v2876_v6 = vsel %vm2730_vm1, %v1820_v55, %v2875_v0  ;;  %v1857_v11 = vrot.slane %v1856_v3, 4  ;;  %v1863_v12 = vadd.f32 %v507_v61, %v506_v60  ;;  %v3110_v55 = vld [vmem:[#allocation3 + $0xa0] sm:$0xff] }
 0x1c9   :  { %3849 = vmatmul.mubr.f32.gmra.mrb[2].mxu1 %v3173_v62  ;;  %v1834_v9 = vadd.f32 %v1833_v63, %v1832_v39  ;;  %v2877_v10 = vsel %vm2732_vm2, %v1827_v56, %v2876_v6  ;;  %v1840_v13 = vrot.slane %v1839_v4, 1  ;;  %v1845_v14 = vrot.slane %v1844_v5, 2  ;;  %v520_v6 = vld [vmem:[#allocation6 + $0xb00] sm:$0xff] }
 0x1ca   :  { %v1851_v15 = vadd.f32 %v1850_v31, %v1849_v59  ;;  %v1870_v18 = vadd.f32 %v509_v2, %v508_v1  ;;  %v1858_v20 = vadd.f32 %v1857_v11, %v1856_v3  ;;  %v1864_v21 = vrot.slane %v1863_v12, 4  ;;  %v521_v11 = vld [vmem:[#allocation6 + $0xb08] sm:$0xff] }
 0x1cb   :  { %v2878_v19 = vsel %vm2734_vm3, %v1834_v9, %v2877_v10  ;;  %v1877_v22 = vadd.f32 %v511_v8, %v510_v7  ;;  %v1841_v23 = vadd.f32 %v1840_v13, %v1839_v4  ;;  %v1846_v24 = vadd.f32 %v1845_v14, %v1844_v5  ;;  %v523_v13 = vld [vmem:[#allocation6 + $0xb18] sm:$0xff] }
 0x1cc   :  { %v1852_v27 = vrot.slane %v1851_v15, 2  ;;  %v1871_v25 = vrot.slane %v1870_v18, 4  ;;  %v1859_v29 = vrot.slane %v1858_v20, 2  ;;  %v1865_v30 = vadd.f32 %v1864_v21, %v1863_v12  ;;  %v522_v12 = vld [vmem:[#allocation6 + $0xb10] sm:$0xff] }
 0x1cd   :  { %v1878_v32 = vrot.slane %v1877_v22, 4  ;;  %v1884_v33 = vadd.f32 %v513_v17, %v512_v16  ;;  %v1847_v34 = vrot.slane %v1846_v24, 1  ;;  %v2879_v36 = vsel %vm2736_vm4, %v1841_v23, %v2878_v19  ;;  %v525_v19 = vld [vmem:[#allocation6 + $0xb28] sm:$0xff] }
 0x1ce   :  { %v1853_v35 = vadd.f32 %v1852_v27, %v1851_v15  ;;  %v1872_v37 = vadd.f32 %v1871_v25, %v1870_v18  ;;  %v1860_v40 = vadd.f32 %v1859_v29, %v1858_v20  ;;  %v1866_v41 = vrot.slane %v1865_v30, 2  ;;  %v524_v18 = vld [vmem:[#allocation6 + $0xb20] sm:$0xff]  ;;  %v527_v27 = vld [vmem:[#allocation6 + $0xb38] sm:$0xff] }
 0x1cf   :  { %v1879_v42 = vadd.f32 %v1878_v32, %v1877_v22  ;;  %v1885_v43 = vrot.slane %v1884_v33, 4  ;;  %v1848_v44 = vadd.f32 %v1847_v34, %v1846_v24  ;;  %v1891_v47 = vadd.f32 %v515_v28, %v514_v38  ;;  %v526_v24 = vld [vmem:[#allocation6 + $0xb30] sm:$0xff]  ;;  %v528_v34 = vld [vmem:[#allocation6 + $0xb40] sm:$0xff] }
 0x1d0   :  { %v1854_v45 = vrot.slane %v1853_v35, 1  ;;  %v1873_v46 = vrot.slane %v1872_v37, 2  ;;  %v1861_v26 = vrot.slane %v1860_v40, 1  ;;  %v1867_v50 = vadd.f32 %v1866_v41, %v1865_v30 }
 0x1d1   :  { %v1880_v51 = vrot.slane %v1879_v42, 2  ;;  %v1886_v52 = vadd.f32 %v1885_v43, %v1884_v33  ;;  %v2880_v54 = vsel %vm2738_vm5, %v1848_v44, %v2879_v36  ;;  %v1892_v56 = vrot.slane %v1891_v47, 4 }
 0x1d2   :  { %v1855_v53 = vadd.f32 %v1854_v45, %v1853_v35  ;;  %v1874_v39 = vadd.f32 %v1873_v46, %v1872_v37  ;;  %v1862_v59 = vadd.f32 %v1861_v26, %v1860_v40  ;;  %v1868_v60 = vrot.slane %v1867_v50, 1  ;;  %v529_v35 = vld [vmem:[#allocation6 + $0xb48] sm:$0xff] }
 0x1d3   :  { %v1881_v61 = vadd.f32 %v1880_v51, %v1879_v42  ;;  %v1887_v62 = vrot.slane %v1886_v52, 2  ;;  %v1893_v1 = vadd.f32 %v1892_v56, %v1891_v47  ;;  %v1898_v2 = vadd.f32 %v517_v49, %v516_v48  ;;  %v530_v47 = vld [vmem:[#allocation6 + $0xb50] sm:$0xff]  ;;  %v531_v48 = vld [vmem:[#allocation6 + $0xb58] sm:$0xff] }
 0x1d4   :  { %v2881_v63 = vsel %vm2740_vm6, %v1855_v53, %v2880_v54  ;;  %v1875_v0 = vrot.slane %v1874_v39, 1  ;;  %v1869_v4 = vadd.f32 %v1868_v60, %v1867_v50  ;;  %v1905_v10 = vadd.f32 %v519_v58, %v518_v57 }
 0x1d5   :  { %v3142_v3 = vadd.f32 %v3110_v55, %v2881_v63  ;;  %v1882_v5 = vrot.slane %v1881_v61, 1  ;;  %v1888_v31 = vadd.f32 %v1887_v62, %v1886_v52  ;;  %v1894_v8 = vrot.slane %v1893_v1, 2  ;;  %v532_v63 = vld [vmem:[#allocation6 + $0xb60] sm:$0xff] }
 0x1d6   :  { %v1876_v7 = vadd.f32 %v1875_v0, %v1874_v39  ;;  %v1899_v9 = vrot.slane %v1898_v2, 4  ;;  %v2882_v17 = vsel %vm2728_vm0, %v1869_v4, %v1862_v59  ;;  %v1906_v22 = vrot.slane %v1905_v10, 4  ;;  %v533_v0 = vld [vmem:[#allocation6 + $0xb68] sm:$0xff] }
 0x1d7   :  { %v3174_v14 = vmul.f32 0.05882353, %v3142_v3  ;;  %v1883_v15 = vadd.f32 %v1882_v5, %v1881_v61  ;;  %v1889_v16 = vrot.slane %v1888_v31, 1  ;;  %v1895_v20 = vadd.f32 %v1894_v8, %v1893_v1 }
 0x1d8   :  { %v1900_v21 = vadd.f32 %v1899_v9, %v1898_v2  ;;  %v2883_v23 = vsel %vm2730_vm1, %v1876_v7, %v2882_v17  ;;  %v1912_v28 = vadd.f32 %v521_v11, %v520_v6  ;;  %v1919_v29 = vadd.f32 %v523_v13, %v522_v12  ;;  %v3111_v6 = vld [vmem:[#allocation3 + $0xa8] sm:$0xff] }
 0x1d9   :  { %3851 = vmatprep.mubr.f32.mxu1 %v3174_v14  ;;  %v1890_v25 = vadd.f32 %v1889_v16, %v1888_v31  ;;  %v2884_v38 = vsel %vm2732_vm2, %v1883_v15, %v2883_v23  ;;  %v1896_v30 = vrot.slane %v1895_v20, 1  ;;  %v1907_v33 = vadd.f32 %v1906_v22, %v1905_v10  ;;  %v534_v14 = vld [vmem:[#allocation6 + $0xb70] sm:$0xff]  ;;  %v535_v15 = vld [vmem:[#allocation6 + $0xb78] sm:$0xff]  ;;  %v536_v23 = vld [vmem:[#allocation6 + $0xb80] sm:$0xff] }
 0x1da   :  { %v1901_v32 = vrot.slane %v1900_v21, 2  ;;  %v1926_v36 = vadd.f32 %v525_v19, %v524_v18  ;;  %v1913_v40 = vrot.slane %v1912_v28, 4  ;;  %v1920_v41 = vrot.slane %v1919_v29, 4 }
 0x1db   :  { %v2885_v37 = vsel %vm2734_vm3, %v1890_v25, %v2884_v38  ;;  %v1933_v42 = vadd.f32 %v527_v27, %v526_v24  ;;  %v1897_v43 = vadd.f32 %v1896_v30, %v1895_v20  ;;  %v1908_v45 = vrot.slane %v1907_v33, 2  ;;  %v539_v30 = vld [vmem:[#allocation6 + $0xb98] sm:$0xff] }
 0x1dc   :  { %v1902_v44 = vadd.f32 %v1901_v32, %v1900_v21  ;;  %v1927_v46 = vrot.slane %v1926_v36, 4  ;;  %v1914_v49 = vadd.f32 %v1913_v40, %v1912_v28  ;;  %v1921_v26 = vadd.f32 %v1920_v41, %v1919_v29  ;;  %v537_v28 = vld [vmem:[#allocation6 + $0xb88] sm:$0xff]  ;;  %v538_v29 = vld [vmem:[#allocation6 + $0xb90] sm:$0xff] }
 0x1dd   :  { %v1934_v50 = vrot.slane %v1933_v42, 4  ;;  %v1940_v51 = vadd.f32 %v529_v35, %v528_v34  ;;  %v1909_v53 = vadd.f32 %v1908_v45, %v1907_v33  ;;  %v2886_v54 = vsel %vm2736_vm4, %v1897_v43, %v2885_v37  ;;  %v541_v37 = vld [vmem:[#allocation6 + $0xba8] sm:$0xff]  ;;  %v543_v45 = vld [vmem:[#allocation6 + $0xbb8] sm:$0xff] }
 0x1de   :  { %v1903_v52 = vrot.slane %v1902_v44, 1  ;;  %v1928_v55 = vadd.f32 %v1927_v46, %v1926_v36  ;;  %v1915_v39 = vrot.slane %v1914_v49, 2  ;;  %v1922_v56 = vrot.slane %v1921_v26, 2  ;;  %v540_v36 = vld [vmem:[#allocation6 + $0xba0] sm:$0xff] }
 0x1df   :  { %v1935_v57 = vadd.f32 %v1934_v50, %v1933_v42  ;;  %v1941_v58 = vrot.slane %v1940_v51, 4  ;;  %v1910_v60 = vrot.slane %v1909_v53, 1  ;;  %v1947_v62 = vadd.f32 %v531_v48, %v530_v47 }
 0x1e0   :  { %v1904_v59 = vadd.f32 %v1903_v52, %v1902_v44  ;;  %v1929_v61 = vrot.slane %v1928_v55, 2  ;;  %v1916_v1 = vadd.f32 %v1915_v39, %v1914_v49  ;;  %v1923_v2 = vadd.f32 %v1922_v56, %v1921_v26  ;;  %v542_v44 = vld [vmem:[#allocation6 + $0xbb0] sm:$0xff] }
 0x1e1   :  { %v1936_v3 = vrot.slane %v1935_v57, 2  ;;  %v1942_v4 = vadd.f32 %v1941_v58, %v1940_v51  ;;  %v1911_v5 = vadd.f32 %v1910_v60, %v1909_v53  ;;  %v1948_v8 = vrot.slane %v1947_v62, 4 }
 0x1e2   :  { %v2887_v31 = vsel %vm2738_vm5, %v1904_v59, %v2886_v54  ;;  %v1930_v7 = vadd.f32 %v1929_v61, %v1928_v55  ;;  %v1917_v9 = vrot.slane %v1916_v1, 1  ;;  %v1924_v10 = vrot.slane %v1923_v2, 1  ;;  %v544_v54 = vld [vmem:[#allocation6 + $0xbc0] sm:$0xff]  ;;  %v545_v55 = vld [vmem:[#allocation6 + $0xbc8] sm:$0xff] }
 0x1e3   :  { %v1937_v11 = vadd.f32 %v1936_v3, %v1935_v57  ;;  %v1943_v12 = vrot.slane %v1942_v4, 2  ;;  %v2888_v13 = vsel %vm2740_vm6, %v1911_v5, %v2887_v31  ;;  %v1949_v17 = vadd.f32 %v1948_v8, %v1947_v62 }
 0x1e4   :  { %v1931_v16 = vrot.slane %v1930_v7, 1  ;;  %v1954_v18 = vadd.f32 %v533_v0, %v532_v63  ;;  %v3143_v19 = vadd.f32 %v3111_v6, %v2888_v13  ;;  %v1918_v20 = vadd.f32 %v1917_v9, %v1916_v1  ;;  %v546_v63 = vld [vmem:[#allocation6 + $0xbd0] sm:$0xff]  ;;  %v547_v0 = vld [vmem:[#allocation6 + $0xbd8] sm:$0xff] }
 0x1e5   :  { %v1925_v21 = vadd.f32 %v1924_v10, %v1923_v2  ;;  %v1938_v22 = vrot.slane %v1937_v11, 1  ;;  %v1944_v27 = vadd.f32 %v1943_v12, %v1942_v4  ;;  %v1950_v25 = vrot.slane %v1949_v17, 2 }
 0x1e6   :  { %v1932_v24 = vadd.f32 %v1931_v16, %v1930_v7  ;;  %v1955_v38 = vrot.slane %v1954_v18, 4  ;;  %v3175_v32 = vmul.f32 0.05882353, %v3143_v19  ;;  %v1961_v34 = vadd.f32 %v535_v15, %v534_v14  ;;  %v548_v16 = vld [vmem:[#allocation6 + $0xbe0] sm:$0xff] }
 0x1e7   :  { %v1939_v33 = vadd.f32 %v1938_v22, %v1937_v11  ;;  %v2889_v35 = vsel %vm2728_vm0, %v1925_v21, %v1918_v20  ;;  %v1945_v40 = vrot.slane %v1944_v27, 1  ;;  %v1951_v41 = vadd.f32 %v1950_v25, %v1949_v17  ;;  %v549_v17 = vld [vmem:[#allocation6 + $0xbe8] sm:$0xff]  ;;  %v3112_v25 = vld [vmem:[#allocation3 + $0xb0] sm:$0xff] }
 0x1e8   :  { %v1956_v42 = vadd.f32 %v1955_v38, %v1954_v18  ;;  %v2890_v43 = vsel %vm2730_vm1, %v1932_v24, %v2889_v35  ;;  %3852 = vmatmul.mubr.f32.gmra.mrb[4].mxu1 %v3175_v32  ;;  %v1962_v46 = vrot.slane %v1961_v34, 4  ;;  %v1968_v48 = vadd.f32 %v537_v28, %v536_v23  ;;  %v551_v32 = vld [vmem:[#allocation6 + $0xbf8] sm:$0xff] }
 0x1e9   :  { %v2891_v47 = vsel %vm2732_vm2, %v1939_v33, %v2890_v43  ;;  %v1975_v49 = vadd.f32 %v539_v30, %v538_v29  ;;  %v1946_v26 = vadd.f32 %v1945_v40, %v1944_v27  ;;  %v1952_v50 = vrot.slane %v1951_v41, 1  ;;  %v550_v30 = vld [vmem:[#allocation6 + $0xbf0] sm:$0xff] }
 0x1ea   :  { %v1957_v51 = vrot.slane %v1956_v42, 2  ;;  %v1982_v52 = vadd.f32 %v541_v37, %v540_v36  ;;  %v1963_v53 = vadd.f32 %v1962_v46, %v1961_v34  ;;  %v1969_v39 = vrot.slane %v1968_v48, 4 }
 0x1eb   :  { %v1976_v56 = vrot.slane %v1975_v49, 4  ;;  %v1989_v57 = vadd.f32 %v543_v45, %v542_v44  ;;  %v1953_v58 = vadd.f32 %v1952_v50, %v1951_v41  ;;  %v2892_v60 = vsel %vm2734_vm3, %v1946_v26, %v2891_v47  ;;  %v552_v47 = vld [vmem:[#allocation6 + $0xc00] sm:$0xff] }
 0x1ec   :  { %v1958_v59 = vadd.f32 %v1957_v51, %v1956_v42  ;;  %v1983_v61 = vrot.slane %v1982_v52, 4  ;;  %v1964_v62 = vrot.slane %v1963_v53, 2  ;;  %v1970_v1 = vadd.f32 %v1969_v39, %v1968_v48  ;;  %v553_v48 = vld [vmem:[#allocation6 + $0xc08] sm:$0xff] }
 0x1ed   :  { %v1977_v2 = vadd.f32 %v1976_v56, %v1975_v49  ;;  %v1990_v3 = vrot.slane %v1989_v57, 4  ;;  %v2893_v5 = vsel %vm2736_vm4, %v1953_v58, %v2892_v60  ;;  %v1996_v6 = vadd.f32 %v545_v55, %v544_v54  ;;  %v554_v49 = vld [vmem:[#allocation6 + $0xc10] sm:$0xff]  ;;  %v556_v54 = vld [vmem:[#allocation6 + $0xc20] sm:$0xff]  ;;  %v557_v55 = vld [vmem:[#allocation6 + $0xc28] sm:$0xff] }
 0x1ee   :  { %v1959_v4 = vrot.slane %v1958_v59, 1  ;;  %v1984_v31 = vadd.f32 %v1983_v61, %v1982_v52  ;;  %v1965_v7 = vadd.f32 %v1964_v62, %v1963_v53  ;;  %v1971_v8 = vrot.slane %v1970_v1, 2  ;;  %v555_v53 = vld [vmem:[#allocation6 + $0xc18] sm:$0xff] }
 0x1ef   :  { %v1978_v9 = vrot.slane %v1977_v2, 2  ;;  %v1991_v10 = vadd.f32 %v1990_v3, %v1989_v57  ;;  %v1997_v13 = vrot.slane %v1996_v6, 4  ;;  %v2003_v14 = vadd.f32 %v547_v0, %v546_v63  ;;  %v559_v60 = vld [vmem:[#allocation6 + $0xc38] sm:$0xff] }
 0x1f0   :  { %v1960_v11 = vadd.f32 %v1959_v4, %v1958_v59  ;;  %v1985_v12 = vrot.slane %v1984_v31, 2  ;;  %v1966_v15 = vrot.slane %v1965_v7, 1  ;;  %v1972_v18 = vadd.f32 %v1971_v8, %v1970_v1  ;;  %v558_v59 = vld [vmem:[#allocation6 + $0xc30] sm:$0xff] }
 0x1f1   :  { %v1979_v19 = vadd.f32 %v1978_v9, %v1977_v2  ;;  %v1992_v20 = vrot.slane %v1991_v10, 2  ;;  %v1998_v23 = vadd.f32 %v1997_v13, %v1996_v6  ;;  %v2004_v24 = vrot.slane %v2003_v14, 4  ;;  %v560_v6 = vld [vmem:[#allocation6 + $0xc40] sm:$0xff] }
 0x1f2   :  { %v2894_v21 = vsel %vm2738_vm5, %v1960_v11, %v2893_v5  ;;  %v1986_v22 = vadd.f32 %v1985_v12, %v1984_v31  ;;  %v1967_v27 = vadd.f32 %v1966_v15, %v1965_v7  ;;  %v1973_v38 = vrot.slane %v1972_v18, 1  ;;  %v561_v7 = vld [vmem:[#allocation6 + $0xc48] sm:$0xff] }
 0x1f3   :  { %v1980_v28 = vrot.slane %v1979_v19, 1  ;;  %v1993_v29 = vadd.f32 %v1992_v20, %v1991_v10  ;;  %v1999_v34 = vrot.slane %v1998_v23, 2  ;;  %v2005_v35 = vadd.f32 %v2004_v24, %v2003_v14 }
 0x1f4   :  { %v1987_v33 = vrot.slane %v1986_v22, 1  ;;  %v2010_v36 = vadd.f32 %v549_v17, %v548_v16  ;;  %v2895_v37 = vsel %vm2740_vm6, %v1967_v27, %v2894_v21  ;;  %v1974_v40 = vadd.f32 %v1973_v38, %v1972_v18  ;;  %v562_v16 = vld [vmem:[#allocation6 + $0xc50] sm:$0xff]  ;;  %v563_v17 = vld [vmem:[#allocation6 + $0xc58] sm:$0xff] }
 0x1f5   :  { %v1981_v41 = vadd.f32 %v1980_v28, %v1979_v19  ;;  %v1994_v42 = vrot.slane %v1993_v29, 1  ;;  %v3144_v43 = vadd.f32 %v3112_v25, %v2895_v37  ;;  %v2000_v45 = vadd.f32 %v1999_v34, %v1998_v23  ;;  %v564_v37 = vld [vmem:[#allocation6 + $0xc60] sm:$0xff] }
 0x1f6   :  { %v1988_v44 = vadd.f32 %v1987_v33, %v1986_v22  ;;  %v2006_v46 = vrot.slane %v2005_v35, 2  ;;  %v2011_v50 = vrot.slane %v2010_v36, 4  ;;  %v2017_v51 = vadd.f32 %v551_v32, %v550_v30 }
 0x1f7   :  { %v1995_v26 = vadd.f32 %v1994_v42, %v1993_v29  ;;  %v2896_v52 = vsel %vm2728_vm0, %v1981_v41, %v1974_v40  ;;  %v3176_v39 = vmul.f32 0.05882353, %v3144_v43  ;;  %v2001_v56 = vrot.slane %v2000_v45, 1  ;;  %v565_v40 = vld [vmem:[#allocation6 + $0xc68] sm:$0xff] }
 0x1f8   :  { %v2007_v57 = vadd.f32 %v2006_v46, %v2005_v35  ;;  %v2897_v58 = vsel %vm2730_vm1, %v1988_v44, %v2896_v52  ;;  %v2012_v61 = vadd.f32 %v2011_v50, %v2010_v36  ;;  %v2018_v62 = vrot.slane %v2017_v51, 4  ;;  %v567_v50 = vld [vmem:[#allocation6 + $0xc78] sm:$0xff] }
 0x1f9   :  { %v2898_v63 = vsel %vm2732_vm2, %v1995_v26, %v2897_v58  ;;  %v2024_v0 = vadd.f32 %v553_v48, %v552_v47  ;;  %3854 = vmatprep.mubr.f32.mxu1 %v3176_v39  ;;  %v2002_v1 = vadd.f32 %v2001_v56, %v2000_v45  ;;  %v2031_v3 = vadd.f32 %v555_v53, %v554_v49  ;;  %v3113_v47 = vld [vmem:[#allocation3 + $0xb8] sm:$0xff]  ;;  %v566_v26 = vld [vmem:[#allocation6 + $0xc70] sm:$0xff]  ;;  %v568_v58 = vld [vmem:[#allocation6 + $0xc80] sm:$0xff] }
 0x1fa   :  { %v2008_v2 = vrot.slane %v2007_v57, 1  ;;  %v2038_v4 = vadd.f32 %v557_v55, %v556_v54  ;;  %v2013_v5 = vrot.slane %v2012_v61, 2  ;;  %v2019_v31 = vadd.f32 %v2018_v62, %v2017_v51 }
 0x1fb   :  { %v2025_v8 = vrot.slane %v2024_v0, 4  ;;  %v2045_v9 = vadd.f32 %v559_v60, %v558_v59  ;;  %v2899_v11 = vsel %vm2734_vm3, %v2002_v1, %v2898_v63  ;;  %v2032_v12 = vrot.slane %v2031_v3, 4  ;;  %v569_v59 = vld [vmem:[#allocation6 + $0xc88] sm:$0xff] }
 0x1fc   :  { %v2009_v10 = vadd.f32 %v2008_v2, %v2007_v57  ;;  %v2039_v13 = vrot.slane %v2038_v4, 4  ;;  %v2014_v14 = vadd.f32 %v2013_v5, %v2012_v61  ;;  %v2020_v15 = vrot.slane %v2019_v31, 2  ;;  %v571_v5 = vld [vmem:[#allocation6 + $0xc98] sm:$0xff] }
 0x1fd   :  { %v2026_v18 = vadd.f32 %v2025_v8, %v2024_v0  ;;  %v2046_v19 = vrot.slane %v2045_v9, 4  ;;  %v2033_v21 = vadd.f32 %v2032_v12, %v2031_v3  ;;  %v2052_v23 = vadd.f32 %v561_v7, %v560_v6  ;;  %v572_v8 = vld [vmem:[#allocation6 + $0xca0] sm:$0xff] }
 0x1fe   :  { %v2900_v20 = vsel %vm2736_vm4, %v2009_v10, %v2899_v11  ;;  %v2040_v22 = vadd.f32 %v2039_v13, %v2038_v4  ;;  %v2015_v24 = vrot.slane %v2014_v14, 1  ;;  %v2021_v27 = vadd.f32 %v2020_v15, %v2019_v31  ;;  %v570_v4 = vld [vmem:[#allocation6 + $0xc90] sm:$0xff] }
 0x1ff   :  { %v2027_v25 = vrot.slane %v2026_v18, 2  ;;  %v2047_v38 = vadd.f32 %v2046_v19, %v2045_v9  ;;  %v2034_v28 = vrot.slane %v2033_v21, 2  ;;  %v2053_v30 = vrot.slane %v2052_v23, 4  ;;  %v573_v9 = vld [vmem:[#allocation6 + $0xca8] sm:$0xff]  ;;  %v574_v15 = vld [vmem:[#allocation6 + $0xcb0] sm:$0xff] }
 0x200   :  { %v2041_v29 = vrot.slane %v2040_v22, 2  ;;  %v2059_v32 = vadd.f32 %v563_v17, %v562_v16  ;;  %v2016_v33 = vadd.f32 %v2015_v24, %v2014_v14  ;;  %v2022_v34 = vrot.slane %v2021_v27, 1  ;;  %v575_v16 = vld [vmem:[#allocation6 + $0xcb8] sm:$0xff]  ;;  %v576_v24 = vld [vmem:[#allocation6 + $0xcc0] sm:$0xff] }
 0x201   :  { %v2028_v35 = vadd.f32 %v2027_v25, %v2026_v18  ;;  %v2048_v36 = vrot.slane %v2047_v38, 2  ;;  %v2035_v41 = vadd.f32 %v2034_v28, %v2033_v21  ;;  %v2054_v43 = vadd.f32 %v2053_v30, %v2052_v23 }
 0x202   :  { %v2042_v42 = vadd.f32 %v2041_v29, %v2040_v22  ;;  %v2060_v44 = vrot.slane %v2059_v32, 4  ;;  %v2023_v45 = vadd.f32 %v2022_v34, %v2021_v27  ;;  %v2901_v46 = vsel %vm2738_vm5, %v2016_v33, %v2900_v20  ;;  %v577_v27 = vld [vmem:[#allocation6 + $0xcc8] sm:$0xff] }
 0x203   :  { %v2029_v48 = vrot.slane %v2028_v35, 1  ;;  %v2049_v49 = vadd.f32 %v2048_v36, %v2047_v38  ;;  %v2036_v51 = vrot.slane %v2035_v41, 1  ;;  %v2055_v53 = vrot.slane %v2054_v43, 2 }
 0x204   :  { %v2043_v52 = vrot.slane %v2042_v42, 1  ;;  %v2061_v54 = vadd.f32 %v2060_v44, %v2059_v32  ;;  %v2902_v55 = vsel %vm2740_vm6, %v2023_v45, %v2901_v46  ;;  %v2066_v57 = vadd.f32 %v565_v40, %v564_v37  ;;  %v4434_v32 = vpop.f32.mrb[0].mxu0  ;;  %v578_v40 = vld [vmem:[#allocation6 + $0xcd0] sm:$0xff] }
 0x205   :  { %v2030_v39 = vadd.f32 %v2029_v48, %v2028_v35  ;;  %v2050_v56 = vrot.slane %v2049_v49, 1  ;;  %v3145_v60 = vadd.f32 %v3113_v47, %v2902_v55  ;;  %v2037_v61 = vadd.f32 %v2036_v51, %v2035_v41  ;;  %v4436_v37 = vpop.f32.mrb[1].mxu0  ;;  %v579_v41 = vld [vmem:[#allocation6 + $0xcd8] sm:$0xff] }
 0x206   :  { %v2044_v62 = vadd.f32 %v2043_v52, %v2042_v42  ;;  %v2056_v63 = vadd.f32 %v2055_v53, %v2054_v43  ;;  %v2062_v1 = vrot.slane %v2061_v54, 2  ;;  %v2067_v2 = vrot.slane %v2066_v57, 4  ;;  %v4438_v46 = vpop.f32.mrb[2].mxu0 }
 0x207   :  { %v2051_v0 = vadd.f32 %v2050_v56, %v2049_v49  ;;  %v2073_v3 = vadd.f32 %v567_v50, %v566_v26  ;;  %v3177_v31 = vmul.f32 0.05882353, %v3145_v60  ;;  %v2903_v7 = vsel %vm2728_vm0, %v2037_v61, %v2030_v39  ;;  %v4441_v50 = vpop.f32.mrb[3].mxu0  ;;  %v580_v60 = vld [vmem:[#allocation6 + $0xce0] sm:$0xff]  ;;  %v581_v61 = vld [vmem:[#allocation6 + $0xce8] sm:$0xff] }
 0x208   :  { %v2057_v6 = vrot.slane %v2056_v63, 1  ;;  %v2080_v10 = vadd.f32 %v569_v59, %v568_v58  ;;  %v2063_v11 = vadd.f32 %v2062_v1, %v2061_v54  ;;  %v2068_v12 = vadd.f32 %v2067_v2, %v2066_v57  ;;  %v4443_v55 = vpop.f32.mrb[4].mxu0 }
 0x209   :  { %v2074_v13 = vrot.slane %v2073_v3, 4  ;;  %v2904_v14 = vsel %vm2730_vm1, %v2044_v62, %v2903_v7  ;;  %3855 = vmatmul.mubr.f32.gmra.mrb[6].mxu1 %v3177_v31  ;;  %v2087_v20 = vadd.f32 %v571_v5, %v570_v4  ;;  %v2094_v25 = vadd.f32 %v573_v9, %v572_v8  ;;  %v4445_v59 = vpop.f32.mrb[5].mxu0  ;;  %v3114_v5 = vld [vmem:[#allocation3 + $0xc0] sm:$0xff]  ;;  %v582_v8 = vld [vmem:[#allocation6 + $0xcf0] sm:$0xff]  ;;  %v583_v9 = vld [vmem:[#allocation6 + $0xcf8] sm:$0xff] }
 0x20a   :  { %v2058_v17 = vadd.f32 %v2057_v6, %v2056_v63  ;;  %v2905_v18 = vsel %vm2732_vm2, %v2051_v0, %v2904_v14  ;;  %v2081_v19 = vrot.slane %v2080_v10, 4  ;;  %v2064_v21 = vrot.slane %v2063_v11, 1  ;;  %v4447_v2 = vpop.f32.mrb[6].mxu0 }
 0x20b   :  { %v2069_v22 = vrot.slane %v2068_v12, 2  ;;  %v2075_v23 = vadd.f32 %v2074_v13, %v2073_v3  ;;  %v2088_v29 = vrot.slane %v2087_v20, 4  ;;  %v2101_v30 = vadd.f32 %v575_v16, %v574_v15  ;;  %v4450_v7 = vpop.f32.mrb[7].mxu0 }
 0x20c   :  { %v2906_v38 = vsel %vm2734_vm3, %v2058_v17, %v2905_v18  ;;  %v2082_v28 = vadd.f32 %v2081_v19, %v2080_v10  ;;  %v2065_v33 = vadd.f32 %v2064_v21, %v2063_v11  ;;  %v2095_v36 = vrot.slane %v2094_v25, 4  ;;  %v4452_v14 = vpop.f32.mrb[8].mxu0 }
 0x20d   :  { %v2070_v34 = vadd.f32 %v2069_v22, %v2068_v12  ;;  %v2076_v35 = vrot.slane %v2075_v23, 2  ;;  %v2089_v43 = vadd.f32 %v2088_v29, %v2087_v20  ;;  %v2102_v44 = vrot.slane %v2101_v30, 4  ;;  %v4455_v19 = vpop.f32.mrb[9].mxu0  ;;  %v585_v29 = vld [vmem:[#allocation6 + $0xd08] sm:$0xff] }
 0x20e   :  { %v2083_v42 = vrot.slane %v2082_v28, 2  ;;  %v2108_v45 = vadd.f32 %v577_v27, %v576_v24  ;;  %v2907_v49 = vsel %vm2736_vm4, %v2065_v33, %v2906_v38  ;;  %v2096_v26 = vadd.f32 %v2095_v36, %v2094_v25  ;;  %v584_v24 = vld [vmem:[#allocation6 + $0xd00] sm:$0xff]  ;;  %v587_v33 = vld [vmem:[#allocation6 + $0xd18] sm:$0xff] }
 0x20f   :  { %v2071_v47 = vrot.slane %v2070_v34, 1  ;;  %v2077_v48 = vadd.f32 %v2076_v35, %v2075_v23  ;;  %v2090_v52 = vrot.slane %v2089_v43, 2  ;;  %v2103_v53 = vadd.f32 %v2102_v44, %v2101_v30  ;;  %v586_v30 = vld [vmem:[#allocation6 + $0xd10] sm:$0xff] }
 0x210   :  { %v2084_v51 = vadd.f32 %v2083_v42, %v2082_v28  ;;  %v2109_v54 = vrot.slane %v2108_v45, 4  ;;  %v2097_v57 = vrot.slane %v2096_v26, 2  ;;  %v2115_v58 = vadd.f32 %v579_v41, %v578_v40  ;;  %v588_v41 = vld [vmem:[#allocation6 + $0xd20] sm:$0xff]  ;;  %v589_v42 = vld [vmem:[#allocation6 + $0xd28] sm:$0xff] }
 0x211   :  { %v2072_v39 = vadd.f32 %v2071_v47, %v2070_v34  ;;  %v2078_v56 = vrot.slane %v2077_v48, 1  ;;  %v2091_v63 = vadd.f32 %v2090_v52, %v2089_v43  ;;  %v2104_v0 = vrot.slane %v2103_v53, 2 }
 0x212   :  { %v2085_v62 = vrot.slane %v2084_v51, 1  ;;  %v2110_v1 = vadd.f32 %v2109_v54, %v2108_v45  ;;  %v2098_v31 = vadd.f32 %v2097_v57, %v2096_v26  ;;  %v2116_v6 = vrot.slane %v2115_v58, 4 }
 0x213   :  { %v2079_v3 = vadd.f32 %v2078_v56, %v2077_v48  ;;  %v2908_v4 = vsel %vm2738_vm5, %v2072_v39, %v2907_v49  ;;  %v2092_v11 = vrot.slane %v2091_v63, 1  ;;  %v2105_v12 = vadd.f32 %v2104_v0, %v2103_v53  ;;  %v590_v48 = vld [vmem:[#allocation6 + $0xd30] sm:$0xff]  ;;  %v591_v49 = vld [vmem:[#allocation6 + $0xd38] sm:$0xff] }
 0x214   :  { %v2086_v10 = vadd.f32 %v2085_v62, %v2084_v51  ;;  %v2111_v13 = vrot.slane %v2110_v1, 2  ;;  %v2099_v16 = vrot.slane %v2098_v31, 1  ;;  %v2117_v17 = vadd.f32 %v2116_v6, %v2115_v58  ;;  %v592_v58 = vld [vmem:[#allocation6 + $0xd40] sm:$0xff] }
 0x215   :  { %v2909_v15 = vsel %vm2740_vm6, %v2079_v3, %v2908_v4  ;;  %v2122_v18 = vadd.f32 %v581_v61, %v580_v60  ;;  %v2093_v21 = vadd.f32 %v2092_v11, %v2091_v63  ;;  %v2106_v22 = vrot.slane %v2105_v12, 1  ;;  %v593_v60 = vld [vmem:[#allocation6 + $0xd48] sm:$0xff] }
 0x216   :  { %v3146_v20 = vadd.f32 %v3114_v5, %v2909_v15  ;;  %v2112_v23 = vadd.f32 %v2111_v13, %v2110_v1  ;;  %v2100_v27 = vadd.f32 %v2099_v16, %v2098_v31  ;;  %v2118_v25 = vrot.slane %v2117_v17, 2 }
 0x217   :  { %v2123_v38 = vrot.slane %v2122_v18, 4  ;;  %v2129_v28 = vadd.f32 %v583_v9, %v582_v8  ;;  %v2107_v35 = vadd.f32 %v2106_v22, %v2105_v12  ;;  %v2910_v40 = vsel %vm2728_vm0, %v2093_v21, %v2086_v10  ;;  %v594_v8 = vld [vmem:[#allocation6 + $0xd50] sm:$0xff]  ;;  %v595_v9 = vld [vmem:[#allocation6 + $0xd58] sm:$0xff] }
 0x218   :  { %v3178_v34 = vmul.f32 0.05882353, %v3146_v20  ;;  %v2113_v36 = vrot.slane %v2112_v23, 1  ;;  %v2119_v43 = vadd.f32 %v2118_v25, %v2117_v17  ;;  %v2911_v47 = vsel %vm2730_vm1, %v2100_v27, %v2910_v40 }
 0x219   :  { %v2124_v44 = vadd.f32 %v2123_v38, %v2122_v18  ;;  %v2130_v45 = vrot.slane %v2129_v28, 4  ;;  %v2912_v51 = vsel %vm2732_vm2, %v2107_v35, %v2911_v47  ;;  %v2136_v52 = vadd.f32 %v585_v29, %v584_v24  ;;  %v597_v29 = vld [vmem:[#allocation6 + $0xd68] sm:$0xff] }
 0x21a   :  { %3857 = vmatprep.mubr.f32.mxu1 %v3178_v34  ;;  %v2114_v26 = vadd.f32 %v2113_v36, %v2112_v23  ;;  %v2143_v53 = vadd.f32 %v587_v33, %v586_v30  ;;  %v4460_v54 = vpop.f32.mrb[10].mxu0  ;;  %v2120_v39 = vrot.slane %v2119_v43, 1  ;;  %v2150_v61 = vadd.f32 %v589_v42, %v588_v41  ;;  %v3115_v41 = vld [vmem:[#allocation3 + $0xc8] sm:$0xff] }
 0x21b   :  { %v2125_v56 = vrot.slane %v2124_v44, 2  ;;  %v2131_v57 = vadd.f32 %v2130_v45, %v2129_v28  ;;  %v4462_v62 = vpop.f32.mrb[11].mxu0  ;;  %v2137_v0 = vrot.slane %v2136_v52, 4  ;;  %v2157_v3 = vadd.f32 %v591_v49, %v590_v48  ;;  %v596_v28 = vld [vmem:[#allocation6 + $0xd60] sm:$0xff] }
 0x21c   :  { %v2913_v63 = vsel %vm2734_vm3, %v2114_v26, %v2912_v51  ;;  %v2144_v1 = vrot.slane %v2143_v53, 4  ;;  %v2121_v4 = vadd.f32 %v2120_v39, %v2119_v43  ;;  %v2151_v6 = vrot.slane %v2150_v61, 4  ;;  %v598_v26 = vld [vmem:[#allocation6 + $0xd70] sm:$0xff]  ;;  %v599_v51 = vld [vmem:[#allocation6 + $0xd78] sm:$0xff] }
 0x21d   :  { %v2126_v5 = vadd.f32 %v2125_v56, %v2124_v44  ;;  %v2132_v31 = vrot.slane %v2131_v57, 2  ;;  %v2138_v10 = vadd.f32 %v2137_v0, %v2136_v52  ;;  %v2158_v12 = vrot.slane %v2157_v3, 4 }
 0x21e   :  { %v2145_v11 = vadd.f32 %v2144_v1, %v2143_v53  ;;  %v2164_v13 = vadd.f32 %v593_v60, %v592_v58  ;;  %v2914_v17 = vsel %vm2736_vm4, %v2121_v4, %v2913_v63  ;;  %v2152_v18 = vadd.f32 %v2151_v6, %v2150_v61  ;;  %v600_v61 = vld [vmem:[#allocation6 + $0xd80] sm:$0xff]  ;;  %v601_v4 = vld [vmem:[#allocation6 + $0xd88] sm:$0xff] }
 0x21f   :  { %v2127_v15 = vrot.slane %v2126_v5, 1  ;;  %v2133_v16 = vadd.f32 %v2132_v31, %v2131_v57  ;;  %v2139_v20 = vrot.slane %v2138_v10, 2  ;;  %v2159_v22 = vadd.f32 %v2158_v12, %v2157_v3  ;;  %v603_v31 = vld [vmem:[#allocation6 + $0xd98] sm:$0xff]  ;;  %v605_v12 = vld [vmem:[#allocation6 + $0xda8] sm:$0xff] }
 0x220   :  { %v2146_v21 = vrot.slane %v2145_v11, 2  ;;  %v2165_v23 = vrot.slane %v2164_v13, 4  ;;  %v2153_v25 = vrot.slane %v2152_v18, 2  ;;  %v2171_v38 = vadd.f32 %v595_v9, %v594_v8 }
 0x221   :  { %v2128_v24 = vadd.f32 %v2127_v15, %v2126_v5  ;;  %v2134_v27 = vrot.slane %v2133_v16, 1  ;;  %v2140_v30 = vadd.f32 %v2139_v20, %v2138_v10  ;;  %v2160_v34 = vrot.slane %v2159_v22, 2  ;;  %v602_v5 = vld [vmem:[#allocation6 + $0xd90] sm:$0xff]  ;;  %v607_v20 = vld [vmem:[#allocation6 + $0xdb8] sm:$0xff] }
 0x222   :  { %v2147_v33 = vadd.f32 %v2146_v21, %v2145_v11  ;;  %v2166_v35 = vadd.f32 %v2165_v23, %v2164_v13  ;;  %v2154_v42 = vadd.f32 %v2153_v25, %v2152_v18  ;;  %v2172_v43 = vrot.slane %v2171_v38, 4  ;;  %v604_v11 = vld [vmem:[#allocation6 + $0xda0] sm:$0xff]  ;;  %v606_v18 = vld [vmem:[#allocation6 + $0xdb0] sm:$0xff] }
 0x223   :  { %v2135_v36 = vadd.f32 %v2134_v27, %v2133_v16  ;;  %v2915_v40 = vsel %vm2738_vm5, %v2128_v24, %v2914_v17  ;;  %v2141_v44 = vrot.slane %v2140_v30, 1  ;;  %v2161_v47 = vadd.f32 %v2160_v34, %v2159_v22 }
 0x224   :  { %v2148_v45 = vrot.slane %v2147_v33, 1  ;;  %v2167_v48 = vrot.slane %v2166_v35, 2  ;;  %v2155_v52 = vrot.slane %v2154_v42, 1  ;;  %v2173_v53 = vadd.f32 %v2172_v43, %v2171_v38 }
 0x225   :  { %v2916_v49 = vsel %vm2740_vm6, %v2135_v36, %v2915_v40  ;;  %v2178_v39 = vadd.f32 %v597_v29, %v596_v28  ;;  %v2142_v57 = vadd.f32 %v2141_v44, %v2140_v30  ;;  %v2162_v60 = vrot.slane %v2161_v47, 1  ;;  %v608_v30 = vld [vmem:[#allocation6 + $0xdc0] sm:$0xff] }
 0x226   :  { %v3147_v56 = vadd.f32 %v3115_v41, %v2916_v49  ;;  %v2149_v58 = vadd.f32 %v2148_v45, %v2147_v33  ;;  %v2156_v63 = vadd.f32 %v2155_v52, %v2154_v42  ;;  %v2168_v0 = vadd.f32 %v2167_v48, %v2166_v35  ;;  %v609_v33 = vld [vmem:[#allocation6 + $0xdc8] sm:$0xff]  ;;  %v610_v45 = vld [vmem:[#allocation6 + $0xdd0] sm:$0xff] }
 0x227   :  { %v2174_v1 = vrot.slane %v2173_v53, 2  ;;  %v2179_v3 = vrot.slane %v2178_v39, 4  ;;  %v2163_v8 = vadd.f32 %v2162_v60, %v2161_v47  ;;  %v2185_v9 = vadd.f32 %v599_v51, %v598_v26  ;;  %v611_v47 = vld [vmem:[#allocation6 + $0xdd8] sm:$0xff] }
 0x228   :  { %v3179_v6 = vmul.f32 0.05882353, %v3147_v56  ;;  %v2917_v10 = vsel %vm2728_vm0, %v2149_v58, %v2142_v57  ;;  %v2169_v13 = vrot.slane %v2168_v0, 1  ;;  %v2192_v23 = vadd.f32 %v601_v4, %v600_v61  ;;  %v612_v4 = vld [vmem:[#allocation6 + $0xde0] sm:$0xff] }
 0x229   :  { %v2175_v15 = vadd.f32 %v2174_v1, %v2173_v53  ;;  %v2180_v16 = vadd.f32 %v2179_v3, %v2178_v39  ;;  %v2918_v17 = vsel %vm2730_vm1, %v2156_v63, %v2917_v10  ;;  %v2186_v21 = vrot.slane %v2185_v9, 4 }
 0x22a   :  { %3858 = vmatmul.mubr.f32.gmra.mrb[8].mxu1 %v3179_v6  ;;  %v2919_v22 = vsel %vm2732_vm2, %v2163_v8, %v2918_v17  ;;  %v2199_v24 = vadd.f32 %v603_v31, %v602_v5  ;;  %v2170_v27 = vadd.f32 %v2169_v13, %v2168_v0  ;;  %v2206_v28 = vadd.f32 %v605_v12, %v604_v11  ;;  %v613_v5 = vld [vmem:[#allocation6 + $0xde8] sm:$0xff] }
 0x22b   :  { %v2176_v25 = vrot.slane %v2175_v15, 1  ;;  %v2181_v38 = vrot.slane %v2180_v16, 2  ;;  %v2187_v29 = vadd.f32 %v2186_v21, %v2185_v9  ;;  %v2193_v34 = vrot.slane %v2192_v23, 4  ;;  %v615_v21 = vld [vmem:[#allocation6 + $0xdf8] sm:$0xff] }
 0x22c   :  { %v2200_v35 = vrot.slane %v2199_v24, 4  ;;  %v2213_v36 = vadd.f32 %v607_v20, %v606_v18  ;;  %v2920_v42 = vsel %vm2734_vm3, %v2170_v27, %v2919_v22  ;;  %v2207_v43 = vrot.slane %v2206_v28, 4  ;;  %v614_v20 = vld [vmem:[#allocation6 + $0xdf0] sm:$0xff] }
 0x22d   :  { %v2177_v40 = vadd.f32 %v2176_v25, %v2175_v15  ;;  %v2182_v41 = vadd.f32 %v2181_v38, %v2180_v16  ;;  %v2188_v44 = vrot.slane %v2187_v29, 2  ;;  %v2194_v48 = vadd.f32 %v2193_v34, %v2192_v23  ;;  %v3116_v15 = vld [vmem:[#allocation3 + $0xd0] sm:$0xff] }
 0x22e   :  { %v2201_v49 = vadd.f32 %v2200_v35, %v2199_v24  ;;  %v2214_v26 = vrot.slane %v2213_v36, 4  ;;  %v2208_v53 = vadd.f32 %v2207_v43, %v2206_v28  ;;  %v2220_v39 = vadd.f32 %v609_v33, %v608_v30 }
 0x22f   :  { %v2183_v51 = vrot.slane %v2182_v41, 1  ;;  %v2921_v52 = vsel %vm2736_vm4, %v2177_v40, %v2920_v42  ;;  %v2189_v56 = vadd.f32 %v2188_v44, %v2187_v29  ;;  %v2195_v57 = vrot.slane %v2194_v48, 2  ;;  %v617_v40 = vld [vmem:[#allocation6 + $0xe08] sm:$0xff] }
 0x230   :  { %v2202_v58 = vrot.slane %v2201_v49, 2  ;;  %v2215_v60 = vadd.f32 %v2214_v26, %v2213_v36  ;;  %v2209_v63 = vrot.slane %v2208_v53, 2  ;;  %v2221_v0 = vrot.slane %v2220_v39, 4  ;;  %v616_v36 = vld [vmem:[#allocation6 + $0xe00] sm:$0xff] }
 0x231   :  { %v2184_v61 = vadd.f32 %v2183_v51, %v2182_v41  ;;  %v2227_v1 = vadd.f32 %v611_v47, %v610_v45  ;;  %v2190_v3 = vrot.slane %v2189_v56, 1  ;;  %v2196_v31 = vadd.f32 %v2195_v57, %v2194_v48  ;;  %v618_v41 = vld [vmem:[#allocation6 + $0xe10] sm:$0xff]  ;;  %v619_v47 = vld [vmem:[#allocation6 + $0xe18] sm:$0xff]  ;;  %v620_v48 = vld [vmem:[#allocation6 + $0xe20] sm:$0xff] }
 0x232   :  { %v2203_v6 = vadd.f32 %v2202_v58, %v2201_v49  ;;  %v2216_v8 = vrot.slane %v2215_v60, 2  ;;  %v2210_v10 = vadd.f32 %v2209_v63, %v2208_v53  ;;  %v2222_v11 = vadd.f32 %v2221_v0, %v2220_v39  ;;  %v621_v49 = vld [vmem:[#allocation6 + $0xe28] sm:$0xff]  ;;  %v622_v39 = vld [vmem:[#allocation6 + $0xe30] sm:$0xff] }
 0x233   :  { %v2922_v9 = vsel %vm2738_vm5, %v2184_v61, %v2921_v52  ;;  %v2228_v12 = vrot.slane %v2227_v1, 4  ;;  %v2191_v13 = vadd.f32 %v2190_v3, %v2189_v56  ;;  %v2197_v16 = vrot.slane %v2196_v31, 1  ;;  %v623_v56 = vld [vmem:[#allocation6 + $0xe38] sm:$0xff] }
 0x234   :  { %v2204_v17 = vrot.slane %v2203_v6, 1  ;;  %v2217_v18 = vadd.f32 %v2216_v8, %v2215_v60  ;;  %v2211_v22 = vrot.slane %v2210_v10, 1  ;;  %v2223_v23 = vrot.slane %v2222_v11, 2  ;;  %v624_v8 = vld [vmem:[#allocation6 + $0xe40] sm:$0xff] }
 0x235   :  { %v2229_v24 = vadd.f32 %v2228_v12, %v2227_v1  ;;  %v2234_v27 = vadd.f32 %v613_v5, %v612_v4  ;;  %v2923_v25 = vsel %vm2740_vm6, %v2191_v13, %v2922_v9  ;;  %v2198_v38 = vadd.f32 %v2197_v16, %v2196_v31  ;;  %v625_v9 = vld [vmem:[#allocation6 + $0xe48] sm:$0xff] }
 0x236   :  { %v2205_v28 = vadd.f32 %v2204_v17, %v2203_v6  ;;  %v2218_v29 = vrot.slane %v2217_v18, 1  ;;  %v3148_v30 = vadd.f32 %v3116_v15, %v2923_v25  ;;  %v2212_v33 = vadd.f32 %v2211_v22, %v2210_v10 }
 0x237   :  { %v2224_v34 = vadd.f32 %v2223_v23, %v2222_v11  ;;  %v2230_v35 = vrot.slane %v2229_v24, 2  ;;  %v2235_v43 = vrot.slane %v2234_v27, 4  ;;  %v2241_v44 = vadd.f32 %v615_v21, %v614_v20  ;;  %v626_v20 = vld [vmem:[#allocation6 + $0xe50] sm:$0xff]  ;;  %v627_v21 = vld [vmem:[#allocation6 + $0xe58] sm:$0xff] }
 0x238   :  { %v2219_v42 = vadd.f32 %v2218_v29, %v2217_v18  ;;  %v2924_v45 = vsel %vm2728_vm0, %v2205_v28, %v2198_v38  ;;  %v3180_v26 = vmul.f32 0.05882353, %v3148_v30  ;;  %v2248_v61 = vadd.f32 %v617_v40, %v616_v36 }
 0x239   :  { %v2225_v51 = vrot.slane %v2224_v34, 1  ;;  %v2231_v52 = vadd.f32 %v2230_v35, %v2229_v24  ;;  %v2925_v53 = vsel %vm2730_vm1, %v2212_v33, %v2924_v45  ;;  %v2236_v57 = vadd.f32 %v2235_v43, %v2234_v27  ;;  %v4478_v63 = vpop.f32.mrb[12].mxu0  ;;  %v628_v45 = vld [vmem:[#allocation6 + $0xe60] sm:$0xff] }
 0x23a   :  { %v2242_v58 = vrot.slane %v2241_v44, 4  ;;  %v2926_v60 = vsel %vm2732_vm2, %v2219_v42, %v2925_v53  ;;  %3860 = vmatprep.mubr.f32.mxu1 %v3180_v26  ;;  %v2255_v3 = vadd.f32 %v619_v47, %v618_v41  ;;  %v2262_v4 = vadd.f32 %v621_v49, %v620_v48  ;;  %v4480_v5 = vpop.f32.mrb[13].mxu0  ;;  %v629_v47 = vld [vmem:[#allocation6 + $0xe68] sm:$0xff] }
 0x23b   :  { %v2226_v0 = vadd.f32 %v2225_v51, %v2224_v34  ;;  %v2232_v1 = vrot.slane %v2231_v52, 1  ;;  %v2237_v31 = vrot.slane %v2236_v57, 2  ;;  %v2249_v10 = vrot.slane %v2248_v61, 4 }
 0x23c   :  { %v2243_v6 = vadd.f32 %v2242_v58, %v2241_v44  ;;  %v2269_v11 = vadd.f32 %v623_v56, %v622_v39  ;;  %v2256_v15 = vrot.slane %v2255_v3, 4  ;;  %v2263_v16 = vrot.slane %v2262_v4, 4  ;;  %v3117_v39 = vld [vmem:[#allocation3 + $0xd8] sm:$0xff]  ;;  %v630_v58 = vld [vmem:[#allocation6 + $0xe70] sm:$0xff] }
 0x23d   :  { %v2233_v12 = vadd.f32 %v2232_v1, %v2231_v52  ;;  %v2927_v13 = vsel %vm2734_vm3, %v2226_v0, %v2926_v60  ;;  %v2238_v17 = vadd.f32 %v2237_v31, %v2236_v57  ;;  %v2250_v22 = vadd.f32 %v2249_v10, %v2248_v61  ;;  %v631_v60 = vld [vmem:[#allocation6 + $0xe78] sm:$0xff]  ;;  %v633_v10 = vld [vmem:[#allocation6 + $0xe88] sm:$0xff] }
 0x23e   :  { %v2244_v18 = vrot.slane %v2243_v6, 2  ;;  %v2270_v23 = vrot.slane %v2269_v11, 4  ;;  %v2257_v27 = vadd.f32 %v2256_v15, %v2255_v3  ;;  %v2264_v25 = vadd.f32 %v2263_v16, %v2262_v4 }
 0x23f   :  { %v2928_v24 = vsel %vm2736_vm4, %v2233_v12, %v2927_v13  ;;  %v2276_v38 = vadd.f32 %v625_v9, %v624_v8  ;;  %v2239_v28 = vrot.slane %v2238_v17, 1  ;;  %v2251_v30 = vrot.slane %v2250_v22, 2  ;;  %v632_v9 = vld [vmem:[#allocation6 + $0xe80] sm:$0xff] }
 0x240   :  { %v2245_v29 = vadd.f32 %v2244_v18, %v2243_v6  ;;  %v2271_v33 = vadd.f32 %v2270_v23, %v2269_v11  ;;  %v2258_v34 = vrot.slane %v2257_v27, 2  ;;  %v2265_v35 = vrot.slane %v2264_v25, 2 }
 0x241   :  { %v2277_v36 = vrot.slane %v2276_v38, 4  ;;  %v2283_v40 = vadd.f32 %v627_v21, %v626_v20  ;;  %v2240_v41 = vadd.f32 %v2239_v28, %v2238_v17  ;;  %v2252_v43 = vadd.f32 %v2251_v30, %v2250_v22  ;;  %v634_v21 = vld [vmem:[#allocation6 + $0xe90] sm:$0xff]  ;;  %v635_v22 = vld [vmem:[#allocation6 + $0xe98] sm:$0xff] }
 0x242   :  { %v2246_v42 = vrot.slane %v2245_v29, 1  ;;  %v2272_v44 = vrot.slane %v2271_v33, 2  ;;  %v2259_v48 = vadd.f32 %v2258_v34, %v2257_v27  ;;  %v2266_v49 = vadd.f32 %v2265_v35, %v2264_v25  ;;  %v636_v25 = vld [vmem:[#allocation6 + $0xea0] sm:$0xff]  ;;  %v638_v35 = vld [vmem:[#allocation6 + $0xeb0] sm:$0xff] }
 0x243   :  { %v2278_v26 = vadd.f32 %v2277_v36, %v2276_v38  ;;  %v2284_v51 = vrot.slane %v2283_v40, 4  ;;  %v2929_v53 = vsel %vm2738_vm5, %v2240_v41, %v2928_v24  ;;  %v2253_v56 = vrot.slane %v2252_v43, 1  ;;  %v637_v38 = vld [vmem:[#allocation6 + $0xea8] sm:$0xff]  ;;  %v639_v36 = vld [vmem:[#allocation6 + $0xeb8] sm:$0xff] }
 0x244   :  { %v2247_v52 = vadd.f32 %v2246_v42, %v2245_v29  ;;  %v2273_v57 = vadd.f32 %v2272_v44, %v2271_v33  ;;  %v2260_v61 = vrot.slane %v2259_v48, 1  ;;  %v2267_v0 = vrot.slane %v2266_v49, 1 }
 0x245   :  { %v2279_v1 = vrot.slane %v2278_v26, 2  ;;  %v2285_v3 = vadd.f32 %v2284_v51, %v2283_v40  ;;  %v2254_v31 = vadd.f32 %v2253_v56, %v2252_v43  ;;  %v2290_v8 = vadd.f32 %v629_v47, %v628_v45 }
 0x246   :  { %v2930_v4 = vsel %vm2740_vm6, %v2247_v52, %v2929_v53  ;;  %v2274_v6 = vrot.slane %v2273_v57, 1  ;;  %v2261_v12 = vadd.f32 %v2260_v61, %v2259_v48  ;;  %v2268_v13 = vadd.f32 %v2267_v0, %v2266_v49  ;;  %v640_v48 = vld [vmem:[#allocation6 + $0xec0] sm:$0xff]  ;;  %v641_v49 = vld [vmem:[#allocation6 + $0xec8] sm:$0xff]  ;;  %v642_v61 = vld [vmem:[#allocation6 + $0xed0] sm:$0xff] }
 0x247   :  { %v3149_v11 = vadd.f32 %v3117_v39, %v2930_v4  ;;  %v2280_v15 = vadd.f32 %v2279_v1, %v2278_v26  ;;  %v2286_v17 = vrot.slane %v2285_v3, 2  ;;  %v2291_v18 = vrot.slane %v2290_v8, 4  ;;  %v643_v0 = vld [vmem:[#allocation6 + $0xed8] sm:$0xff] }
 0x248   :  { %v2275_v16 = vadd.f32 %v2274_v6, %v2273_v57  ;;  %v2297_v20 = vadd.f32 %v631_v60, %v630_v58  ;;  %v2931_v27 = vsel %vm2728_vm0, %v2261_v12, %v2254_v31  ;;  %v2304_v28 = vadd.f32 %v633_v10, %v632_v9 }
 0x249   :  { %v3181_v23 = vmul.f32 0.05882353, %v3149_v11  ;;  %v2281_v24 = vrot.slane %v2280_v15, 1  ;;  %v2287_v29 = vadd.f32 %v2286_v17, %v2285_v3  ;;  %v2292_v30 = vadd.f32 %v2291_v18, %v2290_v8 }
 0x24a   :  { %v2298_v33 = vrot.slane %v2297_v20, 4  ;;  %v2932_v34 = vsel %vm2730_vm1, %v2268_v13, %v2931_v27  ;;  %v2305_v42 = vrot.slane %v2304_v28, 4  ;;  %v2311_v43 = vadd.f32 %v635_v22, %v634_v21  ;;  %v644_v21 = vld [vmem:[#allocation6 + $0xee0] sm:$0xff]  ;;  %v645_v22 = vld [vmem:[#allocation6 + $0xee8] sm:$0xff] }
 0x24b   :  { %3861 = vmatmul.mubr.f32.gmra.mrb[10].mxu1 %v3181_v23  ;;  %v2282_v40 = vadd.f32 %v2281_v24, %v2280_v15  ;;  %v2933_v41 = vsel %vm2732_vm2, %v2275_v16, %v2932_v34  ;;  %v2288_v44 = vrot.slane %v2287_v29, 1  ;;  %v2293_v45 = vrot.slane %v2292_v30, 2  ;;  %v646_v34 = vld [vmem:[#allocation6 + $0xef0] sm:$0xff] }
 0x24c   :  { %v2299_v47 = vadd.f32 %v2298_v33, %v2297_v20  ;;  %v2318_v26 = vadd.f32 %v637_v38, %v636_v25  ;;  %v2306_v52 = vadd.f32 %v2305_v42, %v2304_v28  ;;  %v2312_v53 = vrot.slane %v2311_v43, 4 }
 0x24d   :  { %v2934_v51 = vsel %vm2734_vm3, %v2282_v40, %v2933_v41  ;;  %v2325_v39 = vadd.f32 %v639_v36, %v638_v35  ;;  %v2289_v56 = vadd.f32 %v2288_v44, %v2287_v29  ;;  %v2294_v57 = vadd.f32 %v2293_v45, %v2292_v30  ;;  %v3118_v29 = vld [vmem:[#allocation3 + $0xe0] sm:$0xff]  ;;  %v647_v35 = vld [vmem:[#allocation6 + $0xef8] sm:$0xff] }
 0x24e   :  { %v2300_v58 = vrot.slane %v2299_v47, 2  ;;  %v2319_v60 = vrot.slane %v2318_v26, 4  ;;  %v2307_v1 = vrot.slane %v2306_v52, 2  ;;  %v2313_v3 = vadd.f32 %v2312_v53, %v2311_v43 }
 0x24f   :  { %v2326_v4 = vrot.slane %v2325_v39, 4  ;;  %v2332_v31 = vadd.f32 %v641_v49, %v640_v48  ;;  %v2295_v6 = vrot.slane %v2294_v57, 1  ;;  %v2935_v9 = vsel %vm2736_vm4, %v2289_v56, %v2934_v51 }
 0x250   :  { %v2301_v8 = vadd.f32 %v2300_v58, %v2299_v47  ;;  %v2320_v10 = vadd.f32 %v2319_v60, %v2318_v26  ;;  %v2308_v11 = vadd.f32 %v2307_v1, %v2306_v52  ;;  %v2314_v12 = vrot.slane %v2313_v3, 2  ;;  %v648_v52 = vld [vmem:[#allocation6 + $0xf00] sm:$0xff]  ;;  %v649_v58 = vld [vmem:[#allocation6 + $0xf08] sm:$0xff]  ;;  %v650_v60 = vld [vmem:[#allocation6 + $0xf10] sm:$0xff] }
 0x251   :  { %v2327_v13 = vadd.f32 %v2326_v4, %v2325_v39  ;;  %v2333_v15 = vrot.slane %v2332_v31, 4  ;;  %v2296_v16 = vadd.f32 %v2295_v6, %v2294_v57  ;;  %v2339_v20 = vadd.f32 %v643_v0, %v642_v61  ;;  %v651_v61 = vld [vmem:[#allocation6 + $0xf18] sm:$0xff]  ;;  %v653_v6 = vld [vmem:[#allocation6 + $0xf28] sm:$0xff] }
 0x252   :  { %v2302_v17 = vrot.slane %v2301_v8, 1  ;;  %v2321_v18 = vrot.slane %v2320_v10, 2  ;;  %v2309_v23 = vrot.slane %v2308_v11, 1  ;;  %v2315_v24 = vadd.f32 %v2314_v12, %v2313_v3  ;;  %v654_v12 = vld [vmem:[#allocation6 + $0xf30] sm:$0xff] }
 0x253   :  { %v2328_v27 = vrot.slane %v2327_v13, 2  ;;  %v2334_v25 = vadd.f32 %v2333_v15, %v2332_v31  ;;  %v2936_v28 = vsel %vm2738_vm5, %v2296_v16, %v2935_v9  ;;  %v2340_v33 = vrot.slane %v2339_v20, 4  ;;  %v652_v31 = vld [vmem:[#allocation6 + $0xf20] sm:$0xff] }
 0x254   :  { %v2303_v38 = vadd.f32 %v2302_v17, %v2301_v8  ;;  %v2322_v30 = vadd.f32 %v2321_v18, %v2320_v10  ;;  %v2310_v36 = vadd.f32 %v2309_v23, %v2308_v11  ;;  %v2316_v40 = vrot.slane %v2315_v24, 1 }
 0x255   :  { %v2329_v41 = vadd.f32 %v2328_v27, %v2327_v13  ;;  %v2335_v42 = vrot.slane %v2334_v25, 2  ;;  %v2341_v45 = vadd.f32 %v2340_v33, %v2339_v20  ;;  %v2346_v47 = vadd.f32 %v645_v22, %v644_v21  ;;  %v655_v13 = vld [vmem:[#allocation6 + $0xf38] sm:$0xff]  ;;  %v657_v27 = vld [vmem:[#allocation6 + $0xf48] sm:$0xff] }
 0x256   :  { %v2937_v43 = vsel %vm2740_vm6, %v2303_v38, %v2936_v28  ;;  %v2323_v44 = vrot.slane %v2322_v30, 1  ;;  %v2317_v49 = vadd.f32 %v2316_v40, %v2315_v24  ;;  %v2353_v57 = vadd.f32 %v647_v35, %v646_v34  ;;  %v656_v24 = vld [vmem:[#allocation6 + $0xf40] sm:$0xff] }
 0x257   :  { %v3150_v48 = vadd.f32 %v3118_v29, %v2937_v43  ;;  %v2330_v26 = vrot.slane %v2329_v41, 1  ;;  %v2336_v51 = vadd.f32 %v2335_v42, %v2334_v25  ;;  %v2342_v39 = vrot.slane %v2341_v45, 2  ;;  %v659_v42 = vld [vmem:[#allocation6 + $0xf58] sm:$0xff] }
 0x258   :  { %v2324_v53 = vadd.f32 %v2323_v44, %v2322_v30  ;;  %v2347_v56 = vrot.slane %v2346_v47, 4  ;;  %v2938_v4 = vsel %vm2728_vm0, %v2317_v49, %v2310_v36  ;;  %v2354_v10 = vrot.slane %v2353_v57, 4 }
 0x259   :  { %v3182_v0 = vmul.f32 0.05882353, %v3150_v48  ;;  %v2331_v1 = vadd.f32 %v2330_v26, %v2329_v41  ;;  %v2337_v3 = vrot.slane %v2336_v51, 1  ;;  %v2343_v8 = vadd.f32 %v2342_v39, %v2341_v45  ;;  %v658_v41 = vld [vmem:[#allocation6 + $0xf50] sm:$0xff] }
 0x25a   :  { %v2348_v9 = vadd.f32 %v2347_v56, %v2346_v47  ;;  %v2939_v11 = vsel %vm2730_vm1, %v2324_v53, %v2938_v4  ;;  %v2360_v17 = vadd.f32 %v649_v58, %v648_v52  ;;  %v2367_v18 = vadd.f32 %v651_v61, %v650_v60  ;;  %v4496_v20 = vpop.f32.mrb[14].mxu0 }
 0x25b   :  { %3863 = vmatprep.mubr.f32.mxu1 %v3182_v0  ;;  %v2338_v15 = vadd.f32 %v2337_v3, %v2336_v51  ;;  %v2940_v16 = vsel %vm2732_vm2, %v2331_v1, %v2939_v11  ;;  %v2344_v21 = vrot.slane %v2343_v8, 1  ;;  %v2355_v23 = vadd.f32 %v2354_v10, %v2353_v57  ;;  %v4498_v38 = vpop.f32.mrb[15].mxu0  ;;  %v660_v0 = vld [vmem:[#allocation6 + $0xf60] sm:$0xff]  ;;  %v661_v1 = vld [vmem:[#allocation6 + $0xf68] sm:$0xff] }
 0x25c   :  { %v2349_v22 = vrot.slane %v2348_v9, 2  ;;  %v2374_v25 = vadd.f32 %v653_v6, %v652_v31  ;;  %v2361_v29 = vrot.slane %v2360_v17, 4  ;;  %v2368_v30 = vrot.slane %v2367_v18, 4  ;;  %v3119_v10 = vld [vmem:[#allocation3 + $0xe8] sm:$0xff] }
 0x25d   :  { %v2941_v28 = vsel %vm2734_vm3, %v2338_v15, %v2940_v16  ;;  %v2381_v33 = vadd.f32 %v655_v13, %v654_v12  ;;  %v2345_v34 = vadd.f32 %v2344_v21, %v2343_v8  ;;  %v2356_v36 = vrot.slane %v2355_v23, 2  ;;  %v662_v21 = vld [vmem:[#allocation6 + $0xf70] sm:$0xff] }
 0x25e   :  { %v2350_v35 = vadd.f32 %v2349_v22, %v2348_v9  ;;  %v2375_v40 = vrot.slane %v2374_v25, 4  ;;  %v2362_v43 = vadd.f32 %v2361_v29, %v2360_v17  ;;  %v2369_v44 = vadd.f32 %v2368_v30, %v2367_v18  ;;  %v663_v22 = vld [vmem:[#allocation6 + $0xf78] sm:$0xff] }
 0x25f   :  { %v2382_v45 = vrot.slane %v2381_v33, 4  ;;  %v2388_v47 = vadd.f32 %v657_v27, %v656_v24  ;;  %v2357_v49 = vadd.f32 %v2356_v36, %v2355_v23  ;;  %v2942_v26 = vsel %vm2736_vm4, %v2345_v34, %v2941_v28 }
 0x260   :  { %v2351_v48 = vrot.slane %v2350_v35, 1  ;;  %v2376_v51 = vadd.f32 %v2375_v40, %v2374_v25  ;;  %v2363_v52 = vrot.slane %v2362_v43, 2  ;;  %v2370_v53 = vrot.slane %v2369_v44, 2 }
 0x261   :  { %v2383_v39 = vadd.f32 %v2382_v45, %v2381_v33  ;;  %v2389_v56 = vrot.slane %v2388_v47, 4  ;;  %v2358_v58 = vrot.slane %v2357_v49, 1  ;;  %v2395_v61 = vadd.f32 %v659_v42, %v658_v41  ;;  %v664_v33 = vld [vmem:[#allocation6 + $0xf80] sm:$0xff]  ;;  %v665_v41 = vld [vmem:[#allocation6 + $0xf88] sm:$0xff]  ;;  %v666_v42 = vld [vmem:[#allocation6 + $0xf90] sm:$0xff] }
 0x262   :  { %v2352_v57 = vadd.f32 %v2351_v48, %v2350_v35  ;;  %v2377_v60 = vrot.slane %v2376_v51, 2  ;;  %v2364_v3 = vadd.f32 %v2363_v52, %v2362_v43  ;;  %v2371_v4 = vadd.f32 %v2370_v53, %v2369_v44  ;;  %v667_v43 = vld [vmem:[#allocation6 + $0xf98] sm:$0xff] }
 0x263   :  { %v2384_v31 = vrot.slane %v2383_v39, 2  ;;  %v2390_v6 = vadd.f32 %v2389_v56, %v2388_v47  ;;  %v2359_v8 = vadd.f32 %v2358_v58, %v2357_v49  ;;  %v2396_v12 = vrot.slane %v2395_v61, 4  ;;  %v668_v49 = vld [vmem:[#allocation6 + $0xfa0] sm:$0xff]  ;;  %v670_v56 = vld [vmem:[#allocation6 + $0xfb0] sm:$0xff] }
 0x264   :  { %v2943_v9 = vsel %vm2738_vm5, %v2352_v57, %v2942_v26  ;;  %v2378_v11 = vadd.f32 %v2377_v60, %v2376_v51  ;;  %v2365_v13 = vrot.slane %v2364_v3, 1  ;;  %v2372_v15 = vrot.slane %v2371_v4, 1  ;;  %v669_v26 = vld [vmem:[#allocation6 + $0xfa8] sm:$0xff]  ;;  %v671_v57 = vld [vmem:[#allocation6 + $0xfb8] sm:$0xff] }
 0x265   :  { %v2385_v16 = vadd.f32 %v2384_v31, %v2383_v39  ;;  %v2391_v17 = vrot.slane %v2390_v6, 2  ;;  %v2944_v18 = vsel %vm2740_vm6, %v2359_v8, %v2943_v9  ;;  %v2397_v24 = vadd.f32 %v2396_v12, %v2395_v61  ;;  %v672_v8 = vld [vmem:[#allocation6 + $0xfc0] sm:$0xff]  ;;  %v673_v9 = vld [vmem:[#allocation6 + $0xfc8] sm:$0xff] }
 0x266   :  { %v2379_v23 = vrot.slane %v2378_v11, 1  ;;  %v2402_v27 = vadd.f32 %v661_v1, %v660_v0  ;;  %v3151_v25 = vadd.f32 %v3119_v10, %v2944_v18  ;;  %v2366_v28 = vadd.f32 %v2365_v13, %v2364_v3 }
 0x267   :  { %v2373_v29 = vadd.f32 %v2372_v15, %v2371_v4  ;;  %v2386_v30 = vrot.slane %v2385_v16, 1  ;;  %v2392_v35 = vadd.f32 %v2391_v17, %v2390_v6  ;;  %v2398_v36 = vrot.slane %v2397_v24, 2 }
 0x268   :  { %v2380_v34 = vadd.f32 %v2379_v23, %v2378_v11  ;;  %v2403_v40 = vrot.slane %v2402_v27, 4  ;;  %v3183_v44 = vmul.f32 0.05882353, %v3151_v25  ;;  %v2409_v47 = vadd.f32 %v663_v22, %v662_v21  ;;  %v674_v21 = vld [vmem:[#allocation6 + $0xfd0] sm:$0xff]  ;;  %v675_v22 = vld [vmem:[#allocation6 + $0xfd8] sm:$0xff] }
 0x269   :  { %v2387_v45 = vadd.f32 %v2386_v30, %v2385_v16  ;;  %v2945_v48 = vsel %vm2728_vm0, %v2373_v29, %v2366_v28  ;;  %v2393_v51 = vrot.slane %v2392_v35, 1  ;;  %v2399_v52 = vadd.f32 %v2398_v36, %v2397_v24 }
 0x26a   :  { %v2404_v53 = vadd.f32 %v2403_v40, %v2402_v27  ;;  %v2946_v39 = vsel %vm2730_vm1, %v2380_v34, %v2945_v48  ;;  %3864 = vmatmul.mubr.f32.gmra.mrb[12].mxu1 %v3183_v44  ;;  %v2410_v58 = vrot.slane %v2409_v47, 4  ;;  %v2416_v61 = vadd.f32 %v665_v41, %v664_v33 }
 0x26b   :  { %v2947_v60 = vsel %vm2732_vm2, %v2387_v45, %v2946_v39  ;;  %v2423_v0 = vadd.f32 %v667_v43, %v666_v42  ;;  %v2394_v1 = vadd.f32 %v2393_v51, %v2392_v35  ;;  %v2400_v3 = vrot.slane %v2399_v52, 1  ;;  %v676_v45 = vld [vmem:[#allocation6 + $0xfe0] sm:$0xff] }
 0x26c   :  { %v2405_v4 = vrot.slane %v2404_v53, 2  ;;  %v2430_v31 = vadd.f32 %v669_v26, %v668_v49  ;;  %v2411_v6 = vadd.f32 %v2410_v58, %v2409_v47  ;;  %v2417_v10 = vrot.slane %v2416_v61, 4  ;;  %v677_v47 = vld [vmem:[#allocation6 + $0xfe8] sm:$0xff] }
 0x26d   :  { %v2424_v11 = vrot.slane %v2423_v0, 4  ;;  %v2437_v12 = vadd.f32 %v671_v57, %v670_v56  ;;  %v2401_v13 = vadd.f32 %v2400_v3, %v2399_v52  ;;  %v2948_v16 = vsel %vm2734_vm3, %v2394_v1, %v2947_v60  ;;  %v3120_v57 = vld [vmem:[#allocation3 + $0xf0] sm:$0xff]  ;;  %v679_v1 = vld [vmem:[#allocation6 + $0xff8] sm:$0xff] }
 0x26e   :  { %v2406_v15 = vadd.f32 %v2405_v4, %v2404_v53  ;;  %v2431_v17 = vrot.slane %v2430_v31, 4  ;;  %v2412_v18 = vrot.slane %v2411_v6, 2  ;;  %v2418_v23 = vadd.f32 %v2417_v10, %v2416_v61 }
 0x26f   :  { %v2425_v24 = vadd.f32 %v2424_v11, %v2423_v0  ;;  %v2438_v27 = vrot.slane %v2437_v12, 4  ;;  %v2949_v28 = vsel %vm2736_vm4, %v2401_v13, %v2948_v16  ;;  %v2444_v30 = vadd.f32 %v673_v9, %v672_v8  ;;  %v678_v0 = vld [vmem:[#allocation6 + $0xff0] sm:$0xff] }
 0x270   :  { %v2407_v25 = vrot.slane %v2406_v15, 1  ;;  %v2432_v29 = vadd.f32 %v2431_v17, %v2430_v31  ;;  %v2413_v33 = vadd.f32 %v2412_v18, %v2411_v6  ;;  %v2419_v34 = vrot.slane %v2418_v23, 2 }
 0x271   :  { %v2426_v35 = vrot.slane %v2425_v24, 2  ;;  %v2439_v36 = vadd.f32 %v2438_v27, %v2437_v12  ;;  %v2445_v42 = vrot.slane %v2444_v30, 4  ;;  %v2451_v43 = vadd.f32 %v675_v22, %v674_v21 }
 0x272   :  { %v2408_v40 = vadd.f32 %v2407_v25, %v2406_v15  ;;  %v2433_v41 = vrot.slane %v2432_v29, 2  ;;  %v2414_v44 = vrot.slane %v2413_v33, 1  ;;  %v2420_v48 = vadd.f32 %v2419_v34, %v2418_v23 }
 0x273   :  { %v2427_v49 = vadd.f32 %v2426_v35, %v2425_v24  ;;  %v2440_v26 = vrot.slane %v2439_v36, 2  ;;  %v2446_v53 = vadd.f32 %v2445_v42, %v2444_v30  ;;  %v2452_v39 = vrot.slane %v2451_v43, 4 }
 0x274   :  { %v2950_v51 = vsel %vm2738_vm5, %v2408_v40, %v2949_v28  ;;  %v2434_v52 = vadd.f32 %v2433_v41, %v2432_v29  ;;  %v2415_v56 = vadd.f32 %v2414_v44, %v2413_v33  ;;  %v2421_v58 = vrot.slane %v2420_v48, 1 }
 0x275   :  { %v2428_v60 = vrot.slane %v2427_v49, 1  ;;  %v2441_v61 = vadd.f32 %v2440_v26, %v2439_v36  ;;  %v2447_v4 = vrot.slane %v2446_v53, 2  ;;  %v2453_v31 = vadd.f32 %v2452_v39, %v2451_v43  ;;  %v3121_v39 = vld [vmem:[#allocation3 + $0xf8] sm:$0xff] }
 0x276   :  { %v2435_v3 = vrot.slane %v2434_v52, 1  ;;  %v2458_v6 = vadd.f32 %v677_v47, %v676_v45  ;;  %v2951_v8 = vsel %vm2740_vm6, %v2415_v56, %v2950_v51  ;;  %v2422_v9 = vadd.f32 %v2421_v58, %v2420_v48 }
 0x277   :  { %v2429_v10 = vadd.f32 %v2428_v60, %v2427_v49  ;;  %v2442_v11 = vrot.slane %v2441_v61, 1  ;;  %v3152_v12 = vadd.f32 %v3120_v57, %v2951_v8  ;;  %v2448_v15 = vadd.f32 %v2447_v4, %v2446_v53 }
 0x278   :  { %v2436_v13 = vadd.f32 %v2435_v3, %v2434_v52  ;;  %v2454_v16 = vrot.slane %v2453_v31, 2  ;;  %v2459_v18 = vrot.slane %v2458_v6, 4  ;;  %v2465_v21 = vadd.f32 %v679_v1, %v678_v0  ;;  %v4528_v3 = vld [vmem:[#allocation9] ss:$0 sm:$0xff] }
 0x279   :  { %v2443_v17 = vadd.f32 %v2442_v11, %v2441_v61  ;;  %v2952_v22 = vsel %vm2728_vm0, %v2429_v10, %v2422_v9  ;;  %v3184_v23 = vmul.f32 0.05882353, %v3152_v12  ;;  %v2449_v24 = vrot.slane %v2448_v15, 1 }
 0x27a   :  { %v2455_v27 = vadd.f32 %v2454_v16, %v2453_v31  ;;  %v2953_v25 = vsel %vm2730_vm1, %v2436_v13, %v2952_v22  ;;  %v2460_v28 = vadd.f32 %v2459_v18, %v2458_v6  ;;  %v2466_v29 = vrot.slane %v2465_v21, 4 }
 0x27b   :  { %v4513_v30 = vpop.f32.mrb[0].mxu1  ;;  %3866 = vmatprep.mubr.f32.mxu1 %v3184_v23  ;;  %v2450_v33 = vadd.f32 %v2449_v24, %v2448_v15  ;;  %v2954_v35 = vsel %vm2732_vm2, %v2443_v17, %v2953_v25  ;;  %v4532_v4 = vadd.f32 %v4434_v32, %v4528_v3  ;;  %v4536_v31 = vadd.f32 %v4528_v3, %v4436_v37 }
 0x27c   :  { %v2456_v34 = vrot.slane %v2455_v27, 1  ;;  %v4516_v36 = vpop.f32.mrb[1].mxu1  ;;  %v2461_v40 = vrot.slane %v2460_v28, 2  ;;  %v2467_v41 = vadd.f32 %v2466_v29, %v2465_v21  ;;  %v4540_v6 = vadd.f32 %v4528_v3, %v4441_v50 }
 0x27d   :  { %v2955_v45 = vsel %vm2734_vm3, %v2450_v33, %v2954_v35  ;;  %v3435_v8 = vmax.f32 %v4532_v4, 0.0  ;;  %v3434_v9 = vmax.f32 %v4536_v31, 0.0  ;;  %v4551_v11 = vadd.f32 %v4438_v46, %v4528_v3 }
 0x27e   :  { %v2457_v42 = vadd.f32 %v2456_v34, %v2455_v27  ;;  %v2462_v43 = vadd.f32 %v2461_v40, %v2460_v28  ;;  %v2468_v44 = vrot.slane %v2467_v41, 2  ;;  %v3436_v10 = vmax.f32 %v4540_v6, 0.0 }
 0x27f   :  { %v3466_v32 = vadd.f32 %v3435_v8, %v3434_v9  ;;  %v4557_v50 = vadd.f32 %v4528_v3, %v4445_v59  ;;  %v3437_v13 = vmax.f32 %v4551_v11, 0.0  ;;  %v4567_v46 = vadd.f32 %v4443_v55, %v4528_v3 }
 0x280   :  { %v2463_v47 = vrot.slane %v2462_v43, 1  ;;  %v2469_v48 = vadd.f32 %v2468_v44, %v2467_v41  ;;  %v2956_v49 = vsel %vm2736_vm4, %v2457_v42, %v2955_v45  ;;  %v4573_v59 = vadd.f32 %v4528_v3, %v4450_v7 }
 0x281   :  { %v3467_v37 = vadd.f32 %v3466_v32, %v3436_v10  ;;  %v3438_v16 = vmax.f32 %v4557_v50, 0.0  ;;  %v3439_v21 = vmax.f32 %v4567_v46, 0.0  ;;  %v4581_v24 = vadd.f32 %v4447_v2, %v4528_v3 }
 0x282   :  { %v2464_v26 = vadd.f32 %v2463_v47, %v2462_v43  ;;  %v2470_v51 = vrot.slane %v2469_v48, 1  ;;  %v3440_v22 = vmax.f32 %v4573_v59, 0.0  ;;  %v4587_v27 = vadd.f32 %v4528_v3, %v4455_v19 }
 0x283   :  { %v3468_v17 = vadd.f32 %v3467_v37, %v3437_v13  ;;  %v3441_v7 = vmax.f32 %v4581_v24, 0.0  ;;  %v4595_v29 = vadd.f32 %v4452_v14, %v4528_v3  ;;  %v4601_v33 = vadd.f32 %v4528_v3, %v4462_v62 }
 0x284   :  { %v2471_v52 = vadd.f32 %v2470_v51, %v2469_v48  ;;  %v2957_v53 = vsel %vm2738_vm5, %v2464_v26, %v2956_v49  ;;  %v3442_v25 = vmax.f32 %v4587_v27, 0.0  ;;  %v4609_v40 = vadd.f32 %v4460_v54, %v4528_v3 }
 0x285   :  { %v3469_v18 = vadd.f32 %v3468_v17, %v3438_v16  ;;  %v3443_v19 = vmax.f32 %v4595_v29, 0.0  ;;  %v3444_v34 = vmax.f32 %v4601_v33, 0.0  ;;  %v4615_v41 = vadd.f32 %v4528_v3, %v4480_v5 }
 0x286   :  { %v2958_v56 = vsel %vm2740_vm6, %v2471_v52, %v2957_v53  ;;  %v3445_v42 = vmax.f32 %v4609_v40, 0.0  ;;  %v4623_v54 = vadd.f32 %v4478_v63, %v4528_v3  ;;  %v4629_v5 = vadd.f32 %v4528_v3, %v4498_v38 }
 0x287   :  { %v3153_v57 = vadd.f32 %v3121_v39, %v2958_v56  ;;  %v3470_v23 = vadd.f32 %v3469_v18, %v3439_v21  ;;  %v3446_v44 = vmax.f32 %v4615_v41, 0.0  ;;  %v4637_v51 = vadd.f32 %v4496_v20, %v4528_v3 }
 0x288   :  { %v5045_v48 = vmax.f32 %v4623_v54, 0.0  ;;  %v5044_v49 = vmax.f32 %v4629_v5, 0.0  ;;  %v4643_v52 = vadd.f32 %v4528_v3, %v4516_v36  ;;  %v4651_v56 = vadd.f32 %v4513_v30, %v4528_v3 }
 0x289   :  { %v3185_v58 = vmul.f32 0.05882353, %v3153_v57  ;;  %v3471_v55 = vadd.f32 %v3470_v23, %v3440_v22  ;;  %v5043_v38 = vmax.f32 %v4637_v51, 0.0 }
 0x28a   :  { %v5042_v53 = vmax.f32 %v4643_v52, 0.0  ;;  %v5041_v36 = vmax.f32 %v4651_v56, 0.0 }
 0x28b   :  { %3867 = vmatmul.mubr.f32.gmra.mrb[14].mxu1 %v3185_v58  ;;  %v3472_v28 = vadd.f32 %v3471_v55, %v3441_v7 }
 0x28d   :  { %v3473_v2 = vadd.f32 %v3472_v28, %v3442_v25 }
 0x28f   :  { %v3474_v35 = vadd.f32 %v3473_v2, %v3443_v19 }
 0x291   :  { %v3475_v14 = vadd.f32 %v3474_v35, %v3444_v34 }
 0x293   :  { %v3476_v45 = vadd.f32 %v3475_v14, %v3445_v42 }
 0x295   :  { %v3477_v47 = vadd.f32 %v3476_v45, %v3446_v44 }
 0x297   :  { %v3478_v26 = vadd.f32 %v3477_v47, %v5045_v48 }
 0x299   :  { %v3479_v63 = vadd.f32 %v3478_v26, %v5044_v49 }
 0x29b   :  { %v3480_v39 = vadd.f32 %v3479_v63, %v5043_v38 }
 0x29c   :  { %v4522_v60 = vpop.f32.mrb[2].mxu1 }
 0x29d   :  { %v3365_v61 = vpop.f32.mrb[3].mxu1  ;;  %v3481_v20 = vadd.f32 %v3480_v39, %v5042_v53  ;;  %v4664_v37 = vadd.f32 %v4522_v60, %v4528_v3 }
 0x29e   :  { %v4656_v57 = vadd.f32 %v4528_v3, %v3365_v61 }
 0x29f   :  { %v3482_v32 = vadd.f32 %v3481_v20, %v5041_v36  ;;  %v5038_v61 = vmax.f32 %v4664_v37, 0.0 }
 0x2a0   :  { %v5040_v58 = vmax.f32 %v4656_v57, 0.0 }
 0x2a2   :  { %v3483_v30 = vadd.f32 %v3482_v32, %v5040_v58 }
 0x2a4   :  { %v3484_v28 = vadd.f32 %v3483_v30, %v5038_v61 }
 0x2bb   :  { %v4524_v0 = vpop.f32.mrb[4].mxu1 }
 0x2bc   :  { %v4526_v1 = vpop.f32.mrb[5].mxu1  ;;  %v4678_v60 = vadd.f32 %v4524_v0, %v4528_v3 }
 0x2bd   :  { %v4670_v17 = vadd.f32 %v4528_v3, %v4526_v1 }
 0x2be   :  { %v5035_v1 = vmax.f32 %v4678_v60, 0.0 }
 0x2bf   :  { %v5037_v55 = vmax.f32 %v4670_v17, 0.0 }
 0x2c1   :  { %v3485_v2 = vadd.f32 %v3484_v28, %v5037_v55 }
 0x2c3   :  { %v3486_v45 = vadd.f32 %v3485_v2, %v5035_v1 }
 0x2dc   :  { %v4559_v12 = vpop.f32.mrb[6].mxu1 }
 0x2dd   :  { %v3385_v15 = vpop.f32.mrb[7].mxu1  ;;  %v4691_v47 = vadd.f32 %v4559_v12, %v4528_v3 }
 0x2de   :  { %v4683_v35 = vadd.f32 %v4528_v3, %v3385_v15 }
 0x2df   :  { %v5033_v15 = vmax.f32 %v4691_v47, 0.0 }
 0x2e0   :  { %v5034_v14 = vmax.f32 %v4683_v35, 0.0 }
 0x2e2   :  { %v3487_v0 = vadd.f32 %v3486_v45, %v5034_v14 }
 0x2e4   :  { %v3488_v39 = vadd.f32 %v3487_v0, %v5033_v15 }
 0x2fd   :  { %v3859_v62 = vpop.f32.mrb[8].mxu1 }
 0x2fe   :  { %v3395_v43 = vpop.f32.mrb[9].mxu1  ;;  %v4703_v20 = vadd.f32 %v3859_v62, %v4528_v3 }
 0x2ff   :  { %v4696_v26 = vadd.f32 %v4528_v3, %v3395_v43 }
 0x300   :  { %v5036_v30 = vmax.f32 %v4703_v20, 0.0 }
 0x301   :  { %v5032_v63 = vmax.f32 %v4696_v26, 0.0 }
 0x303   :  { %v3489_v12 = vadd.f32 %v3488_v39, %v5032_v63 }
 0x305   :  { %v3490_v28 = vadd.f32 %v3489_v12, %v5036_v30 }
 0x31e   :  { %v3862_v18 = vpop.f32.mrb[10].mxu1 }
 0x31f   :  { %v3405_v23 = vpop.f32.mrb[11].mxu1  ;;  %v4715_v2 = vadd.f32 %v3862_v18, %v4528_v3 }
 0x320   :  { %v4708_v32 = vadd.f32 %v4528_v3, %v3405_v23 }
 0x321   :  { %v3461_v45 = vmax.f32 %v4715_v2, 0.0 }
 0x322   :  { %v5039_v43 = vmax.f32 %v4708_v32, 0.0 }
 0x324   :  { %v3491_v62 = vadd.f32 %v3490_v28, %v5039_v43 }
 0x326   :  { %v3492_v15 = vadd.f32 %v3491_v62, %v3461_v45 }
 0x33d   :  { %v3865_v0 = vpop.f32.mrb[12].mxu1 }
 0x33e   :  { %v3415_v39 = vpop.f32.mrb[13].mxu1  ;;  %v3421_v23 = vadd.f32 %v3865_v0, %v4528_v3 }
 0x33f   :  { %v3416_v63 = vadd.f32 %v4528_v3, %v3415_v39 }
 0x340   :  { %v3463_v1 = vmax.f32 %v3421_v23, 0.0 }
 0x341   :  { %v3462_v14 = vmax.f32 %v3416_v63, 0.0 }
 0x343   :  { %v3493_v12 = vadd.f32 %v3492_v15, %v3462_v14 }
 0x345   :  { %v3494_v30 = vadd.f32 %v3493_v12, %v3463_v1  ;;  %v5046_v12 = vmax.f32 %v4623_v54, 0.0 }
 0x35e   :  { %v3868_v18 = vpop.f32.mrb[14].mxu1 }
 0x35f   :  { %v3425_v55 = vpop.f32.mrb[15].mxu1  ;;  %v3431_v61 = vadd.f32 %v3868_v18, %v4528_v3 }
 0x360   :  { %v3426_v28 = vadd.f32 %v4528_v3, %v3425_v55 }
 0x361   :  { %v3465_v58 = vmax.f32 %v3431_v61, 0.0 }
 0x362   :  { %v3464_v43 = vmax.f32 %v3426_v28, 0.0  ;;  %v5047_v28 = vmax.f32 %v4629_v5, 0.0 }
 0x364   :  { %v3495_v36 = vadd.f32 %v3494_v30, %v3464_v43 }
 0x366   :  { %v3496_v53 = vadd.f32 %v3495_v36, %v3465_v58 }
 0x368   :  { %v3497_v0 = vrot.slane %v3496_v53, 4 }
 0x36a   :  { %v3498_v38 = vadd.f32 %v3497_v0, %v3496_v53 }
 0x36c   :  { %v3499_v39 = vrot.slane %v3498_v38, 2 }
 0x36e   :  { %v3500_v49 = vadd.f32 %v3499_v39, %v3498_v38  ;;  %v5048_v39 = vmax.f32 %v4637_v51, 0.0 }
 0x370   :  { %v3501_v48 = vrot.slane %v3500_v49, 1 }
 0x372   :  { %v3502_v62 = vadd.f32 %v3501_v48, %v3500_v49 }
 0x374   :  { %v4726_v63 = vmul.f32 0.00390625, %v3502_v62 }
 0x376   :  { %v4729_v15 = vsub.f32 %v3462_v14, %v4726_v63  ;;  %v4732_v23 = vsub.f32 %v3463_v1, %v4726_v63  ;;  %v4735_v3 = vsub.f32 %v3464_v43, %v4726_v63  ;;  %v4738_v61 = vsub.f32 %v3465_v58, %v4726_v63 }
 0x377   :  { %v4743_v38 = vsub.f32 %v3434_v9, %v4726_v63  ;;  %v4748_v48 = vsub.f32 %v3435_v8, %v4726_v63  ;;  %v4753_v49 = vsub.f32 %v3436_v10, %v4726_v63  ;;  %v4762_v31 = vsub.f32 %v3437_v13, %v4726_v63 }
 0x378   :  { %v4767_v4 = vsub.f32 %v3438_v16, %v4726_v63  ;;  %v4774_v9 = vsub.f32 %v3439_v21, %v4726_v63  ;;  %v4781_v13 = vsub.f32 %v3440_v22, %v4726_v63  ;;  %v4788_v58 = vsub.f32 %v3441_v7, %v4726_v63 }
 0x379   :  { %v3536_v53 = vmul.f32 %v4743_v38, %v4743_v38  ;;  %v3537_v36 = vmul.f32 %v4748_v48, %v4748_v48  ;;  %v3538_v6 = vmul.f32 %v4753_v49, %v4753_v49  ;;  %v3539_v10 = vmul.f32 %v4762_v31, %v4762_v31 }
 0x37a   :  { %v3540_v50 = vmul.f32 %v4767_v4, %v4767_v4  ;;  %v3541_v46 = vmul.f32 %v4774_v9, %v4774_v9  ;;  %v4795_v55 = vsub.f32 %v3442_v25, %v4726_v63  ;;  %v3542_v59 = vmul.f32 %v4781_v13, %v4781_v13 }
 0x37b   :  { %v3568_v8 = vadd.f32 %v3537_v36, %v3536_v53  ;;  %v4802_v1 = vsub.f32 %v3443_v19, %v4726_v63  ;;  %v3543_v24 = vmul.f32 %v4788_v58, %v4788_v58  ;;  %v4809_v14 = vsub.f32 %v3444_v34, %v4726_v63 }
 0x37c   :  { %v3544_v27 = vmul.f32 %v4795_v55, %v4795_v55  ;;  %v4816_v30 = vsub.f32 %v3445_v42, %v4726_v63  ;;  %v4823_v43 = vsub.f32 %v3446_v44, %v4726_v63  ;;  %v4830_v18 = vsub.f32 %v5046_v12, %v4726_v63 }
 0x37d   :  { %v3569_v11 = vadd.f32 %v3568_v8, %v3538_v6  ;;  %v3545_v29 = vmul.f32 %v4802_v1, %v4802_v1  ;;  %v3546_v33 = vmul.f32 %v4809_v14, %v4809_v14  ;;  %v4837_v0 = vsub.f32 %v5047_v28, %v4726_v63 }
 0x37e   :  { %v3547_v40 = vmul.f32 %v4816_v30, %v4816_v30  ;;  %v3548_v41 = vmul.f32 %v4823_v43, %v4823_v43  ;;  %v4844_v62 = vsub.f32 %v5048_v39, %v4726_v63  ;;  %v3549_v54 = vmul.f32 %v4830_v18, %v4830_v18 }
 0x37f   :  { %v3570_v16 = vadd.f32 %v3569_v11, %v3539_v10  ;;  %v5049_v36 = vmax.f32 %v4643_v52, 0.0  ;;  %v3550_v5 = vmul.f32 %v4837_v0, %v4837_v0  ;;  %v5050_v10 = vmax.f32 %v4651_v56, 0.0 }
 0x380   :  { %v3551_v51 = vmul.f32 %v4844_v62, %v4844_v62  ;;  %v3565_v2 = vmul.f32 %v4732_v23, %v4732_v23 }
 0x381   :  { %v3571_v21 = vadd.f32 %v3570_v16, %v3540_v50  ;;  %v4851_v6 = vsub.f32 %v5049_v36, %v4726_v63  ;;  %v4858_v11 = vsub.f32 %v5050_v10, %v4726_v63  ;;  %v5051_v16 = vmax.f32 %v4656_v57, 0.0 }
 0x383   :  { %v3572_v22 = vadd.f32 %v3571_v21, %v3541_v46  ;;  %v4865_v46 = vsub.f32 %v5051_v16, %v4726_v63  ;;  %v3552_v52 = vmul.f32 %v4851_v6, %v4851_v6  ;;  %v3553_v56 = vmul.f32 %v4858_v11, %v4858_v11 }
 0x385   :  { %v3573_v7 = vadd.f32 %v3572_v22, %v3542_v59  ;;  %v5052_v59 = vmax.f32 %v4664_v37, 0.0  ;;  %v3554_v57 = vmul.f32 %v4865_v46, %v4865_v46 }
 0x387   :  { %v3574_v25 = vadd.f32 %v3573_v7, %v3543_v24  ;;  %v4872_v22 = vsub.f32 %v5052_v59, %v4726_v63  ;;  %v5053_v7 = vmax.f32 %v4670_v17, 0.0 }
 0x389   :  { %v3575_v19 = vadd.f32 %v3574_v25, %v3544_v27  ;;  %v4879_v27 = vsub.f32 %v5053_v7, %v4726_v63  ;;  %v3555_v37 = vmul.f32 %v4872_v22, %v4872_v22 }
 0x38b   :  { %v3576_v34 = vadd.f32 %v3575_v19, %v3545_v29  ;;  %v5054_v29 = vmax.f32 %v4678_v60, 0.0  ;;  %v3556_v17 = vmul.f32 %v4879_v27, %v4879_v27 }
 0x38d   :  { %v3577_v42 = vadd.f32 %v3576_v34, %v3546_v33  ;;  %v4886_v19 = vsub.f32 %v5054_v29, %v4726_v63  ;;  %v5055_v34 = vmax.f32 %v4683_v35, 0.0 }
 0x38f   :  { %v3578_v44 = vadd.f32 %v3577_v42, %v3547_v40  ;;  %v4893_v12 = vsub.f32 %v5055_v34, %v4726_v63  ;;  %v5056_v42 = vmax.f32 %v4691_v47, 0.0  ;;  %v3557_v60 = vmul.f32 %v4886_v19, %v4886_v19 }
 0x391   :  { %v3579_v53 = vadd.f32 %v3578_v44, %v3548_v41  ;;  %v4900_v28 = vsub.f32 %v5056_v42, %v4726_v63  ;;  %v5057_v44 = vmax.f32 %v4696_v26, 0.0  ;;  %v3558_v35 = vmul.f32 %v4893_v12, %v4893_v12 }
 0x393   :  { %v3580_v8 = vadd.f32 %v3579_v53, %v3549_v54  ;;  %v4907_v39 = vsub.f32 %v5057_v44, %v4726_v63  ;;  %v5058_v53 = vmax.f32 %v4703_v20, 0.0  ;;  %v3559_v47 = vmul.f32 %v4900_v28, %v4900_v28 }
 0x394   :  { %v3611_v44 = vlaneseq }
 0x395   :  { %v3581_v50 = vadd.f32 %v3580_v8, %v3550_v5  ;;  %v4914_v36 = vsub.f32 %v5058_v53, %v4726_v63  ;;  %v5059_v8 = vmax.f32 %v4708_v32, 0.0  ;;  %v3560_v26 = vmul.f32 %v4907_v39, %v4907_v39 }
 0x397   :  { %v3582_v21 = vadd.f32 %v3581_v50, %v3551_v51  ;;  %v4921_v10 = vsub.f32 %v5059_v8, %v4726_v63  ;;  %v4928_v50 = vsub.f32 %v3461_v45, %v4726_v63  ;;  %v3561_v20 = vmul.f32 %v4914_v36, %v4914_v36 }
 0x398   :  { %v3566_v63 = vmul.f32 %v4735_v3, %v4735_v3 }
 0x399   :  { %v3583_v24 = vadd.f32 %v3582_v21, %v3552_v52  ;;  %v3562_v52 = vmul.f32 %v4921_v10, %v4921_v10  ;;  %v3563_v32 = vmul.f32 %v4928_v50, %v4928_v50 }
 0x39b   :  { %v3584_v25 = vadd.f32 %v3583_v24, %v3553_v56  ;;  %v3564_v56 = vmul.f32 %v4729_v15, %v4729_v15 }
 0x39d   :  { %v3585_v33 = vadd.f32 %v3584_v25, %v3554_v57  ;;  %v3567_v57 = vmul.f32 %v4738_v61, %v4738_v61 }
 0x39f   :  { %v3586_v40 = vadd.f32 %v3585_v33, %v3555_v37 }
 0x3a1   :  { %v3587_v41 = vadd.f32 %v3586_v40, %v3556_v17 }
 0x3a3   :  { %v3588_v54 = vadd.f32 %v3587_v41, %v3557_v60 }
 0x3a5   :  { %v3589_v5 = vadd.f32 %v3588_v54, %v3558_v35  ;;  %v3612_v35 = vshrl.u32 %v3611_v44, 7  ;;  %v3608_v54 = vld [vmem:[#allocation11] sm:$0x1] }
 0x3a7   :  { %v3590_v51 = vadd.f32 %v3589_v5, %v3559_v47  ;;  %v3613_v53 = vsub.s32 0, %v3612_v35 }
 0x3a9   :  { %v3591_v16 = vadd.f32 %v3590_v51, %v3560_v26  ;;  %v4944_v26 = vld [vmem:[#allocation12] ss:$0 sm:$0xff] }
 0x3ab   :  { %v3592_v21 = vadd.f32 %v3591_v16, %v3561_v20 }
 0x3ad   :  { %v3593_v59 = vadd.f32 %v3592_v21, %v3562_v52 }
 0x3af   :  { %v3594_v24 = vadd.f32 %v3593_v59, %v3563_v32 }
 0x3b1   :  { %v3595_v45 = vadd.f32 %v3594_v24, %v3564_v56 }
 0x3b3   :  { %v3596_v7 = vadd.f32 %v3595_v45, %v3565_v2 }
 0x3b5   :  { %v3597_v25 = vadd.f32 %v3596_v7, %v3566_v63 }
 0x3b7   :  { %v3598_v29 = vadd.f32 %v3597_v25, %v3567_v57 }
 0x3b9   :  { %v3599_v37 = vrot.slane %v3598_v29, 4 }
 0x3bb   :  { %v3600_v33 = vadd.f32 %v3599_v37, %v3598_v29 }
 0x3bd   :  { %v3601_v34 = vrot.slane %v3600_v33, 2 }
 0x3bf   :  { %v3602_v17 = vadd.f32 %v3601_v34, %v3600_v33 }
 0x3c1   :  { %v3603_v40 = vrot.slane %v3602_v17, 1 }
 0x3c3   :  { %v3604_v42 = vadd.f32 %v3603_v40, %v3602_v17 }
 0x3c5   :  { %v3605_v60 = vmul.f32 0.00390625, %v3604_v42 }
 0x3c7   :  { %v3606_v41 = vadd.f32 1e-05, %v3605_v60 }
 0x3c9   :  { %3926 = vrsqrt.f32 %v3606_v41 }
 0x3d3   :  { %v3927_v47 = vpop.eup %3926 }
 0x3d4   :  { %v3609_v5 = vmul.f32 %v3927_v47, %v3608_v54 }
 0x3d6   :  { %v3614_v8 = vrot.slane %v3609_v5, %v3613_v53 }
 0x3d8   :  { %v3646_v51 = vmul.f32 %v3614_v8, %v4735_v3  ;;  %v3616_v20 = vmul.f32 %v3614_v8, %v4743_v38  ;;  %v3617_v16 = vmul.f32 %v3614_v8, %v4748_v48  ;;  %v3618_v52 = vmul.f32 %v3614_v8, %v4753_v49 }
 0x3d9   :  { %v3619_v21 = vmul.f32 %v3614_v8, %v4762_v31  ;;  %v3620_v32 = vmul.f32 %v3614_v8, %v4767_v4  ;;  %v3621_v59 = vmul.f32 %v3614_v8, %v4774_v9  ;;  %v3622_v56 = vmul.f32 %v3614_v8, %v4781_v13 }
 0x3da   :  { %v3685_v24 = vadd.f32 %v4944_v26, %v3646_v51  ;;  %v3623_v2 = vmul.f32 %v3614_v8, %v4788_v58  ;;  %v3624_v3 = vmul.f32 %v3614_v8, %v4795_v55  ;;  %v3625_v38 = vmul.f32 %v3614_v8, %v4802_v1 }
 0x3db   :  { %v3626_v48 = vmul.f32 %v3614_v8, %v4809_v14  ;;  %v3627_v49 = vmul.f32 %v3614_v8, %v4816_v30  ;;  %v3628_v31 = vmul.f32 %v3614_v8, %v4823_v43  ;;  %v3629_v4 = vmul.f32 %v3614_v8, %v4830_v18 }
 0x3dc   :  { %3717 = vst [vmem:[#allocation14 + $0xf0] sm:$0xff] %v3685_v24  ;;  %v3630_v9 = vmul.f32 %v3614_v8, %v4837_v0  ;;  %v3631_v13 = vmul.f32 %v3614_v8, %v4844_v62  ;;  %v3632_v45 = vmul.f32 %v3614_v8, %v4851_v6  ;;  %v3633_v58 = vmul.f32 %v3614_v8, %v4858_v11 }
 0x3dd   :  { %v3634_v55 = vmul.f32 %v3614_v8, %v4865_v46  ;;  %v3635_v1 = vmul.f32 %v3614_v8, %v4872_v22  ;;  %v3636_v14 = vmul.f32 %v3614_v8, %v4879_v27  ;;  %v3637_v30 = vmul.f32 %v3614_v8, %v4886_v19 }
 0x3de   :  { %v3638_v43 = vmul.f32 %v3614_v8, %v4893_v12  ;;  %v3639_v18 = vmul.f32 %v3614_v8, %v4900_v28  ;;  %v3640_v0 = vmul.f32 %v3614_v8, %v4907_v39  ;;  %v3641_v62 = vmul.f32 %v3614_v8, %v4914_v36 }
 0x3df   :  { %v3642_v6 = vmul.f32 %v3614_v8, %v4921_v10  ;;  %v3643_v11 = vmul.f32 %v3614_v8, %v4928_v50  ;;  %v3644_v46 = vmul.f32 %v3614_v8, %v4729_v15  ;;  %v3645_v22 = vmul.f32 %v3614_v8, %v4732_v23 }
 0x3e0   :  { %v3647_v27 = vmul.f32 %v3614_v8, %v4738_v61  ;;  %v3655_v19 = vadd.f32 %v4944_v26, %v3616_v20  ;;  %v3656_v12 = vadd.f32 %v4944_v26, %v3617_v16  ;;  %v3657_v28 = vadd.f32 %v4944_v26, %v3618_v52 }
 0x3e1   :  { %v3658_v39 = vadd.f32 %v4944_v26, %v3619_v21  ;;  %v3659_v36 = vadd.f32 %v4944_v26, %v3620_v32  ;;  %v3660_v10 = vadd.f32 %v4944_v26, %v3621_v59  ;;  %v3661_v50 = vadd.f32 %v4944_v26, %v3622_v56 }
 0x3e2   :  { %v3662_v15 = vadd.f32 %v4944_v26, %v3623_v2  ;;  %v3663_v23 = vadd.f32 %v4944_v26, %v3624_v3  ;;  %v3664_v61 = vadd.f32 %v4944_v26, %v3625_v38  ;;  %v3665_v63 = vadd.f32 %v4944_v26, %v3626_v48  ;;  %3687 = vst [vmem:[#allocation14] sm:$0xff] %v3655_v19 }
 0x3e3   :  { %3688 = vst [vmem:[#allocation14 + $0x8] sm:$0xff] %v3656_v12  ;;  %3689 = vst [vmem:[#allocation14 + $0x10] sm:$0xff] %v3657_v28  ;;  %v3666_v7 = vadd.f32 %v4944_v26, %v3627_v49  ;;  %v3667_v57 = vadd.f32 %v4944_v26, %v3628_v31  ;;  %v3668_v25 = vadd.f32 %v4944_v26, %v3629_v4 }
 0x3e4   :  { %v3669_v29 = vadd.f32 %v4944_v26, %v3630_v9  ;;  %3690 = vst [vmem:[#allocation14 + $0x18] sm:$0xff] %v3658_v39  ;;  %3691 = vst [vmem:[#allocation14 + $0x20] sm:$0xff] %v3659_v36  ;;  %v3670_v37 = vadd.f32 %v4944_v26, %v3631_v13  ;;  %v3671_v33 = vadd.f32 %v4944_v26, %v3632_v45 }
 0x3e5   :  { %3692 = vst [vmem:[#allocation14 + $0x28] sm:$0xff] %v3660_v10  ;;  %3693 = vst [vmem:[#allocation14 + $0x30] sm:$0xff] %v3661_v50  ;;  %v3672_v34 = vadd.f32 %v4944_v26, %v3633_v58  ;;  %v3673_v17 = vadd.f32 %v4944_v26, %v3634_v55  ;;  %v3674_v40 = vadd.f32 %v4944_v26, %v3635_v1 }
 0x3e6   :  { %3694 = vst [vmem:[#allocation14 + $0x38] sm:$0xff] %v3662_v15  ;;  %3695 = vst [vmem:[#allocation14 + $0x40] sm:$0xff] %v3663_v23  ;;  %v3675_v42 = vadd.f32 %v4944_v26, %v3636_v14  ;;  %v3676_v60 = vadd.f32 %v4944_v26, %v3637_v30  ;;  %v3677_v41 = vadd.f32 %v4944_v26, %v3638_v43 }
 0x3e7   :  { %3696 = vst [vmem:[#allocation14 + $0x48] sm:$0xff] %v3664_v61  ;;  %3697 = vst [vmem:[#allocation14 + $0x50] sm:$0xff] %v3665_v63  ;;  %v3678_v44 = vadd.f32 %v4944_v26, %v3639_v18  ;;  %v3679_v35 = vadd.f32 %v4944_v26, %v3640_v0  ;;  %v3680_v54 = vadd.f32 %v4944_v26, %v3641_v62 }
 0x3e8   :  { %3698 = vst [vmem:[#allocation14 + $0x58] sm:$0xff] %v3666_v7  ;;  %3699 = vst [vmem:[#allocation14 + $0x60] sm:$0xff] %v3667_v57  ;;  %v3681_v53 = vadd.f32 %v4944_v26, %v3642_v6  ;;  %v3682_v47 = vadd.f32 %v4944_v26, %v3643_v11  ;;  %v3683_v5 = vadd.f32 %v4944_v26, %v3644_v46 }
 0x3e9   :  { %3700 = vst [vmem:[#allocation14 + $0x68] sm:$0xff] %v3668_v25  ;;  %3701 = vst [vmem:[#allocation14 + $0x70] sm:$0xff] %v3669_v29  ;;  %v3684_v8 = vadd.f32 %v4944_v26, %v3645_v22  ;;  %v3686_v51 = vadd.f32 %v4944_v26, %v3647_v27 }
 0x3ea   :  { %3702 = vst [vmem:[#allocation14 + $0x78] sm:$0xff] %v3670_v37  ;;  %3703 = vst [vmem:[#allocation14 + $0x80] sm:$0xff] %v3671_v33 }
 0x3eb   :  { %3704 = vst [vmem:[#allocation14 + $0x88] sm:$0xff] %v3672_v34  ;;  %3705 = vst [vmem:[#allocation14 + $0x90] sm:$0xff] %v3673_v17 }
 0x3ec   :  { %3706 = vst [vmem:[#allocation14 + $0x98] sm:$0xff] %v3674_v40  ;;  %3707 = vst [vmem:[#allocation14 + $0xa0] sm:$0xff] %v3675_v42 }
 0x3ed   :  { %3708 = vst [vmem:[#allocation14 + $0xa8] sm:$0xff] %v3676_v60  ;;  %3709 = vst [vmem:[#allocation14 + $0xb0] sm:$0xff] %v3677_v41 }
 0x3ee   :  { %3710 = vst [vmem:[#allocation14 + $0xb8] sm:$0xff] %v3678_v44  ;;  %3711 = vst [vmem:[#allocation14 + $0xc0] sm:$0xff] %v3679_v35 }
 0x3ef   :  { %3712 = vst [vmem:[#allocation14 + $0xc8] sm:$0xff] %v3680_v54  ;;  %3713 = vst [vmem:[#allocation14 + $0xd0] sm:$0xff] %v3681_v53 }
 0x3f0   :  { %3714 = vst [vmem:[#allocation14 + $0xd8] sm:$0xff] %v3682_v47  ;;  %3715 = vst [vmem:[#allocation14 + $0xe0] sm:$0xff] %v3683_v5 }
 0x3f1   :  { %3716 = vst [vmem:[#allocation14 + $0xe8] sm:$0xff] %v3684_v8  ;;  %3718 = vst [vmem:[#allocation14 + $0xf8] sm:$0xff] %v3686_v51 }
 0x3f2   :  { %4071 = shalt.err (!%p4068_p10)
}
 0x3f3   :  { %s4072_s26 = scalar_lea.hbm %s5031_s6, 4096 }
 0x3f4   :  { %p4073_p11 = scmp.ne.s32.totalorder %s5031_s6, %s4072_s26  ;;  %p4076_p12 = scmp.lt.u32.totalorder %s4072_s26, %s5031_s6 }
 0x3f6   :  { %p4078_p13 = pnand %p4076_p12, %p4073_p11 }
 0x3f8   :  { %4081 = shalt.err (!%p4078_p13)
}
 0x3f9   :  { %3730 = dma.vmem_to_hbm [thread:$0]  %s3725_s21, 4096, %s5031_s6, [#allocation5], %s4094_s9, %s4094_s9, %s4095_s10  }
 0x3fa   :  { %4090 = dma.done.wait [#allocation5], 4096  }
 0x3fb   :  { %4091 = vsyncadd [#allocation5], 4294963200 }
 0x3fc   :  { %3734 = vsyncpa [#allocation4], 1 }
 0x3fd   :  { %3735 = vsyncpa [#allocation7], 1 }
 0x3fe   :  { %3736 = vsyncpa [#allocation10], 1 }
 0x3ff   :  { %3737 = vsyncpa [#allocation13], 1 }
 0x400   :  { %3738 = vsyncpa [#allocation5], 1 }

</bundles_post_ra>
